<compile_context>
chip_gen: v7x
topology: tpu7x:2x2x1
jax: 0.10.0
libtpu: 0.0.40
codegen_flags: <defaults>
</compile_context>

<pallas_src>
import functools
import math

import jax
import jax.numpy as jnp
from jax.experimental import pallas as pl
from jax.experimental.pallas import tpu as pltpu

# ---- small, forward-consistent sizes ----
B = 4        # batch of datasets
N_SET = 8    # outer set size (instances)
M_SET = 16   # inner set size (features per instance)
H0 = 32      # hidden_size_0
H1 = 32      # hidden_size_1  (2*H1 = 64, 4*H1 = 128, 8*H1 = 256)
PRED = 64    # predlast_hidden_size (2*PRED = 128)
META = 27    # meta_size
OUT = 3      # out_classes
BN_EPS = 1e-5

_VMEM = pl.BlockSpec(memory_space=pltpu.MemorySpace.VMEM)


# ----------------------------------------------------------------------------
# Fused kernel: pos branch + neg branch (shared weights, run once on stacked
# rows) -> split -> regressor (BN pre-folded, dropout = identity in eval).
# ----------------------------------------------------------------------------
def _fused_forward_kernel(pos_ref, neg_ref, y_ref,
                          a_e0, w_e0, b_e0,            # EquivLinear(1 -> H0)
                          w_i0, b_i0,                  # InvLinear(H0 -> H0)
                          a_e1, w_e1, b_e1,            # EquivLinear(H0 -> 2*H1)
                          w_i1, b_i1,                  # InvLinear(2*H1 -> 4*H1)
                          w1p, w1n, w1m, b1f,          # Linear_1 (BN1 folded, row-split)
                          w2f, b2f,                    # Linear_2 (BN2 folded)
                          w3, b3,                      # Linear_3
                          out_ref, *, batch, n_set, m_set, h0, h1):
    f32 = jnp.float32
    rows = 2 * batch * n_set

    # Stack pos and neg along the row (sublane) axis: run the branch once.
    x = jnp.concatenate([pos_ref[...], neg_ref[...]], axis=0)      # (2BN, M) f32

    # --- equiv_0: EquivLinear(1 -> H0) over inner set of M scalars,
    #     fused with ReLU and the inner mean; pure 2D VPU work (no 3D temp). ---
    mean0 = jnp.mean(x, axis=1, keepdims=True)                     # (2BN, 1)
    h_inv0 = mean0 * w_e0[...] + b_e0[...]                         # (2BN, H0)
    a0 = a_e0[...]                                                 # (1, H0)
    acc = jnp.zeros((rows, h0), f32)
    for m in range(m_set):                                         # static unroll, M small
        acc = acc + jnp.maximum(x[:, m:m + 1] * a0 + h_inv0, 0.0)
    z0_mean = acc * (1.0 / m_set)                                  # mean_m(relu(equiv_0))

    # --- inv_0: InvLinear(H0 -> H0) ---
    y1 = jnp.dot(z0_mean, w_i0[...], preferred_element_type=f32) + b_i0[...]   # (2BN, H0)

    # --- equiv_1: EquivLinear(H0 -> 2*H1) over the outer set of N elements ---
    y1_sets = y1.reshape(2 * batch, n_set, h0)                     # (2B, N, H0)
    h_inv1 = jnp.dot(jnp.mean(y1_sets, axis=1), w_e1[...],
                     preferred_element_type=f32) + b_e1[...]       # (2B, 2*H1)
    y2 = (jnp.dot(y1, a_e1[...], preferred_element_type=f32)
          .reshape(2 * batch, n_set, 2 * h1)
          + h_inv1[:, None, :])                                    # (2B, N, 2*H1)
    z2 = jnp.maximum(y2, 0.0)                                      # ReLU

    # --- inv_1: InvLinear(2*H1 -> 4*H1), mean over the N elements ---
    branch = jnp.dot(jnp.mean(z2, axis=1), w_i1[...],
                     preferred_element_type=f32) + b_i1[...]       # (2B, 4*H1)

    pos_vec = branch[:batch]                                       # (B, 4*H1)
    neg_vec = branch[batch:]                                       # (B, 4*H1)

    # --- regressor: Linear(+BN folded) -> ReLU -> [Dropout] -> Linear(+BN folded)
    #     -> ReLU -> [Dropout] -> Linear.  The hstack([pos, neg, y]) is replaced
    #     by a row-split first matmul (lane-aligned, no (B, 283) concat). ---
    # TODO(synk): Dropout(0.7)/Dropout(0.5) are identity in eval mode; train-mode
    # stochastic masking is not implemented here.
    h = (jnp.dot(pos_vec, w1p[...], preferred_element_type=f32)
         + jnp.dot(neg_vec, w1n[...], preferred_element_type=f32)
         + jnp.dot(y_ref[...], w1m[...], preferred_element_type=f32)
         + b1f[...])
    h = jnp.maximum(h, 0.0)
    h = jnp.maximum(jnp.dot(h, w2f[...], preferred_element_type=f32) + b2f[...], 0.0)
    out = jnp.dot(h, w3[...], preferred_element_type=f32) + b3[...]
    out_ref[...] = out.astype(out_ref.dtype)


# ----------------------------------------------------------------------------
# Wrapper: single pallas_call, whole-array VMEM specs (footprint << VMEM on
# v5e/v6e/v7x, so no grid / pipelining — the grid would only add per-step cost).
# ----------------------------------------------------------------------------
@jax.jit
def deepset_model_v5_forward(pos, neg, y, prepared_params):
    b, n, m = pos.shape
    p = prepared_params
    kernel = functools.partial(_fused_forward_kernel,
                               batch=b, n_set=n, m_set=m, h0=H0, h1=H1)
    args = (pos.reshape(b * n, m), neg.reshape(b * n, m), y.reshape(b, META),
            p['a_e0'], p['w_e0'], p['b_e0'],
            p['w_i0'], p['b_i0'],
            p['a_e1'], p['w_e1'], p['b_e1'],
            p['w_i1'], p['b_i1'],
            p['w1_pos'], p['w1_neg'], p['w1_meta'], p['b1f'],
            p['w2f'], p['b2f'],
            p['w3'], p['b3'])

    # Advisory cost estimate (matmul MACs * 2; all operands + output bytes).
    r = 2 * b * n
    flops = 2 * (r * H0 * H0                       # inv_0
                 + 2 * b * H0 * (2 * H1)           # equiv_1 (invariant part)
                 + r * H0 * (2 * H1)               # equiv_1 (equivariant part)
                 + 2 * b * (2 * H1) * (4 * H1)     # inv_1
                 + 2 * b * (4 * H1) * (2 * PRED)   # regressor w1_pos + w1_neg
                 + b * META * (2 * PRED)           # regressor w1_meta
                 + b * (2 * PRED) * PRED           # regressor w2
                 + b * PRED * OUT)                 # regressor w3
    bytes_accessed = sum(int(a.size) * a.dtype.itemsize for a in args) + b * OUT * 4
    cost = pl.CostEstimate(flops=flops, transcendentals=0,
                           bytes_accessed=bytes_accessed)

    return pl.pallas_call(
        kernel,
        out_shape=jax.ShapeDtypeStruct((b, OUT), jnp.float32),
        in_specs=[_VMEM] * len(args),
        out_specs=_VMEM,
        cost_estimate=cost,
    )(*args)


# ----------------------------------------------------------------------------
# Deterministic parameter init (shapes from DeepSetModelV5.__init__) and
# param preparation (fold BN into the preceding Linear, split w1 rows).
# ----------------------------------------------------------------------------
def init_params(key):
    def xavier(k, shape):
        fan_in, fan_out = shape
        lim = math.sqrt(6.0 / (fan_in + fan_out))
        return jax.random.uniform(k, shape, jnp.float32, -lim, lim)

    ks = jax.random.split(key, 9)
    p = {}
    # equiv_0: EquivLinear(1, H0)   -> alpha (1,H0), weight (1,H0), bias (1,H0)
    p['a_e0'] = xavier(ks[0], (1, H0))
    p['w_e0'] = xavier(ks[1], (1, H0))
    p['b_e0'] = jnp.zeros((1, H0), jnp.float32)
    # inv_0: InvLinear(H0, H0)      -> weight (H0,H0), bias (1,H0)
    p['w_i0'] = xavier(ks[2], (H0, H0))
    p['b_i0'] = jnp.zeros((1, H0), jnp.float32)
    # equiv_1: EquivLinear(H0, 2*H1)
    p['a_e1'] = xavier(ks[3], (H0, 2 * H1))
    p['w_e1'] = xavier(ks[4], (H0, 2 * H1))
    p['b_e1'] = jnp.zeros((1, 2 * H1), jnp.float32)
    # inv_1: InvLinear(2*H1, 4*H1)
    p['w_i1'] = xavier(ks[5], (2 * H1, 4 * H1))
    p['b_i1'] = jnp.zeros((1, 4 * H1), jnp.float32)
    # regressor: Linear + BN + ReLU + Dropout + Linear + BN + ReLU + Dropout + Linear
    d_in = 8 * H1 + META
    p['w1'] = xavier(ks[6], (d_in, 2 * PRED))
    p['b1'] = jnp.zeros((1, 2 * PRED), jnp.float32)
    p['g1'] = jnp.ones((1, 2 * PRED), jnp.float32)      # BN1 gamma
    p['be1'] = jnp.zeros((1, 2 * PRED), jnp.float32)    # BN1 beta
    p['rm1'] = jnp.zeros((1, 2 * PRED), jnp.float32)    # BN1 running_mean
    p['rv1'] = jnp.ones((1, 2 * PRED), jnp.float32)     # BN1 running_var
    p['w2'] = xavier(ks[7], (2 * PRED, PRED))
    p['b2'] = jnp.zeros((1, PRED), jnp.float32)
    p['g2'] = jnp.ones((1, PRED), jnp.float32)
    p['be2'] = jnp.zeros((1, PRED), jnp.float32)
    p['rm2'] = jnp.zeros((1, PRED), jnp.float32)
    p['rv2'] = jnp.ones((1, PRED), jnp.float32)
    p['w3'] = xavier(ks[8], (PRED, OUT))
    p['b3'] = jnp.zeros((1, OUT), jnp.float32)
    return p


def prepare_params(p):
    """Fold eval-mode BatchNorm into the preceding Linear and split w1 into the
    pos / neg / meta row blocks consumed by the fused kernel."""
    s1 = p['g1'] / jnp.sqrt(p['rv1'] + BN_EPS)              # (1, 2*PRED)
    w1f = p['w1'] * s1                                      # scale columns
    b1f = (p['b1'] - p['rm1']) * s1 + p['be1']
    s2 = p['g2'] / jnp.sqrt(p['rv2'] + BN_EPS)
    w2f = p['w2'] * s2
    b2f = (p['b2'] - p['rm2']) * s2 + p['be2']

    fp = {k: p[k] for k in ('a_e0', 'w_e0', 'b_e0', 'w_i0', 'b_i0',
                            'a_e1', 'w_e1', 'b_e1', 'w_i1', 'b_i1',
                            'w3', 'b3')}
    fp['w1_pos'] = w1f[:4 * H1]            # rows multiplying pos_vec
    fp['w1_neg'] = w1f[4 * H1:8 * H1]      # rows multiplying neg_vec
    fp['w1_meta'] = w1f[8 * H1:]           # rows multiplying meta features y
    fp['b1f'] = b1f
    fp['w2f'] = w2f
    fp['b2f'] = b2f
    return fp


if __name__ == "__main__":
    key = jax.random.PRNGKey(0)
    kp, kn, ky, kw = jax.random.split(key, 4)
    pos = jax.random.normal(kp, (B, N_SET, M_SET), jnp.float32)
    neg = jax.random.normal(kn, (B, N_SET, M_SET), jnp.float32)
    y_meta = jax.random.normal(ky, (B, META), jnp.float32)
    params = prepare_params(init_params(kw))

    out = deepset_model_v5_forward(pos, neg, y_meta, params)
    out = jax.block_until_ready(out)
    assert out.shape == (B, OUT) and out.dtype == jnp.float32
    print("KERNEL_OK")
</pallas_src>

<mosaic_0001>
module attributes {stable_mosaic.version = 11 : i64} {
  func.func @_fused_forward_kernel(%arg0: memref<32x16xf32, #tpu.memory_space<vmem>>, %arg1: memref<32x16xf32, #tpu.memory_space<vmem>>, %arg2: memref<4x27xf32, #tpu.memory_space<vmem>>, %arg3: memref<1x32xf32, #tpu.memory_space<vmem>>, %arg4: memref<1x32xf32, #tpu.memory_space<vmem>>, %arg5: memref<1x32xf32, #tpu.memory_space<vmem>>, %arg6: memref<32x32xf32, #tpu.memory_space<vmem>>, %arg7: memref<1x32xf32, #tpu.memory_space<vmem>>, %arg8: memref<32x64xf32, #tpu.memory_space<vmem>>, %arg9: memref<32x64xf32, #tpu.memory_space<vmem>>, %arg10: memref<1x64xf32, #tpu.memory_space<vmem>>, %arg11: memref<64x128xf32, #tpu.memory_space<vmem>>, %arg12: memref<1x128xf32, #tpu.memory_space<vmem>>, %arg13: memref<128x128xf32, #tpu.memory_space<vmem>>, %arg14: memref<128x128xf32, #tpu.memory_space<vmem>>, %arg15: memref<27x128xf32, #tpu.memory_space<vmem>>, %arg16: memref<1x128xf32, #tpu.memory_space<vmem>>, %arg17: memref<128x64xf32, #tpu.memory_space<vmem>>, %arg18: memref<1x64xf32, #tpu.memory_space<vmem>>, %arg19: memref<64x3xf32, #tpu.memory_space<vmem>>, %arg20: memref<1x3xf32, #tpu.memory_space<vmem>>, %arg21: memref<4x3xf32, #tpu.memory_space<vmem>>) attributes {dimension_semantics = [], scalar_prefetch = 0 : i64, scratch_operands = 0 : i64, tpu.core_type = #tpu.core_type<tc>} {
    %c0 = arith.constant 0 : index
    %c0_0 = arith.constant 0 : index
    %0 = vector.load %arg0[%c0, %c0_0] : memref<32x16xf32, #tpu.memory_space<vmem>>, vector<32x16xf32>
    %c0_1 = arith.constant 0 : index
    %c0_2 = arith.constant 0 : index
    %1 = vector.load %arg1[%c0_1, %c0_2] : memref<32x16xf32, #tpu.memory_space<vmem>>, vector<32x16xf32>
    %2 = tpu.concatenate %0, %1 in 0 : vector<32x16xf32>, vector<32x16xf32> -> vector<64x16xf32>
    %cst = arith.constant dense<0.000000e+00> : vector<64xf32>
    %3 = vector.multi_reduction <add>, %2, %cst [1] : vector<64x16xf32> to vector<64xf32>
    %4 = vector.shape_cast %3 : vector<64xf32> to vector<64x1xf32>
    %cst_3 = arith.constant 1.600000e+01 : f32
    %5 = vector.broadcast %cst_3 : f32 to vector<64x1xf32>
    %6 = arith.divf %4, %5 : vector<64x1xf32>
    %c0_4 = arith.constant 0 : index
    %c0_5 = arith.constant 0 : index
    %7 = vector.load %arg4[%c0_4, %c0_5] : memref<1x32xf32, #tpu.memory_space<vmem>>, vector<1x32xf32>
    %8 = vector.broadcast %6 : vector<64x1xf32> to vector<64x32xf32>
    %9 = vector.broadcast %7 : vector<1x32xf32> to vector<64x32xf32>
    %10 = arith.mulf %8, %9 : vector<64x32xf32>
    %c0_6 = arith.constant 0 : index
    %c0_7 = arith.constant 0 : index
    %11 = vector.load %arg5[%c0_6, %c0_7] : memref<1x32xf32, #tpu.memory_space<vmem>>, vector<1x32xf32>
    %12 = vector.broadcast %11 : vector<1x32xf32> to vector<64x32xf32>
    %13 = arith.addf %10, %12 : vector<64x32xf32>
    %c0_8 = arith.constant 0 : index
    %c0_9 = arith.constant 0 : index
    %14 = vector.load %arg3[%c0_8, %c0_9] : memref<1x32xf32, #tpu.memory_space<vmem>>, vector<1x32xf32>
    %cst_10 = arith.constant 0.000000e+00 : f32
    %15 = vector.broadcast %cst_10 : f32 to vector<64x32xf32>
    %16 = vector.extract_strided_slice %2 {offsets = [0, 0], sizes = [64, 1], strides = [1, 1]} : vector<64x16xf32> to vector<64x1xf32>
    %17 = vector.broadcast %16 : vector<64x1xf32> to vector<64x32xf32>
    %18 = vector.broadcast %14 : vector<1x32xf32> to vector<64x32xf32>
    %19 = arith.mulf %17, %18 : vector<64x32xf32>
    %20 = arith.addf %19, %13 : vector<64x32xf32>
    %cst_11 = arith.constant 0.000000e+00 : f32
    %21 = vector.broadcast %cst_11 : f32 to vector<64x32xf32>
    %22 = arith.maximumf %20, %21 : vector<64x32xf32>
    %23 = arith.addf %15, %22 : vector<64x32xf32>
    %24 = vector.extract_strided_slice %2 {offsets = [0, 1], sizes = [64, 1], strides = [1, 1]} : vector<64x16xf32> to vector<64x1xf32>
    %25 = vector.broadcast %24 : vector<64x1xf32> to vector<64x32xf32>
    %26 = vector.broadcast %14 : vector<1x32xf32> to vector<64x32xf32>
    %27 = arith.mulf %25, %26 : vector<64x32xf32>
    %28 = arith.addf %27, %13 : vector<64x32xf32>
    %cst_12 = arith.constant 0.000000e+00 : f32
    %29 = vector.broadcast %cst_12 : f32 to vector<64x32xf32>
    %30 = arith.maximumf %28, %29 : vector<64x32xf32>
    %31 = arith.addf %23, %30 : vector<64x32xf32>
    %32 = vector.extract_strided_slice %2 {offsets = [0, 2], sizes = [64, 1], strides = [1, 1]} : vector<64x16xf32> to vector<64x1xf32>
    %33 = vector.broadcast %32 : vector<64x1xf32> to vector<64x32xf32>
    %34 = vector.broadcast %14 : vector<1x32xf32> to vector<64x32xf32>
    %35 = arith.mulf %33, %34 : vector<64x32xf32>
    %36 = arith.addf %35, %13 : vector<64x32xf32>
    %cst_13 = arith.constant 0.000000e+00 : f32
    %37 = vector.broadcast %cst_13 : f32 to vector<64x32xf32>
    %38 = arith.maximumf %36, %37 : vector<64x32xf32>
    %39 = arith.addf %31, %38 : vector<64x32xf32>
    %40 = vector.extract_strided_slice %2 {offsets = [0, 3], sizes = [64, 1], strides = [1, 1]} : vector<64x16xf32> to vector<64x1xf32>
    %41 = vector.broadcast %40 : vector<64x1xf32> to vector<64x32xf32>
    %42 = vector.broadcast %14 : vector<1x32xf32> to vector<64x32xf32>
    %43 = arith.mulf %41, %42 : vector<64x32xf32>
    %44 = arith.addf %43, %13 : vector<64x32xf32>
    %cst_14 = arith.constant 0.000000e+00 : f32
    %45 = vector.broadcast %cst_14 : f32 to vector<64x32xf32>
    %46 = arith.maximumf %44, %45 : vector<64x32xf32>
    %47 = arith.addf %39, %46 : vector<64x32xf32>
    %48 = vector.extract_strided_slice %2 {offsets = [0, 4], sizes = [64, 1], strides = [1, 1]} : vector<64x16xf32> to vector<64x1xf32>
    %49 = vector.broadcast %48 : vector<64x1xf32> to vector<64x32xf32>
    %50 = vector.broadcast %14 : vector<1x32xf32> to vector<64x32xf32>
    %51 = arith.mulf %49, %50 : vector<64x32xf32>
    %52 = arith.addf %51, %13 : vector<64x32xf32>
    %cst_15 = arith.constant 0.000000e+00 : f32
    %53 = vector.broadcast %cst_15 : f32 to vector<64x32xf32>
    %54 = arith.maximumf %52, %53 : vector<64x32xf32>
    %55 = arith.addf %47, %54 : vector<64x32xf32>
    %56 = vector.extract_strided_slice %2 {offsets = [0, 5], sizes = [64, 1], strides = [1, 1]} : vector<64x16xf32> to vector<64x1xf32>
    %57 = vector.broadcast %56 : vector<64x1xf32> to vector<64x32xf32>
    %58 = vector.broadcast %14 : vector<1x32xf32> to vector<64x32xf32>
    %59 = arith.mulf %57, %58 : vector<64x32xf32>
    %60 = arith.addf %59, %13 : vector<64x32xf32>
    %cst_16 = arith.constant 0.000000e+00 : f32
    %61 = vector.broadcast %cst_16 : f32 to vector<64x32xf32>
    %62 = arith.maximumf %60, %61 : vector<64x32xf32>
    %63 = arith.addf %55, %62 : vector<64x32xf32>
    %64 = vector.extract_strided_slice %2 {offsets = [0, 6], sizes = [64, 1], strides = [1, 1]} : vector<64x16xf32> to vector<64x1xf32>
    %65 = vector.broadcast %64 : vector<64x1xf32> to vector<64x32xf32>
    %66 = vector.broadcast %14 : vector<1x32xf32> to vector<64x32xf32>
    %67 = arith.mulf %65, %66 : vector<64x32xf32>
    %68 = arith.addf %67, %13 : vector<64x32xf32>
    %cst_17 = arith.constant 0.000000e+00 : f32
    %69 = vector.broadcast %cst_17 : f32 to vector<64x32xf32>
    %70 = arith.maximumf %68, %69 : vector<64x32xf32>
    %71 = arith.addf %63, %70 : vector<64x32xf32>
    %72 = vector.extract_strided_slice %2 {offsets = [0, 7], sizes = [64, 1], strides = [1, 1]} : vector<64x16xf32> to vector<64x1xf32>
    %73 = vector.broadcast %72 : vector<64x1xf32> to vector<64x32xf32>
    %74 = vector.broadcast %14 : vector<1x32xf32> to vector<64x32xf32>
    %75 = arith.mulf %73, %74 : vector<64x32xf32>
    %76 = arith.addf %75, %13 : vector<64x32xf32>
    %cst_18 = arith.constant 0.000000e+00 : f32
    %77 = vector.broadcast %cst_18 : f32 to vector<64x32xf32>
    %78 = arith.maximumf %76, %77 : vector<64x32xf32>
    %79 = arith.addf %71, %78 : vector<64x32xf32>
    %80 = vector.extract_strided_slice %2 {offsets = [0, 8], sizes = [64, 1], strides = [1, 1]} : vector<64x16xf32> to vector<64x1xf32>
    %81 = vector.broadcast %80 : vector<64x1xf32> to vector<64x32xf32>
    %82 = vector.broadcast %14 : vector<1x32xf32> to vector<64x32xf32>
    %83 = arith.mulf %81, %82 : vector<64x32xf32>
    %84 = arith.addf %83, %13 : vector<64x32xf32>
    %cst_19 = arith.constant 0.000000e+00 : f32
    %85 = vector.broadcast %cst_19 : f32 to vector<64x32xf32>
    %86 = arith.maximumf %84, %85 : vector<64x32xf32>
    %87 = arith.addf %79, %86 : vector<64x32xf32>
    %88 = vector.extract_strided_slice %2 {offsets = [0, 9], sizes = [64, 1], strides = [1, 1]} : vector<64x16xf32> to vector<64x1xf32>
    %89 = vector.broadcast %88 : vector<64x1xf32> to vector<64x32xf32>
    %90 = vector.broadcast %14 : vector<1x32xf32> to vector<64x32xf32>
    %91 = arith.mulf %89, %90 : vector<64x32xf32>
    %92 = arith.addf %91, %13 : vector<64x32xf32>
    %cst_20 = arith.constant 0.000000e+00 : f32
    %93 = vector.broadcast %cst_20 : f32 to vector<64x32xf32>
    %94 = arith.maximumf %92, %93 : vector<64x32xf32>
    %95 = arith.addf %87, %94 : vector<64x32xf32>
    %96 = vector.extract_strided_slice %2 {offsets = [0, 10], sizes = [64, 1], strides = [1, 1]} : vector<64x16xf32> to vector<64x1xf32>
    %97 = vector.broadcast %96 : vector<64x1xf32> to vector<64x32xf32>
    %98 = vector.broadcast %14 : vector<1x32xf32> to vector<64x32xf32>
    %99 = arith.mulf %97, %98 : vector<64x32xf32>
    %100 = arith.addf %99, %13 : vector<64x32xf32>
    %cst_21 = arith.constant 0.000000e+00 : f32
    %101 = vector.broadcast %cst_21 : f32 to vector<64x32xf32>
    %102 = arith.maximumf %100, %101 : vector<64x32xf32>
    %103 = arith.addf %95, %102 : vector<64x32xf32>
    %104 = vector.extract_strided_slice %2 {offsets = [0, 11], sizes = [64, 1], strides = [1, 1]} : vector<64x16xf32> to vector<64x1xf32>
    %105 = vector.broadcast %104 : vector<64x1xf32> to vector<64x32xf32>
    %106 = vector.broadcast %14 : vector<1x32xf32> to vector<64x32xf32>
    %107 = arith.mulf %105, %106 : vector<64x32xf32>
    %108 = arith.addf %107, %13 : vector<64x32xf32>
    %cst_22 = arith.constant 0.000000e+00 : f32
    %109 = vector.broadcast %cst_22 : f32 to vector<64x32xf32>
    %110 = arith.maximumf %108, %109 : vector<64x32xf32>
    %111 = arith.addf %103, %110 : vector<64x32xf32>
    %112 = vector.extract_strided_slice %2 {offsets = [0, 12], sizes = [64, 1], strides = [1, 1]} : vector<64x16xf32> to vector<64x1xf32>
    %113 = vector.broadcast %112 : vector<64x1xf32> to vector<64x32xf32>
    %114 = vector.broadcast %14 : vector<1x32xf32> to vector<64x32xf32>
    %115 = arith.mulf %113, %114 : vector<64x32xf32>
    %116 = arith.addf %115, %13 : vector<64x32xf32>
    %cst_23 = arith.constant 0.000000e+00 : f32
    %117 = vector.broadcast %cst_23 : f32 to vector<64x32xf32>
    %118 = arith.maximumf %116, %117 : vector<64x32xf32>
    %119 = arith.addf %111, %118 : vector<64x32xf32>
    %120 = vector.extract_strided_slice %2 {offsets = [0, 13], sizes = [64, 1], strides = [1, 1]} : vector<64x16xf32> to vector<64x1xf32>
    %121 = vector.broadcast %120 : vector<64x1xf32> to vector<64x32xf32>
    %122 = vector.broadcast %14 : vector<1x32xf32> to vector<64x32xf32>
    %123 = arith.mulf %121, %122 : vector<64x32xf32>
    %124 = arith.addf %123, %13 : vector<64x32xf32>
    %cst_24 = arith.constant 0.000000e+00 : f32
    %125 = vector.broadcast %cst_24 : f32 to vector<64x32xf32>
    %126 = arith.maximumf %124, %125 : vector<64x32xf32>
    %127 = arith.addf %119, %126 : vector<64x32xf32>
    %128 = vector.extract_strided_slice %2 {offsets = [0, 14], sizes = [64, 1], strides = [1, 1]} : vector<64x16xf32> to vector<64x1xf32>
    %129 = vector.broadcast %128 : vector<64x1xf32> to vector<64x32xf32>
    %130 = vector.broadcast %14 : vector<1x32xf32> to vector<64x32xf32>
    %131 = arith.mulf %129, %130 : vector<64x32xf32>
    %132 = arith.addf %131, %13 : vector<64x32xf32>
    %cst_25 = arith.constant 0.000000e+00 : f32
    %133 = vector.broadcast %cst_25 : f32 to vector<64x32xf32>
    %134 = arith.maximumf %132, %133 : vector<64x32xf32>
    %135 = arith.addf %127, %134 : vector<64x32xf32>
    %136 = vector.extract_strided_slice %2 {offsets = [0, 15], sizes = [64, 1], strides = [1, 1]} : vector<64x16xf32> to vector<64x1xf32>
    %137 = vector.broadcast %136 : vector<64x1xf32> to vector<64x32xf32>
    %138 = vector.broadcast %14 : vector<1x32xf32> to vector<64x32xf32>
    %139 = arith.mulf %137, %138 : vector<64x32xf32>
    %140 = arith.addf %139, %13 : vector<64x32xf32>
    %cst_26 = arith.constant 0.000000e+00 : f32
    %141 = vector.broadcast %cst_26 : f32 to vector<64x32xf32>
    %142 = arith.maximumf %140, %141 : vector<64x32xf32>
    %143 = arith.addf %135, %142 : vector<64x32xf32>
    %cst_27 = arith.constant 6.250000e-02 : f32
    %144 = vector.broadcast %cst_27 : f32 to vector<64x32xf32>
    %145 = arith.mulf %143, %144 : vector<64x32xf32>
    %c0_28 = arith.constant 0 : index
    %c0_29 = arith.constant 0 : index
    %146 = vector.load %arg6[%c0_28, %c0_29] : memref<32x32xf32, #tpu.memory_space<vmem>>, vector<32x32xf32>
    %cst_30 = arith.constant dense<0.000000e+00> : vector<64x32xf32>
    %147 = tpu.matmul %145, %146, %cst_30 {dimension_numbers = #tpu.dot_dimension_numbers<[1], [0], [0], [1], [0, 0, 1, 1], [], []>} : vector<64x32xf32>, vector<32x32xf32>, vector<64x32xf32> -> vector<64x32xf32>
    %c0_31 = arith.constant 0 : index
    %c0_32 = arith.constant 0 : index
    %148 = vector.load %arg7[%c0_31, %c0_32] : memref<1x32xf32, #tpu.memory_space<vmem>>, vector<1x32xf32>
    %149 = vector.broadcast %148 : vector<1x32xf32> to vector<64x32xf32>
    %150 = arith.addf %147, %149 : vector<64x32xf32>
    %151 = vector.shape_cast %150 : vector<64x32xf32> to vector<8x8x32xf32>
    %cst_33 = arith.constant dense<0.000000e+00> : vector<8x32xf32>
    %152 = vector.multi_reduction <add>, %151, %cst_33 [1] : vector<8x8x32xf32> to vector<8x32xf32>
    %cst_34 = arith.constant 8.000000e+00 : f32
    %153 = vector.broadcast %cst_34 : f32 to vector<8x32xf32>
    %154 = arith.divf %152, %153 : vector<8x32xf32>
    %c0_35 = arith.constant 0 : index
    %c0_36 = arith.constant 0 : index
    %155 = vector.load %arg9[%c0_35, %c0_36] : memref<32x64xf32, #tpu.memory_space<vmem>>, vector<32x64xf32>
    %cst_37 = arith.constant dense<0.000000e+00> : vector<8x64xf32>
    %156 = tpu.matmul %154, %155, %cst_37 {dimension_numbers = #tpu.dot_dimension_numbers<[1], [0], [0], [1], [0, 0, 1, 1], [], []>} : vector<8x32xf32>, vector<32x64xf32>, vector<8x64xf32> -> vector<8x64xf32>
    %c0_38 = arith.constant 0 : index
    %c0_39 = arith.constant 0 : index
    %157 = vector.load %arg10[%c0_38, %c0_39] : memref<1x64xf32, #tpu.memory_space<vmem>>, vector<1x64xf32>
    %158 = vector.broadcast %157 : vector<1x64xf32> to vector<8x64xf32>
    %159 = arith.addf %156, %158 : vector<8x64xf32>
    %c0_40 = arith.constant 0 : index
    %c0_41 = arith.constant 0 : index
    %160 = vector.load %arg8[%c0_40, %c0_41] : memref<32x64xf32, #tpu.memory_space<vmem>>, vector<32x64xf32>
    %cst_42 = arith.constant dense<0.000000e+00> : vector<64x64xf32>
    %161 = tpu.matmul %150, %160, %cst_42 {dimension_numbers = #tpu.dot_dimension_numbers<[1], [0], [0], [1], [0, 0, 1, 1], [], []>} : vector<64x32xf32>, vector<32x64xf32>, vector<64x64xf32> -> vector<64x64xf32>
    %162 = vector.shape_cast %161 : vector<64x64xf32> to vector<8x8x64xf32>
    %163 = vector.shape_cast %159 : vector<8x64xf32> to vector<8x1x64xf32>
    %164 = vector.broadcast %163 : vector<8x1x64xf32> to vector<8x8x64xf32>
    %165 = arith.addf %162, %164 : vector<8x8x64xf32>
    %cst_43 = arith.constant 0.000000e+00 : f32
    %166 = vector.broadcast %cst_43 : f32 to vector<8x8x64xf32>
    %167 = arith.maximumf %165, %166 : vector<8x8x64xf32>
    %cst_44 = arith.constant dense<0.000000e+00> : vector<8x64xf32>
    %168 = vector.multi_reduction <add>, %167, %cst_44 [1] : vector<8x8x64xf32> to vector<8x64xf32>
    %cst_45 = arith.constant 8.000000e+00 : f32
    %169 = vector.broadcast %cst_45 : f32 to vector<8x64xf32>
    %170 = arith.divf %168, %169 : vector<8x64xf32>
    %c0_46 = arith.constant 0 : index
    %c0_47 = arith.constant 0 : index
    %171 = vector.load %arg11[%c0_46, %c0_47] : memref<64x128xf32, #tpu.memory_space<vmem>>, vector<64x128xf32>
    %cst_48 = arith.constant dense<0.000000e+00> : vector<8x128xf32>
    %172 = tpu.matmul %170, %171, %cst_48 {dimension_numbers = #tpu.dot_dimension_numbers<[1], [0], [0], [1], [0, 0, 1, 1], [], []>} : vector<8x64xf32>, vector<64x128xf32>, vector<8x128xf32> -> vector<8x128xf32>
    %c0_49 = arith.constant 0 : index
    %c0_50 = arith.constant 0 : index
    %173 = vector.load %arg12[%c0_49, %c0_50] : memref<1x128xf32, #tpu.memory_space<vmem>>, vector<1x128xf32>
    %174 = vector.broadcast %173 : vector<1x128xf32> to vector<8x128xf32>
    %175 = arith.addf %172, %174 : vector<8x128xf32>
    %176 = vector.extract_strided_slice %175 {offsets = [0, 0], sizes = [4, 128], strides = [1, 1]} : vector<8x128xf32> to vector<4x128xf32>
    %177 = vector.extract_strided_slice %175 {offsets = [4, 0], sizes = [4, 128], strides = [1, 1]} : vector<8x128xf32> to vector<4x128xf32>
    %c0_51 = arith.constant 0 : index
    %c0_52 = arith.constant 0 : index
    %178 = vector.load %arg13[%c0_51, %c0_52] : memref<128x128xf32, #tpu.memory_space<vmem>>, vector<128x128xf32>
    %cst_53 = arith.constant dense<0.000000e+00> : vector<4x128xf32>
    %179 = tpu.matmul %176, %178, %cst_53 {dimension_numbers = #tpu.dot_dimension_numbers<[1], [0], [0], [1], [0, 0, 1, 1], [], []>} : vector<4x128xf32>, vector<128x128xf32>, vector<4x128xf32> -> vector<4x128xf32>
    %c0_54 = arith.constant 0 : index
    %c0_55 = arith.constant 0 : index
    %180 = vector.load %arg14[%c0_54, %c0_55] : memref<128x128xf32, #tpu.memory_space<vmem>>, vector<128x128xf32>
    %cst_56 = arith.constant dense<0.000000e+00> : vector<4x128xf32>
    %181 = tpu.matmul %177, %180, %cst_56 {dimension_numbers = #tpu.dot_dimension_numbers<[1], [0], [0], [1], [0, 0, 1, 1], [], []>} : vector<4x128xf32>, vector<128x128xf32>, vector<4x128xf32> -> vector<4x128xf32>
    %182 = arith.addf %179, %181 : vector<4x128xf32>
    %c0_57 = arith.constant 0 : index
    %c0_58 = arith.constant 0 : index
    %183 = vector.load %arg2[%c0_57, %c0_58] : memref<4x27xf32, #tpu.memory_space<vmem>>, vector<4x27xf32>
    %c0_59 = arith.constant 0 : index
    %c0_60 = arith.constant 0 : index
    %184 = vector.load %arg15[%c0_59, %c0_60] : memref<27x128xf32, #tpu.memory_space<vmem>>, vector<27x128xf32>
    %cst_61 = arith.constant dense<0.000000e+00> : vector<4x128xf32>
    %185 = tpu.matmul %183, %184, %cst_61 {dimension_numbers = #tpu.dot_dimension_numbers<[1], [0], [0], [1], [0, 0, 1, 1], [], []>} : vector<4x27xf32>, vector<27x128xf32>, vector<4x128xf32> -> vector<4x128xf32>
    %186 = arith.addf %182, %185 : vector<4x128xf32>
    %c0_62 = arith.constant 0 : index
    %c0_63 = arith.constant 0 : index
    %187 = vector.load %arg16[%c0_62, %c0_63] : memref<1x128xf32, #tpu.memory_space<vmem>>, vector<1x128xf32>
    %188 = vector.broadcast %187 : vector<1x128xf32> to vector<4x128xf32>
    %189 = arith.addf %186, %188 : vector<4x128xf32>
    %cst_64 = arith.constant 0.000000e+00 : f32
    %190 = vector.broadcast %cst_64 : f32 to vector<4x128xf32>
    %191 = arith.maximumf %189, %190 : vector<4x128xf32>
    %c0_65 = arith.constant 0 : index
    %c0_66 = arith.constant 0 : index
    %192 = vector.load %arg17[%c0_65, %c0_66] : memref<128x64xf32, #tpu.memory_space<vmem>>, vector<128x64xf32>
    %cst_67 = arith.constant dense<0.000000e+00> : vector<4x64xf32>
    %193 = tpu.matmul %191, %192, %cst_67 {dimension_numbers = #tpu.dot_dimension_numbers<[1], [0], [0], [1], [0, 0, 1, 1], [], []>} : vector<4x128xf32>, vector<128x64xf32>, vector<4x64xf32> -> vector<4x64xf32>
    %c0_68 = arith.constant 0 : index
    %c0_69 = arith.constant 0 : index
    %194 = vector.load %arg18[%c0_68, %c0_69] : memref<1x64xf32, #tpu.memory_space<vmem>>, vector<1x64xf32>
    %195 = vector.broadcast %194 : vector<1x64xf32> to vector<4x64xf32>
    %196 = arith.addf %193, %195 : vector<4x64xf32>
    %cst_70 = arith.constant 0.000000e+00 : f32
    %197 = vector.broadcast %cst_70 : f32 to vector<4x64xf32>
    %198 = arith.maximumf %196, %197 : vector<4x64xf32>
    %c0_71 = arith.constant 0 : index
    %c0_72 = arith.constant 0 : index
    %199 = vector.load %arg19[%c0_71, %c0_72] : memref<64x3xf32, #tpu.memory_space<vmem>>, vector<64x3xf32>
    %cst_73 = arith.constant dense<0.000000e+00> : vector<4x3xf32>
    %200 = tpu.matmul %198, %199, %cst_73 {dimension_numbers = #tpu.dot_dimension_numbers<[1], [0], [0], [1], [0, 0, 1, 1], [], []>} : vector<4x64xf32>, vector<64x3xf32>, vector<4x3xf32> -> vector<4x3xf32>
    %c0_74 = arith.constant 0 : index
    %c0_75 = arith.constant 0 : index
    %201 = vector.load %arg20[%c0_74, %c0_75] : memref<1x3xf32, #tpu.memory_space<vmem>>, vector<1x3xf32>
    %202 = vector.broadcast %201 : vector<1x3xf32> to vector<4x3xf32>
    %203 = arith.addf %200, %202 : vector<4x3xf32>
    %c0_76 = arith.constant 0 : index
    %c0_77 = arith.constant 0 : index
    %204 = vector.load %arg21[%c0_76, %c0_77] : memref<4x3xf32, #tpu.memory_space<vmem>>, vector<4x3xf32>
    tpu.vector_store %arg21[%c0_76, %c0_77], %203 {strides = array<i32>} : memref<4x3xf32, #tpu.memory_space<vmem>>, vector<4x3xf32>,
    return
  }
}

</mosaic_0001>

<bundles_post_ra>
// kernel: deepset_model_v5_forward.1
= control target key start
LH: loop header
LB: loop body
LE: loop exit
PB: predicated region body
PF: predicated region fallthrough
CT: control target
= control target key end

     0   :  { %s5089_s0 = inlined_call_operand.hbm [shape: f32[32,16], index: 0, kind: input, shape index: {}]   ;;  %s5090_s1 = inlined_call_operand.hbm [shape: f32[32,16], index: 1, kind: input, shape index: {}]   ;;  %s5091_s2 = inlined_call_operand.hbm [shape: f32[4,27], index: 2, kind: input, shape index: {}]   ;;  %s5092_s3 = inlined_call_operand.hbm [shape: f32[1,32], index: 3, kind: input, shape index: {}]   ;;  %s5093_s4 = inlined_call_operand.vmem [shape: f32[1,32], index: 4, kind: input, shape index: {}]   ;;  %s5094_s5 = inlined_call_operand.hbm [shape: f32[1,32], index: 5, kind: input, shape index: {}]   ;;  %s5095_s6 = inlined_call_operand.hbm [shape: f32[32,32], index: 6, kind: input, shape index: {}]   ;;  %s5096_s7 = inlined_call_operand.hbm [shape: f32[1,32], index: 7, kind: input, shape index: {}]   ;;  %s5097_s8 = inlined_call_operand.hbm [shape: f32[32,64], index: 8, kind: input, shape index: {}]   ;;  %s5098_s9 = inlined_call_operand.hbm [shape: f32[32,64], index: 9, kind: input, shape index: {}]   ;;  %s5099_s10 = inlined_call_operand.hbm [shape: f32[1,64], index: 10, kind: input, shape index: {}]   ;;  %s5100_s11 = inlined_call_operand.hbm [shape: f32[64,128], index: 11, kind: input, shape index: {}]   ;;  %s5101_s12 = inlined_call_operand.hbm [shape: f32[1,128], index: 12, kind: input, shape index: {}]   ;;  %s5102_s13 = inlined_call_operand.vmem [shape: f32[128,128], index: 13, kind: input, shape index: {}]   ;;  %s5103_s14 = inlined_call_operand.vmem [shape: f32[128,128], index: 14, kind: input, shape index: {}]   ;;  %s5104_s15 = inlined_call_operand.hbm [shape: f32[27,128], index: 15, kind: input, shape index: {}]   ;;  %s5105_s16 = inlined_call_operand.hbm [shape: f32[1,128], index: 16, kind: input, shape index: {}]   ;;  %s5106_s17 = inlined_call_operand.vmem [shape: f32[128,64], index: 17, kind: input, shape index: {}]   ;;  %s5107_s18 = inlined_call_operand.hbm [shape: f32[1,64], index: 18, kind: input, shape index: {}]   ;;  %s5108_s19 = inlined_call_operand.vmem [shape: f32[64,3], index: 19, kind: input, shape index: {}]   ;;  %s5109_s20 = inlined_call_operand.hbm [shape: f32[1,3], index: 20, kind: input, shape index: {}]   ;;  %s5110_s21 = inlined_call_operand.hbm [shape: f32[4,3], index: 21, kind: output, shape index: {}]  }
   0x1   :  { %5137 = sst [smem:[#allocation47_spill]] %s5089_s0 }
   0x2   :  { %5138 = sst [smem:[#allocation48_spill]] %s5090_s1 }
   0x3   :  { %5139 = sst [smem:[#allocation49_spill]] %s5091_s2 }
   0x4   :  { %5140 = sst [smem:[#allocation50_spill]] %s5092_s3 }
   0x5   :  { %5141 = sst [smem:[#allocation51_spill]] %s5093_s4 }
   0x6   :  { %5142 = sst [smem:[#allocation52_spill]] %s5094_s5 }
   0x7   :  { %26 = vsyncpa [#allocation3], 0 }
   0x8   :  { %27 = vsyncpa [#allocation6], 0 }
   0x9   :  { %28 = vsyncpa [#allocation9], 0 }
   0xa   :  { %29 = vsyncpa [#allocation12], 0 }
   0xb   :  { %30 = vsyncpa [#allocation15], 0 }
   0xc   :  { %31 = vsyncpa [#allocation18], 0 }
   0xd   :  { %32 = vsyncpa [#allocation21], 0 }
   0xe   :  { %33 = vsyncpa [#allocation24], 0 }
   0xf   :  { %34 = vsyncpa [#allocation27], 0 }
  0x10   :  { %35 = vsyncpa [#allocation4], 0  ;;  %s3578_s2 = smov [#allocation5]   ;;  %s3579_s26 = smov [#allocation8]  }
  0x11   :  { %s53_s25 = sshll.u32 %s3578_s2, 4  ;;  %s76_s27 = sshll.u32 %s3579_s26, 4  ;;  %s54_s25 = int_to_ptr.vmem [resolvable:$true] %s53_s25  ;;  %s3728_s27 = int_to_ptr.vmem [resolvable:$true] %s76_s27 }
  0x12   :  { %s5143_s29 = sld [smem:[#allocation48_spill]] }
  0x18   :  { %s3184_s0 = scalar_lea.hbm %s5143_s29, 512 }
  0x19   :  { %p3185_p0 = scmp.ne.s32.totalorder %s5143_s29, %s3184_s0  ;;  %p3188_p1 = scmp.lt.u32.totalorder %s3184_s0, %s5143_s29 }
  0x1b   :  { %p3190_p2 = pnand %p3188_p1, %p3185_p0 }
  0x1d   :  { %3193 = shalt.err (!%p3190_p2)
}
  0x1e   :  { %s3194_s23 = scalar_lea.vmem %s54_s25, 512  ;;  %p3199_p4 = scmp.lt.s32.totalorder %s54_s25, %s54_s25 }
  0x1f   :  { %p3195_p3 = scmp.ne.s32.totalorder %s54_s25, %s3194_s23  ;;  %p3200_p5 = scmp.lt.s32.totalorder %s3194_s23, %s3194_s23 }
  0x21   :  { %p3201_p6 = por %p3200_p5, %p3199_p4 }
  0x23   :  { %p3202_p7 = pnand %p3201_p6, %p3195_p3 }
  0x25   :  { %3205 = shalt.err (!%p3202_p7)
}
  0x26   :  { %s5116_s1 = smov 128   ;;  %s5118_s24 = smov 8  }
  0x27   :  { %59 = dma.hbm_to_vmem [thread:$0]  %s5143_s29, 512, %s54_s25, [#allocation6], %s5116_s1, %s5116_s1, %s5118_s24  }
  0x28   :  { %s5144_s0 = sld [smem:[#allocation50_spill]] }
  0x2e   :  { %s3206_s4 = scalar_lea.hbm %s5144_s0, 16 }
  0x2f   :  { %p3207_p8 = scmp.ne.s32.totalorder %s5144_s0, %s3206_s4  ;;  %p3210_p9 = scmp.lt.u32.totalorder %s3206_s4, %s5144_s0 }
  0x31   :  { %p3212_p10 = pnand %p3210_p9, %p3207_p8 }
  0x33   :  { %3215 = shalt.err (!%p3212_p10)
}
  0x34   :  { %s3216_s2 = scalar_lea.vmem %s3728_s27, 16  ;;  %s3220_s25 = scalar_lea.vmem %s3728_s27, 32 }
  0x35   :  { %p3217_p11 = scmp.ne.s32.totalorder %s3728_s27, %s3216_s2  ;;  %p3221_p12 = scmp.lt.s32.totalorder %s3728_s27, %s3728_s27 }
  0x36   :  { %p3222_p13 = scmp.lt.s32.totalorder %s3220_s25, %s3216_s2 }
  0x38   :  { %p3223_p0 = por %p3222_p13, %p3221_p12 }
  0x3a   :  { %p3224_p1 = pnand %p3223_p0, %p3217_p11 }
  0x3c   :  { %3227 = shalt.err (!%p3224_p1)
}
  0x3d   :  { %79 = dma.hbm_to_vmem [thread:$0]  %s5144_s0, 16, %s3728_s27, [#allocation9]  }
  0x3e   :  { %s3582_s3 = smov [#allocation11]   ;;  %s3583_s4 = smov [#allocation14]  }
  0x3f   :  { %s97_s28 = sshll.u32 %s3582_s3, 4  ;;  %s119_s30 = sshll.u32 %s3583_s4, 4  ;;  %s98_s28 = int_to_ptr.vmem [resolvable:$true] %s97_s28  ;;  %s3763_s30 = int_to_ptr.vmem [resolvable:$true] %s119_s30 }
  0x40   :  { %s3228_s23 = scalar_lea.hbm %s5095_s6, 512 }
  0x41   :  { %p3229_p2 = scmp.ne.s32.totalorder %s5095_s6, %s3228_s23  ;;  %p3232_p3 = scmp.lt.u32.totalorder %s3228_s23, %s5095_s6 }
  0x43   :  { %p3234_p4 = pnand %p3232_p3, %p3229_p2 }
  0x45   :  { %3237 = shalt.err (!%p3234_p4)
}
  0x46   :  { %s3238_s27 = scalar_lea.vmem %s98_s28, 512  ;;  %p3243_p6 = scmp.lt.s32.totalorder %s98_s28, %s98_s28 }
  0x47   :  { %p3239_p5 = scmp.ne.s32.totalorder %s98_s28, %s3238_s27  ;;  %p3244_p7 = scmp.lt.s32.totalorder %s3238_s27, %s3238_s27 }
  0x49   :  { %p3245_p8 = por %p3244_p7, %p3243_p6 }
  0x4b   :  { %p3246_p9 = pnand %p3245_p8, %p3239_p5 }
  0x4d   :  { %3249 = shalt.err (!%p3246_p9)
}
  0x4e   :  { %s5145_s0 = smov 8   ;;  %s5146_s29 = smov 128  }
  0x4f   :  { %103 = dma.hbm_to_vmem [thread:$0]  %s5095_s6, 512, %s98_s28, [#allocation12], %s5146_s29, %s5146_s29, %s5145_s0  }
  0x50   :  { %s3250_s1 = scalar_lea.hbm %s5097_s8, 512 }
  0x51   :  { %p3251_p10 = scmp.ne.s32.totalorder %s5097_s8, %s3250_s1  ;;  %p3254_p11 = scmp.lt.u32.totalorder %s3250_s1, %s5097_s8 }
  0x53   :  { %p3256_p12 = pnand %p3254_p11, %p3251_p10 }
  0x55   :  { %3259 = shalt.err (!%p3256_p12)
}
  0x56   :  { %s3260_s25 = scalar_lea.vmem %s3763_s30, 512  ;;  %p3265_p0 = scmp.lt.s32.totalorder %s3763_s30, %s3763_s30 }
  0x57   :  { %p3261_p13 = scmp.ne.s32.totalorder %s3763_s30, %s3260_s25  ;;  %p3266_p1 = scmp.lt.s32.totalorder %s3260_s25, %s3260_s25 }
  0x59   :  { %p3267_p2 = por %p3266_p1, %p3265_p0 }
  0x5b   :  { %p3268_p3 = pnand %p3267_p2, %p3261_p13 }
  0x5d   :  { %3271 = shalt.err (!%p3268_p3)
}
  0x5e   :  { %125 = dma.hbm_to_vmem [thread:$0]  %s5097_s8, 512, %s3763_s30, [#allocation15], %s5146_s29, %s5146_s29, %s5145_s0  }
  0x5f   :  { %s3584_s27 = smov [#allocation17]   ;;  %s3585_s3 = smov [#allocation20]  }
  0x60   :  { %s144_s26 = sshll.u32 %s3584_s27, 4  ;;  %s166_s4 = sshll.u32 %s3585_s3, 4  ;;  %s145_s26 = int_to_ptr.vmem [resolvable:$true] %s144_s26  ;;  %s167_s4 = int_to_ptr.vmem [resolvable:$true] %s166_s4 }
  0x61   :  { %s3272_s24 = scalar_lea.hbm %s5099_s10, 16 }
  0x62   :  { %p3273_p4 = scmp.ne.s32.totalorder %s5099_s10, %s3272_s24  ;;  %p3276_p5 = scmp.lt.u32.totalorder %s3272_s24, %s5099_s10 }
  0x64   :  { %p3278_p6 = pnand %p3276_p5, %p3273_p4 }
  0x66   :  { %3281 = shalt.err (!%p3278_p6)
}
  0x67   :  { %s3282_s8 = scalar_lea.vmem %s145_s26, 16  ;;  %s3286_s30 = scalar_lea.vmem %s145_s26, 32 }
  0x68   :  { %p3283_p7 = scmp.ne.s32.totalorder %s145_s26, %s3282_s8  ;;  %p3287_p8 = scmp.lt.s32.totalorder %s145_s26, %s145_s26 }
  0x69   :  { %p3288_p9 = scmp.lt.s32.totalorder %s3286_s30, %s3282_s8 }
  0x6b   :  { %p3289_p10 = por %p3288_p9, %p3287_p8 }
  0x6d   :  { %p3290_p11 = pnand %p3289_p10, %p3283_p7 }
  0x6f   :  { %3293 = shalt.err (!%p3290_p11)
}
  0x70   :  { %147 = dma.hbm_to_vmem [thread:$0]  %s5099_s10, 16, %s145_s26, [#allocation18]  }
  0x71   :  { %s3294_s5 = scalar_lea.hbm %s5101_s12, 16 }
  0x72   :  { %p3295_p12 = scmp.ne.s32.totalorder %s5101_s12, %s3294_s5  ;;  %p3298_p13 = scmp.lt.u32.totalorder %s3294_s5, %s5101_s12 }
  0x74   :  { %p3300_p0 = pnand %p3298_p13, %p3295_p12 }
  0x76   :  { %3303 = shalt.err (!%p3300_p0)
}
  0x77   :  { %s3304_s2 = scalar_lea.vmem %s167_s4, 16  ;;  %s3308_s25 = scalar_lea.vmem %s167_s4, 32 }
  0x78   :  { %p3305_p1 = scmp.ne.s32.totalorder %s167_s4, %s3304_s2  ;;  %p3309_p2 = scmp.lt.s32.totalorder %s167_s4, %s167_s4 }
  0x79   :  { %p3310_p3 = scmp.lt.s32.totalorder %s3308_s25, %s3304_s2 }
  0x7b   :  { %p3311_p4 = por %p3310_p3, %p3309_p2 }
  0x7d   :  { %p3312_p5 = pnand %p3311_p4, %p3305_p1 }
  0x7f   :  { %3315 = shalt.err (!%p3312_p5)
}
  0x80   :  { %169 = dma.hbm_to_vmem [thread:$0]  %s5101_s12, 16, %s167_s4, [#allocation21]  }
  0x81   :  { %s3586_s8 = smov [#allocation23]   ;;  %s3587_s6 = smov [#allocation2]  }
  0x82   :  { %s192_s30 = sshll.u32 %s3586_s8, 4  ;;  %s41_s28 = sshll.u32 %s3587_s6, 4  ;;  %s193_s30 = int_to_ptr.vmem [resolvable:$true] %s192_s30  ;;  %s3824_s28 = int_to_ptr.vmem [resolvable:$true] %s41_s28 }
  0x83   :  { %s3316_s5 = scalar_lea.hbm %s5105_s16, 16 }
  0x84   :  { %p3317_p6 = scmp.ne.s32.totalorder %s5105_s16, %s3316_s5  ;;  %p3320_p7 = scmp.lt.u32.totalorder %s3316_s5, %s5105_s16 }
  0x86   :  { %p3322_p8 = pnand %p3320_p7, %p3317_p6 }
  0x88   :  { %3325 = shalt.err (!%p3322_p8)
}
  0x89   :  { %s3326_s12 = scalar_lea.vmem %s193_s30, 16  ;;  %s3330_s4 = scalar_lea.vmem %s193_s30, 32 }
  0x8a   :  { %p3327_p9 = scmp.ne.s32.totalorder %s193_s30, %s3326_s12  ;;  %p3331_p10 = scmp.lt.s32.totalorder %s193_s30, %s193_s30 }
  0x8b   :  { %p3332_p11 = scmp.lt.s32.totalorder %s3330_s4, %s3326_s12 }
  0x8d   :  { %p3333_p12 = por %p3332_p11, %p3331_p10 }
  0x8f   :  { %p3334_p13 = pnand %p3333_p12, %p3327_p9 }
  0x91   :  { %3337 = shalt.err (!%p3334_p13)
}
  0x92   :  { %195 = dma.hbm_to_vmem [thread:$0]  %s5105_s16, 16, %s193_s30, [#allocation24]  }
  0x93   :  { %s5147_s8 = sld [smem:[#allocation47_spill]] }
  0x99   :  { %s3338_s6 = scalar_lea.hbm %s5147_s8, 512 }
  0x9a   :  { %p3339_p0 = scmp.ne.s32.totalorder %s5147_s8, %s3338_s6  ;;  %p3342_p1 = scmp.lt.u32.totalorder %s3338_s6, %s5147_s8 }
  0x9c   :  { %p3344_p2 = pnand %p3342_p1, %p3339_p0 }
  0x9e   :  { %3347 = shalt.err (!%p3344_p2)
}
  0x9f   :  { %s3348_s24 = scalar_lea.vmem %s3824_s28, 512  ;;  %p3353_p4 = scmp.lt.s32.totalorder %s3824_s28, %s3824_s28 }
  0xa0   :  { %p3349_p3 = scmp.ne.s32.totalorder %s3824_s28, %s3348_s24  ;;  %p3354_p5 = scmp.lt.s32.totalorder %s3348_s24, %s3348_s24 }
  0xa2   :  { %p3355_p6 = por %p3354_p5, %p3353_p4 }
  0xa4   :  { %p3356_p7 = pnand %p3355_p6, %p3349_p3 }
  0xa6   :  { %3359 = shalt.err (!%p3356_p7)
}
  0xa7   :  { %47 = dma.hbm_to_vmem [thread:$0]  %s5147_s8, 512, %s3824_s28, [#allocation3], %s5146_s29, %s5146_s29, %s5145_s0  }
  0xa8   :  { %s3588_s22 = smov [#allocation7]   ;;  %s3589_s12 = smov [#allocation10]  }
  0xa9   :  { %s66_s23 = sshll.u32 %s3588_s22, 4  ;;  %s88_s4 = sshll.u32 %s3589_s12, 4  ;;  %s67_s23 = int_to_ptr.vmem [resolvable:$true] %s66_s23  ;;  %s89_s4 = int_to_ptr.vmem [resolvable:$true] %s88_s4 }
  0xaa   :  { %s5148_s10 = sld [smem:[#allocation49_spill]] }
  0xb0   :  { %s3360_s26 = scalar_lea.hbm %s5148_s10, 64 }
  0xb1   :  { %p3361_p8 = scmp.ne.s32.totalorder %s5148_s10, %s3360_s26  ;;  %p3364_p9 = scmp.lt.u32.totalorder %s3360_s26, %s5148_s10 }
  0xb3   :  { %p3366_p10 = pnand %p3364_p9, %p3361_p8 }
  0xb5   :  { %3369 = shalt.err (!%p3366_p10)
}
  0xb6   :  { %s3370_s28 = scalar_lea.vmem %s67_s23, 64  ;;  %p3375_p12 = scmp.lt.s32.totalorder %s67_s23, %s67_s23 }
  0xb7   :  { %p3371_p11 = scmp.ne.s32.totalorder %s67_s23, %s3370_s28  ;;  %p3376_p13 = scmp.lt.s32.totalorder %s3370_s28, %s3370_s28 }
  0xb9   :  { %p3377_p0 = por %p3376_p13, %p3375_p12 }
  0xbb   :  { %p3378_p1 = pnand %p3377_p0, %p3371_p11 }
  0xbd   :  { %3381 = shalt.err (!%p3378_p1)
}
  0xbe   :  { %69 = dma.hbm_to_vmem [thread:$0]  %s5148_s10, 64, %s67_s23, [#allocation6]  }
  0xbf   :  { %s5149_s30 = sld [smem:[#allocation52_spill]] }
  0xc5   :  { %s3382_s22 = scalar_lea.hbm %s5149_s30, 16 }
  0xc6   :  { %p3383_p2 = scmp.ne.s32.totalorder %s5149_s30, %s3382_s22  ;;  %p3386_p3 = scmp.lt.u32.totalorder %s3382_s22, %s5149_s30 }
  0xc8   :  { %p3388_p4 = pnand %p3386_p3, %p3383_p2 }
  0xca   :  { %3391 = shalt.err (!%p3388_p4)
}
  0xcb   :  { %s3392_s6 = scalar_lea.vmem %s89_s4, 16  ;;  %s3396_s27 = scalar_lea.vmem %s89_s4, 32 }
  0xcc   :  { %p3393_p5 = scmp.ne.s32.totalorder %s89_s4, %s3392_s6  ;;  %p3397_p6 = scmp.lt.s32.totalorder %s89_s4, %s89_s4 }
  0xcd   :  { %p3398_p7 = scmp.lt.s32.totalorder %s3396_s27, %s3392_s6 }
  0xcf   :  { %p3399_p8 = por %p3398_p7, %p3397_p6 }
  0xd1   :  { %p3400_p9 = pnand %p3399_p8, %p3393_p5 }
  0xd3   :  { %3403 = shalt.err (!%p3400_p9)
}
  0xd4   :  { %91 = dma.hbm_to_vmem [thread:$0]  %s5149_s30, 16, %s89_s4, [#allocation9]  }
  0xd5   :  { %s3590_s3 = smov [#allocation13]   ;;  %s3591_s28 = smov [#allocation16]  }
  0xd6   :  { %s110_s5 = sshll.u32 %s3590_s3, 4  ;;  %s131_s8 = sshll.u32 %s3591_s28, 4  ;;  %s111_s5 = int_to_ptr.vmem [resolvable:$true] %s110_s5  ;;  %s3882_s8 = int_to_ptr.vmem [resolvable:$true] %s131_s8 }
  0xd7   :  { %s3404_s16 = scalar_lea.hbm %s5096_s7, 16 }
  0xd8   :  { %p3405_p10 = scmp.ne.s32.totalorder %s5096_s7, %s3404_s16  ;;  %p3408_p11 = scmp.lt.u32.totalorder %s3404_s16, %s5096_s7 }
  0xda   :  { %p3410_p12 = pnand %p3408_p11, %p3405_p10 }
  0xdc   :  { %3413 = shalt.err (!%p3410_p12)
}
  0xdd   :  { %s3414_s4 = scalar_lea.vmem %s111_s5, 16  ;;  %s3418_s30 = scalar_lea.vmem %s111_s5, 32 }
  0xde   :  { %p3415_p13 = scmp.ne.s32.totalorder %s111_s5, %s3414_s4  ;;  %p3419_p0 = scmp.lt.s32.totalorder %s111_s5, %s111_s5 }
  0xdf   :  { %p3420_p1 = scmp.lt.s32.totalorder %s3418_s30, %s3414_s4 }
  0xe1   :  { %p3421_p2 = por %p3420_p1, %p3419_p0 }
  0xe3   :  { %p3422_p3 = pnand %p3421_p2, %p3415_p13 }
  0xe5   :  { %3425 = shalt.err (!%p3422_p3)
}
  0xe6   :  { %113 = dma.hbm_to_vmem [thread:$0]  %s5096_s7, 16, %s111_s5, [#allocation12]  }
  0xe7   :  { %s3426_s10 = scalar_lea.hbm %s5098_s9, 512 }
  0xe8   :  { %p3427_p4 = scmp.ne.s32.totalorder %s5098_s9, %s3426_s10  ;;  %p3430_p5 = scmp.lt.u32.totalorder %s3426_s10, %s5098_s9 }
  0xea   :  { %p3432_p6 = pnand %p3430_p5, %p3427_p4 }
  0xec   :  { %3435 = shalt.err (!%p3432_p6)
}
  0xed   :  { %s3436_s16 = scalar_lea.vmem %s3882_s8, 512  ;;  %p3441_p8 = scmp.lt.s32.totalorder %s3882_s8, %s3882_s8 }
  0xee   :  { %p3437_p7 = scmp.ne.s32.totalorder %s3882_s8, %s3436_s16  ;;  %p3442_p9 = scmp.lt.s32.totalorder %s3436_s16, %s3436_s16 }
  0xf0   :  { %p3443_p10 = por %p3442_p9, %p3441_p8 }
  0xf2   :  { %p3444_p11 = pnand %p3443_p10, %p3437_p7 }
  0xf4   :  { %3447 = shalt.err (!%p3444_p11)
}
  0xf5   :  { %137 = dma.hbm_to_vmem [thread:$0]  %s5098_s9, 512, %s3882_s8, [#allocation15], %s5146_s29, %s5146_s29, %s5145_s0  }
  0xf6   :  { %s3592_s22 = smov [#allocation19]   ;;  %s3593_s2 = smov [#allocation22]  }
  0xf7   :  { %s153_s12 = sshll.u32 %s3592_s22, 4  ;;  %s179_s25 = sshll.u32 %s3593_s2, 4  ;;  %s154_s12 = int_to_ptr.vmem [resolvable:$true] %s153_s12  ;;  %s3916_s25 = int_to_ptr.vmem [resolvable:$true] %s179_s25 }
  0xf8   :  { %s3448_s26 = scalar_lea.hbm %s5100_s11, 1024 }
  0xf9   :  { %p3449_p12 = scmp.ne.s32.totalorder %s5100_s11, %s3448_s26  ;;  %p3452_p13 = scmp.lt.u32.totalorder %s3448_s26, %s5100_s11 }
  0xfb   :  { %p3454_p0 = pnand %p3452_p13, %p3449_p12 }
  0xfd   :  { %3457 = shalt.err (!%p3454_p0)
}
  0xfe   :  { %s3458_s9 = scalar_lea.vmem %s154_s12, 1024  ;;  %p3463_p2 = scmp.lt.s32.totalorder %s154_s12, %s154_s12 }
  0xff   :  { %p3459_p1 = scmp.ne.s32.totalorder %s154_s12, %s3458_s9  ;;  %p3464_p3 = scmp.lt.s32.totalorder %s3458_s9, %s3458_s9 }
 0x101   :  { %p3465_p4 = por %p3464_p3, %p3463_p2 }
 0x103   :  { %p3466_p5 = pnand %p3465_p4, %p3459_p1 }
 0x105   :  { %3469 = shalt.err (!%p3466_p5)
}
 0x106   :  { %159 = dma.hbm_to_vmem [thread:$0]  %s5100_s11, 1024, %s154_s12, [#allocation18], %s5146_s29, %s5146_s29, %s5145_s0  }
 0x107   :  { %s3470_s24 = scalar_lea.hbm %s5104_s15, 512 }
 0x108   :  { %p3471_p6 = scmp.ne.s32.totalorder %s5104_s15, %s3470_s24  ;;  %p3474_p7 = scmp.lt.u32.totalorder %s3470_s24, %s5104_s15 }
 0x10a   :  { %p3476_p8 = pnand %p3474_p7, %p3471_p6 }
 0x10c   :  { %3479 = shalt.err (!%p3476_p8)
}
 0x10d   :  { %s3480_s2 = scalar_lea.vmem %s3916_s25, 512  ;;  %p3485_p10 = scmp.lt.s32.totalorder %s3916_s25, %s3916_s25 }
 0x10e   :  { %p3481_p9 = scmp.ne.s32.totalorder %s3916_s25, %s3480_s2  ;;  %p3486_p11 = scmp.lt.s32.totalorder %s3480_s2, %s3480_s2 }
 0x110   :  { %p3487_p12 = por %p3486_p11, %p3485_p10 }
 0x112   :  { %p3488_p13 = pnand %p3487_p12, %p3481_p9 }
 0x114   :  { %3491 = shalt.err (!%p3488_p13)
}
 0x115   :  { %185 = dma.hbm_to_vmem [thread:$0]  %s5104_s15, 512, %s3916_s25, [#allocation21], %s5146_s29, %s5146_s29, %s5145_s0  }
 0x116   :  { %s3594_s4 = smov [#allocation25]   ;;  %s3595_s26 = smov [#allocation26]  }
 0x117   :  { %s204_s30 = sshll.u32 %s3594_s4, 4  ;;  %s216_s6 = sshll.u32 %s3595_s26, 4  ;;  %s205_s30 = int_to_ptr.vmem [resolvable:$true] %s204_s30  ;;  %s217_s6 = int_to_ptr.vmem [resolvable:$true] %s216_s6 }
 0x118   :  { %s3492_s10 = scalar_lea.hbm %s5107_s18, 16 }
 0x119   :  { %p3493_p0 = scmp.ne.s32.totalorder %s5107_s18, %s3492_s10  ;;  %p3496_p1 = scmp.lt.u32.totalorder %s3492_s10, %s5107_s18 }
 0x11b   :  { %p3498_p2 = pnand %p3496_p1, %p3493_p0 }
 0x11d   :  { %3501 = shalt.err (!%p3498_p2)
}
 0x11e   :  { %s3502_s15 = scalar_lea.vmem %s205_s30, 16  ;;  %s3506_s0 = scalar_lea.vmem %s205_s30, 32 }
 0x11f   :  { %p3503_p3 = scmp.ne.s32.totalorder %s205_s30, %s3502_s15  ;;  %p3507_p4 = scmp.lt.s32.totalorder %s205_s30, %s205_s30 }
 0x120   :  { %p3508_p5 = scmp.lt.s32.totalorder %s3506_s0, %s3502_s15 }
 0x122   :  { %p3509_p6 = por %p3508_p5, %p3507_p4 }
 0x124   :  { %p3510_p7 = pnand %p3509_p6, %p3503_p3 }
 0x126   :  { %3513 = shalt.err (!%p3510_p7)
}
 0x127   :  { %207 = dma.hbm_to_vmem [thread:$0]  %s5107_s18, 16, %s205_s30, [#allocation24]  }
 0x128   :  { %s3514_s16 = scalar_lea.hbm %s5109_s20, 16 }
 0x129   :  { %p3515_p8 = scmp.ne.s32.totalorder %s5109_s20, %s3514_s16  ;;  %p3518_p9 = scmp.lt.u32.totalorder %s3514_s16, %s5109_s20 }
 0x12b   :  { %p3520_p10 = pnand %p3518_p9, %p3515_p8 }
 0x12d   :  { %3523 = shalt.err (!%p3520_p10)
}
 0x12e   :  { %s3524_s11 = scalar_lea.vmem %s217_s6, 16  ;;  %s3528_s12 = scalar_lea.vmem %s217_s6, 32 }
 0x12f   :  { %p3525_p11 = scmp.ne.s32.totalorder %s217_s6, %s3524_s11  ;;  %p3529_p12 = scmp.lt.s32.totalorder %s217_s6, %s217_s6 }
 0x130   :  { %p3530_p13 = scmp.lt.s32.totalorder %s3528_s12, %s3524_s11 }
 0x132   :  { %p3531_p0 = por %p3530_p13, %p3529_p12 }
 0x134   :  { %p3532_p1 = pnand %p3531_p0, %p3525_p11 }
 0x136   :  { %3535 = shalt.err (!%p3532_p1)
}
 0x137   :  { %219 = dma.hbm_to_vmem [thread:$0]  %s5109_s20, 16, %s217_s6, [#allocation27]  }
 0x138   :  { %3558 = dma.done.wait [#allocation3], 512  }
 0x139   :  { %3559 = vsyncadd [#allocation3], 4294966784 }
 0x13a   :  { %3560 = dma.done.wait [#allocation6], 576  }
 0x13b   :  { %3561 = vsyncadd [#allocation6], 4294966720 }
 0x13c   :  { %3562 = dma.done.wait [#allocation9], 32  }
 0x13d   :  { %3563 = vsyncadd [#allocation9], 4294967264 }
 0x13e   :  { %3564 = dma.done.wait [#allocation12], 528  }
 0x13f   :  { %3565 = vsyncadd [#allocation12], 4294966768 }
 0x140   :  { %3566 = dma.done.wait [#allocation15], 1024  }
 0x141   :  { %3567 = vsyncadd [#allocation15], 4294966272 }
 0x142   :  { %3568 = dma.done.wait [#allocation18], 1040  }
 0x143   :  { %3569 = vsyncadd [#allocation18], 4294966256 }
 0x144   :  { %3570 = dma.done.wait [#allocation21], 528  }
 0x145   :  { %3571 = vsyncadd [#allocation21], 4294966768 }
 0x146   :  { %3572 = dma.done.wait [#allocation24], 32  }
 0x147   :  { %3573 = vsyncadd [#allocation24], 4294967264 }
 0x148   :  { %3574 = dma.done.wait [#allocation27], 16  }
 0x149   :  { %3575 = vsyncadd [#allocation27], 4294967280  ;;  %v3596_v0 = vmov 1   ;;  %vm276_vm0 = vcmask 130048   ;;  %v3979_v1 = vld [vmem:[#allocation2 + $0x10] sm:$0xff]  ;;  %v3981_v2 = vld [vmem:[#allocation2] sm:$0xff] }
 0x14a   :  { %3082 = vset.pattern.permute.xlu1 %v3596_v0  ;;  %3083 = vset.pattern.permute.xlu0 %v3596_v0  ;;  %v3983_v3 = vld [vmem:[#allocation2 + $0x18] sm:$0xff]  ;;  %v283_v4 = vsel %vm276_vm0, %v3979_v1, 0.0  ;;  %v277_v5 = vsel %vm276_vm0, %v3981_v2, 0.0  ;;  %v3989_v6 = vld [vmem:[#allocation2 + $0x8] sm:$0xff]  ;;  %v3997_v10 = vld [vmem:[#allocation5] sm:$0xff]  ;;  %v3597_v13 = vmov 2  }
 0x14b   :  { %284 = vadd.xlane.f32.xlu1 %v283_v4  ;;  %278 = vadd.xlane.f32.xlu0 %v277_v5  ;;  %v286_v7 = vsel %vm276_vm0, %v3983_v3, 0.0  ;;  %v280_v8 = vsel %vm276_vm0, %v3989_v6, 0.0  ;;  %v3995_v9 = vld [vmem:[#allocation5 + $0x8] sm:$0xff]  ;;  %v289_v12 = vsel %vm276_vm0, %v3997_v10, 0.0  ;;  %v5134_v14 = vmov 6   ;;  %v4013_v16 = vld [vmem:[#allocation5 + $0x10] sm:$0xff] }
 0x14c   :  { %v292_v11 = vsel %vm276_vm0, %v3995_v9, 0.0  ;;  %v3599_v15 = vmov 3   ;;  %v295_v17 = vsel %vm276_vm0, %v4013_v16, 0.0  ;;  %v4018_v18 = vld [vmem:[#allocation5 + $0x18] sm:$0xff]  ;;  %v3600_v19 = vmov 0   ;;  %s5150_s26 = sld [smem:[#allocation51_spill]] }
 0x14d   :  { %v298_v20 = vsel %vm276_vm0, %v4018_v18, 0.0  ;;  %v3601_v21 = vmov 4   ;;  %v3602_v22 = vmov 5   ;;  %v5126_v23 = vmov 7   ;;  %v4088_v32 = vld [vmem:[#allocation10] ss:$0 sm:$0xff] }
 0x14e   :  { %v5127_v24 = vmov 8   ;;  %v5128_v31 = vmov 11   ;;  %v4095_v34 = vld [vmem:[#allocation8] ss:$0 sm:$0xff]  ;;  %v5132_v40 = vmov 10   ;;  %v5122_v55 = vmov 14  }
 0x14f   :  { %287 = vadd.xlane.f32.xlu1 %v286_v7  ;;  %281 = vadd.xlane.f32.xlu0 %v280_v8  ;;  %vm1398_vm1 = vcmask 261120   ;;  %vm3613_vm2 = vmmov 0   ;;  %vm1612_vm3 = vcmask 1041409   ;;  %vm1614_vm4 = vcmask 1042434   ;;  %s3617_s10 = smov [#allocation28]  }
 0x150   :  { %vm1616_vm5 = vcmask 1043459   ;;  %vm1618_vm6 = vcmask 1044484   ;;  %vm1620_vm7 = vcmask 1045509   ;;  %vm1622_vm8 = vcmask 1046534   ;;  %s2562_s9 = sshll.u32 %s3617_s10, 4  ;;  %s2563_s9 = int_to_ptr.vmem [resolvable:$true] %s2562_s9 }
 0x151   :  { %vm1624_vm9 = vcmask 1047559   ;;  %vm1937_vm10 = vcmask 523264   ;;  %vm2288_vm11 = vcmask 1042432   ;;  %vm3616_vm12 = vmmov 1   ;;  %s3536_s8 = scalar_lea.vmem %s2563_s9, 64  ;;  %p3541_p3 = scmp.lt.s32.totalorder %s2563_s9, %s2563_s9 }
 0x152   :  { %v4082_v28 = vld [vmem:[%s5150_s26] ss:$0 sm:$0xff]  ;;  %vm3004_vm13 = vmpackc.low %vm2288_vm11, %vm3616_vm12  ;;  %vm2284_vm14 = vcmask 220160   ;;  %vm2554_vm15 = vcmask 19456   ;;  %p3537_p2 = scmp.ne.s32.totalorder %s2563_s9, %s3536_s8  ;;  %p3542_p4 = scmp.lt.s32.totalorder %s3536_s8, %s3536_s8 }
 0x153   :  { %293 = vadd.xlane.f32.xlu1 %v292_v11  ;;  %290 = vadd.xlane.f32.xlu0 %v289_v12 }
 0x154   :  { %p3543_p5 = por %p3542_p4, %p3541_p3 }
 0x156   :  { %p3544_p6 = pnand %p3543_p5, %p3537_p2 }
 0x164   :  { %420 = vperm.xlu1 %3082, %v3981_v2  }
 0x168   :  { %3084 = vset.pattern.permute.xlu1 %v3597_v13 }
 0x169   :  { %424 = vperm.xlu0 %3083, %v3989_v6  }
 0x16d   :  { %428 = vperm.xlu0 %3083, %v3979_v1  }
 0x171   :  { %432 = vperm.xlu0 %3083, %v3983_v3  }
 0x175   :  { %440 = vperm.xlu0 %3083, %v3995_v9  }
 0x179   :  { %3099 = vset.pattern.permute.xlu0 %v5134_v14 }
 0x17a   :  { %744 = vperm.xlu0 %3099, %v3989_v6  }
 0x17e   :  { %3100 = vset.pattern.permute.xlu0 %v3599_v15 }
 0x17f   :  { %556 = vperm.xlu0 %3100, %v3979_v1  }
 0x183   :  { %564 = vperm.xlu0 %3100, %v3997_v10  }
 0x187   :  { %3103 = vset.pattern.permute.xlu0 %v3600_v19 }
 0x188   :  { %296 = vadd.xlane.f32.xlu1 %v295_v17  ;;  %343 = vperm.xlu0 %3103, %v3981_v2  }
 0x18c   :  { %299 = vadd.xlane.f32.xlu1 %v298_v20  ;;  %348 = vperm.xlu0 %3103, %v3989_v6  }
 0x190   :  { %353 = vperm.xlu0 %3103, %v3979_v1  }
 0x194   :  { %378 = vperm.xlu0 %3103, %v4018_v18  }
 0x198   :  { %3106 = vset.pattern.permute.xlu0 %v3597_v13 }
 0x199   :  { %484 = vperm.xlu0 %3106, %v3981_v2  }
 0x19d   :  { %488 = vperm.xlu1 %3084, %v3989_v6   ;;  %492 = vperm.xlu0 %3106, %v3979_v1  }
 0x1a1   :  { %3085 = vset.pattern.permute.xlu1 %v3599_v15  ;;  %500 = vperm.xlu0 %3106, %v3997_v10  }
 0x1a2   :  { %548 = vperm.xlu1 %3085, %v3981_v2  }
 0x1a5   :  { %504 = vperm.xlu0 %3106, %v3995_v9  }
 0x1a6   :  { %3086 = vset.pattern.permute.xlu1 %v3600_v19 }
 0x1a7   :  { %358 = vperm.xlu1 %3086, %v3983_v3  }
 0x1a9   :  { %512 = vperm.xlu0 %3106, %v4018_v18  }
 0x1ab   :  { %3087 = vset.pattern.permute.xlu1 %v3599_v15 }
 0x1ac   :  { %552 = vperm.xlu1 %3087, %v3989_v6  }
 0x1ad   :  { %3113 = vset.pattern.permute.xlu0 %v3601_v21 }
 0x1ae   :  { %616 = vperm.xlu0 %3113, %v3989_v6  }
 0x1b0   :  { %3088 = vset.pattern.permute.xlu1 %v3601_v21 }
 0x1b1   :  { %612 = vperm.xlu1 %3088, %v3981_v2  }
 0x1b2   :  { %628 = vperm.xlu0 %3113, %v3997_v10  }
 0x1b5   :  { %3089 = vset.pattern.permute.xlu1 %v3597_v13 }
 0x1b6   :  { %496 = vperm.xlu1 %3089, %v3983_v3   ;;  %636 = vperm.xlu0 %3113, %v4013_v16  }
 0x1ba   :  { %3090 = vset.pattern.permute.xlu1 %v3600_v19  ;;  %3122 = vset.pattern.permute.xlu0 %v3602_v22 }
 0x1bb   :  { %363 = vperm.xlu1 %3090, %v3997_v10   ;;  %688 = vperm.xlu0 %3122, %v3983_v3  }
 0x1bf   :  { %3091 = vset.pattern.permute.xlu1 %v3596_v0  ;;  %696 = vperm.xlu0 %3122, %v3995_v9  }
 0x1c0   :  { %436 = vperm.xlu1 %3091, %v3997_v10  }
 0x1c3   :  { %704 = vperm.xlu0 %3122, %v4018_v18  }
 0x1c4   :  { %3092 = vset.pattern.permute.xlu1 %v3602_v22 }
 0x1c5   :  { %676 = vperm.xlu1 %3092, %v3981_v2  }
 0x1c7   :  { %3131 = vset.pattern.permute.xlu0 %v5126_v23 }
 0x1c8   :  { %812 = vperm.xlu0 %3131, %v3979_v1  }
 0x1c9   :  { %3093 = vset.pattern.permute.xlu1 %v3600_v19 }
 0x1ca   :  { %368 = vperm.xlu1 %3093, %v3995_v9  }
 0x1cc   :  { %820 = vperm.xlu0 %3131, %v3997_v10  }
 0x1ce   :  { %3094 = vset.pattern.permute.xlu1 %v3599_v15 }
 0x1cf   :  { %560 = vperm.xlu1 %3094, %v3983_v3  }
 0x1d0   :  { %828 = vperm.xlu0 %3131, %v4013_v16  }
 0x1d3   :  { %3095 = vset.pattern.permute.xlu1 %v3602_v22 }
 0x1d4   :  { %680 = vperm.xlu1 %3095, %v3989_v6   ;;  %3140 = vset.pattern.permute.xlu0 %v5127_v24 }
 0x1d5   :  { %872 = vperm.xlu0 %3140, %v3989_v6  }
 0x1d8   :  { %3096 = vset.pattern.permute.xlu1 %v3601_v21  ;;  %v4071_v25 = vpop.xlane.xlu0 %278  ;;  %v285_v46 = vpop.xlane.xlu1 %284 }
 0x1d9   :  { %620 = vperm.xlu1 %3096, %v3979_v1   ;;  %880 = vperm.xlu0 %3140, %v3983_v3   ;;  %v304_v54 = vmul.f32 0.0625, %v285_v46  ;;  %v302_v59 = vmul.f32 0.0625, %v4071_v25 }
 0x1db   :  { %v319_v57 = vmul.f32 %v4082_v28, %v304_v54  ;;  %v317_v5 = vmul.f32 %v4082_v28, %v302_v59 }
 0x1dc   :  { %v282_v26 = vpop.xlane.xlu0 %281  ;;  %v4135_v52 = vpop.xlane.xlu1 %287 }
 0x1dd   :  { %3097 = vset.pattern.permute.xlu1 %v5134_v14  ;;  %888 = vperm.xlu0 %3140, %v3995_v9   ;;  %v303_v27 = vmul.f32 0.0625, %v282_v26  ;;  %v4154_v63 = vadd.f32 %v4088_v32, %v319_v57  ;;  %v4167_v25 = vadd.f32 %v4088_v32, %v317_v5 }
 0x1de   :  { %740 = vperm.xlu1 %3097, %v3981_v2  }
 0x1df   :  { %v318_v30 = vmul.f32 %v4082_v28, %v303_v27 }
 0x1e0   :  { %v291_v29 = vpop.xlane.xlu0 %290  ;;  %v4145_v58 = vpop.xlane.xlu1 %293 }
 0x1e1   :  { %896 = vperm.xlu0 %3140, %v4018_v18   ;;  %v4092_v33 = vadd.f32 %v4088_v32, %v318_v30  ;;  %v306_v44 = vmul.f32 0.0625, %v291_v29 }
 0x1e2   :  { %3098 = vset.pattern.permute.xlu1 %v3601_v21 }
 0x1e3   :  { %624 = vperm.xlu1 %3098, %v3983_v3   ;;  %v321_v48 = vmul.f32 %v4082_v28, %v306_v44 }
 0x1e4   :  { %v421_v8 = vpop.permute.xlu1 %420 }
 0x1e5   :  { %3149 = vset.pattern.permute.xlu0 %v5128_v31  ;;  %v4131_v50 = vadd.f32 %v4088_v32, %v321_v48  ;;  %v451_v26 = vmul.f32 %v4095_v34, %v421_v8 }
 0x1e6   :  { %1064 = vperm.xlu0 %3149, %v3989_v6  }
 0x1e7   :  { %3101 = vset.pattern.permute.xlu1 %v3600_v19 }
 0x1e8   :  { %373 = vperm.xlu1 %3101, %v4013_v16   ;;  %v425_v35 = vpop.permute.xlu0 %424 }
 0x1e9   :  { %v452_v36 = vmul.f32 %v4095_v34, %v425_v35  ;;  %v5124_v35 = vmov 13  }
 0x1ea   :  { %1072 = vperm.xlu0 %3149, %v3983_v3  }
 0x1eb   :  { %v4101_v37 = vadd.f32 %v452_v36, %v4092_v33 }
 0x1ec   :  { %3102 = vset.pattern.permute.xlu1 %v3596_v0  ;;  %v429_v38 = vpop.permute.xlu0 %428 }
 0x1ed   :  { %444 = vperm.xlu1 %3102, %v4013_v16   ;;  %v453_v61 = vmul.f32 %v4095_v34, %v429_v38 }
 0x1ee   :  { %1080 = vperm.xlu0 %3149, %v3995_v9  }
 0x1ef   :  { %v461_v11 = vadd.f32 %v453_v61, %v4154_v63 }
 0x1f0   :  { %v4106_v39 = vpop.permute.xlu0 %432 }
 0x1f1   :  { %3104 = vset.pattern.permute.xlu1 %v3602_v22  ;;  %v469_v29 = vmax.f32 %v461_v11, 0.0 }
 0x1f2   :  { %684 = vperm.xlu1 %3104, %v3979_v1   ;;  %3156 = vset.pattern.permute.xlu0 %v5132_v40 }
 0x1f3   :  { %996 = vperm.xlu0 %3156, %v3981_v2  }
 0x1f4   :  { %v4112_v41 = vpop.permute.xlu0 %440 }
 0x1f6   :  { %3105 = vset.pattern.permute.xlu1 %v5126_v23 }
 0x1f7   :  { %804 = vperm.xlu1 %3105, %v3981_v2   ;;  %1004 = vperm.xlu0 %3156, %v3979_v1  }
 0x1f9   :  { %v745_v42 = vpop.permute.xlu0 %744 }
 0x1fa   :  { %v772_v43 = vmul.f32 %v4095_v34, %v745_v42  ;;  %v459_v42 = vadd.f32 %v451_v26, %v4167_v25 }
 0x1fb   :  { %3107 = vset.pattern.permute.xlu1 %v3596_v0  ;;  %1012 = vperm.xlu0 %3156, %v3997_v10   ;;  %v468_v0 = vmax.f32 %v4101_v37, 0.0 }
 0x1fc   :  { %v4121_v45 = vadd.f32 %v772_v43, %v4092_v33  ;;  %448 = vperm.xlu1 %3107, %v4018_v18  }
 0x1fe   :  { %v4124_v47 = vpop.permute.xlu0 %556 }
 0x1ff   :  { %1020 = vperm.xlu0 %3156, %v4013_v16  }
 0x200   :  { %3108 = vset.pattern.permute.xlu1 %v3599_v15 }
 0x201   :  { %568 = vperm.xlu1 %3108, %v3995_v9  }
 0x202   :  { %v565_v49 = vpop.permute.xlu0 %564 }
 0x203   :  { %1024 = vperm.xlu0 %3156, %v4018_v18   ;;  %v583_v51 = vmul.f32 %v4095_v34, %v565_v49  ;;  %v467_v49 = vmax.f32 %v459_v42, 0.0 }
 0x205   :  { %v4138_v53 = vadd.f32 %v583_v51, %v4131_v50  ;;  %3109 = vset.pattern.permute.xlu1 %v5126_v23  ;;  %v581_v51 = vmul.f32 %v4095_v34, %v4124_v47 }
 0x206   :  { %808 = vperm.xlu1 %3109, %v3989_v6  }
 0x207   :  { %3161 = vset.pattern.permute.xlu0 %v5122_v55  ;;  %v344_v56 = vpop.permute.xlu0 %343 }
 0x208   :  { %1256 = vperm.xlu0 %3161, %v3989_v6   ;;  %v387_v17 = vmul.f32 %v4095_v34, %v344_v56 }
 0x20a   :  { %3110 = vset.pattern.permute.xlu1 %v3597_v13  ;;  %v395_v36 = vadd.f32 %v387_v17, %v4167_v25 }
 0x20b   :  { %508 = vperm.xlu1 %3110, %v4013_v16   ;;  %v349_v60 = vpop.permute.xlu0 %348 }
 0x20c   :  { %v388_v62 = vmul.f32 %v4095_v34, %v349_v60  ;;  %1264 = vperm.xlu0 %3161, %v3983_v3   ;;  %v403_v44 = vmax.f32 %v395_v36, 0.0 }
 0x20e   :  { %v396_v4 = vadd.f32 %v388_v62, %v4092_v33  ;;  %v475_v57 = vadd.f32 %v467_v49, %v403_v44 }
 0x20f   :  { %3111 = vset.pattern.permute.xlu1 %v5134_v14  ;;  %v354_v7 = vpop.permute.xlu0 %353 }
 0x210   :  { %v404_v12 = vmax.f32 %v396_v4, 0.0  ;;  %v389_v13 = vmul.f32 %v4095_v34, %v354_v7  ;;  %748 = vperm.xlu1 %3111, %v3979_v1   ;;  %1268 = vperm.xlu0 %3161, %v3997_v10  }
 0x212   :  { %v476_v19 = vadd.f32 %v468_v0, %v404_v12  ;;  %v397_v20 = vadd.f32 %v389_v13, %v4154_v63  ;;  %v589_v0 = vadd.f32 %v581_v51, %v4154_v63  ;;  %v5120_v13 = vmov 15  }
 0x213   :  { %v4170_v27 = vpop.permute.xlu0 %378 }
 0x214   :  { %v405_v30 = vmax.f32 %v397_v20, 0.0  ;;  %3112 = vset.pattern.permute.xlu1 %v5127_v24  ;;  %3168 = vset.pattern.permute.xlu0 %v5124_v35  ;;  %v597_v20 = vmax.f32 %v589_v0, 0.0 }
 0x215   :  { %868 = vperm.xlu1 %3112, %v3981_v2   ;;  %v4176_v37 = vpop.xlane.xlu1 %296  ;;  %1188 = vperm.xlu0 %3168, %v3981_v2  }
 0x216   :  { %v477_v38 = vadd.f32 %v469_v29, %v405_v30 }
 0x218   :  { %v485_v43 = vpop.permute.xlu0 %484 }
 0x219   :  { %v515_v46 = vmul.f32 %v4095_v34, %v485_v43  ;;  %3114 = vset.pattern.permute.xlu1 %v3601_v21  ;;  %v4182_v48 = vpop.xlane.xlu1 %299  ;;  %1196 = vperm.xlu0 %3168, %v3979_v1  }
 0x21a   :  { %632 = vperm.xlu1 %3114, %v3995_v9  }
 0x21b   :  { %v523_v54 = vadd.f32 %v515_v46, %v4167_v25  ;;  %v5130_v46 = vmov 9  }
 0x21c   :  { %v493_v56 = vpop.permute.xlu0 %492 }
 0x21d   :  { %v531_v59 = vmax.f32 %v523_v54, 0.0  ;;  %v517_v60 = vmul.f32 %v4095_v34, %v493_v56  ;;  %v489_v61 = vpop.permute.xlu1 %488  ;;  %1212 = vperm.xlu0 %3168, %v4013_v16  }
 0x21e   :  { %v516_v62 = vmul.f32 %v4095_v34, %v489_v61  ;;  %3115 = vset.pattern.permute.xlu1 %v5134_v14 }
 0x21f   :  { %v4194_v4 = vadd.f32 %v531_v59, %v475_v57  ;;  %v525_v47 = vadd.f32 %v517_v60, %v4154_v63  ;;  %752 = vperm.xlu1 %3115, %v3983_v3  }
 0x220   :  { %v524_v5 = vadd.f32 %v516_v62, %v4092_v33  ;;  %v501_v7 = vpop.permute.xlu0 %500 }
 0x221   :  { %v533_v8 = vmax.f32 %v525_v47, 0.0  ;;  %v519_v11 = vmul.f32 %v4095_v34, %v501_v7  ;;  %v4200_v12 = vpop.permute.xlu1 %548  ;;  %3170 = vset.pattern.permute.xlu0 %v5120_v13 }
 0x222   :  { %v532_v17 = vmax.f32 %v524_v5, 0.0  ;;  %1324 = vperm.xlu0 %3170, %v3979_v1  }
 0x223   :  { %v541_v26 = vadd.f32 %v533_v8, %v477_v38  ;;  %v4205_v29 = vadd.f32 %v519_v11, %v4131_v50  ;;  %3116 = vset.pattern.permute.xlu1 %v3599_v15 }
 0x224   :  { %v540_v30 = vadd.f32 %v532_v17, %v476_v19  ;;  %572 = vperm.xlu1 %3116, %v4013_v16   ;;  %v505_v36 = vpop.permute.xlu0 %504 }
 0x225   :  { %v4209_v42 = vadd.f32 %v597_v20, %v541_v26 }
 0x226   :  { %v4211_v43 = vpop.permute.xlu1 %358  ;;  %1328 = vperm.xlu0 %3170, %v3983_v3  }
 0x228   :  { %3117 = vset.pattern.permute.xlu1 %v3602_v22  ;;  %v4215_v44 = vpop.permute.xlu0 %512 }
 0x229   :  { %692 = vperm.xlu1 %3117, %v3997_v10  }
 0x22a   :  { %1336 = vperm.xlu0 %3170, %v3995_v9  }
 0x22b   :  { %v553_v38 = vpop.permute.xlu1 %552 }
 0x22c   :  { %v580_v19 = vmul.f32 %v4095_v34, %v553_v38 }
 0x22d   :  { %3118 = vset.pattern.permute.xlu1 %v5130_v46  ;;  %v617_v49 = vpop.permute.xlu0 %616 }
 0x22e   :  { %v588_v51 = vadd.f32 %v580_v19, %v4092_v33  ;;  %v644_v54 = vmul.f32 %v4095_v34, %v617_v49  ;;  %932 = vperm.xlu1 %3118, %v3981_v2   ;;  %1340 = vperm.xlu0 %3170, %v4013_v16  }
 0x230   :  { %v596_v56 = vmax.f32 %v588_v51, 0.0  ;;  %v652_v57 = vadd.f32 %v644_v54, %v4092_v33  ;;  %v4226_v59 = vpop.permute.xlu1 %612 }
 0x231   :  { %v629_v60 = vpop.permute.xlu0 %628 }
 0x232   :  { %v604_v61 = vadd.f32 %v596_v56, %v540_v30  ;;  %v660_v62 = vmax.f32 %v652_v57, 0.0  ;;  %v647_v0 = vmul.f32 %v4095_v34, %v629_v60  ;;  %3119 = vset.pattern.permute.xlu1 %v3599_v15  ;;  %v307_v30 = vmul.f32 0.0625, %v4145_v58 }
 0x233   :  { %576 = vperm.xlu1 %3119, %v4018_v18   ;;  %v535_v56 = vmax.f32 %v4205_v29, 0.0  ;;  %v456_v58 = vmul.f32 %v4095_v34, %v4112_v41  ;;  %v520_v29 = vmul.f32 %v4095_v34, %v505_v36 }
 0x234   :  { %v4231_v47 = vadd.f32 %v660_v62, %v604_v61  ;;  %v655_v5 = vadd.f32 %v647_v0, %v4131_v50  ;;  %v322_v54 = vmul.f32 %v4082_v28, %v307_v30  ;;  %v599_v62 = vmax.f32 %v4138_v53, 0.0 }
 0x235   :  { %v4234_v7 = vpop.permute.xlu1 %496  ;;  %v4236_v8 = vpop.permute.xlu0 %636 }
 0x237   :  { %3120 = vset.pattern.permute.xlu1 %v5126_v23 }
 0x238   :  { %816 = vperm.xlu1 %3120, %v3983_v3  }
 0x23a   :  { %v364_v11 = vpop.permute.xlu1 %363  ;;  %v4240_v17 = vpop.permute.xlu0 %688 }
 0x23b   :  { %v391_v20 = vmul.f32 %v4095_v34, %v364_v11 }
 0x23c   :  { %3121 = vset.pattern.permute.xlu1 %v5130_v46 }
 0x23d   :  { %936 = vperm.xlu1 %3121, %v3989_v6   ;;  %v399_v38 = vadd.f32 %v391_v20, %v4131_v50  ;;  %v4267_v20 = vadd.f32 %v4088_v32, %v322_v54 }
 0x23e   :  { %v4245_v15 = vpop.permute.xlu0 %696 }
 0x23f   :  { %v437_v26 = vpop.permute.xlu1 %436  ;;  %v407_v57 = vmax.f32 %v399_v38, 0.0 }
 0x240   :  { %v455_v19 = vmul.f32 %v4095_v34, %v437_v26  ;;  %v663_v26 = vmax.f32 %v655_v5, 0.0 }
 0x241   :  { %3123 = vset.pattern.permute.xlu1 %v5134_v14 }
 0x242   :  { %v463_v49 = vadd.f32 %v455_v19, %v4131_v50  ;;  %756 = vperm.xlu1 %3123, %v3997_v10   ;;  %v4253_v51 = vpop.permute.xlu0 %704  ;;  %v464_v19 = vadd.f32 %v456_v58, %v4267_v20 }
 0x244   :  { %v471_v60 = vmax.f32 %v463_v49, 0.0  ;;  %v4257_v61 = vpop.permute.xlu1 %676  ;;  %v472_v5 = vmax.f32 %v464_v19, 0.0 }
 0x246   :  { %v479_v0 = vadd.f32 %v471_v60, %v407_v57  ;;  %3124 = vset.pattern.permute.xlu1 %v5127_v24  ;;  %v528_v57 = vadd.f32 %v520_v29, %v4267_v20  ;;  %v305_v29 = vmul.f32 0.0625, %v4135_v52  ;;  %v390_v52 = vmul.f32 %v4095_v34, %v4211_v43 }
 0x247   :  { %876 = vperm.xlu1 %3124, %v3979_v1   ;;  %v4264_v11 = vpop.permute.xlu0 %812 }
 0x248   :  { %v543_v30 = vadd.f32 %v535_v56, %v479_v0 }
 0x249   :  { %v369_v38 = vpop.permute.xlu1 %368 }
 0x24a   :  { %v392_v41 = vmul.f32 %v4095_v34, %v369_v38  ;;  %v607_v53 = vadd.f32 %v599_v62, %v543_v30 }
 0x24b   :  { %3125 = vset.pattern.permute.xlu1 %v3601_v21  ;;  %v821_v49 = vpop.permute.xlu0 %820  ;;  %v536_v21 = vmax.f32 %v528_v57, 0.0 }
 0x24c   :  { %v400_v60 = vadd.f32 %v392_v41, %v4267_v20  ;;  %v839_v54 = vmul.f32 %v4095_v34, %v821_v49  ;;  %640 = vperm.xlu1 %3125, %v4018_v18   ;;  %v4277_v36 = vadd.f32 %v663_v26, %v607_v53  ;;  %v320_v53 = vmul.f32 %v4082_v28, %v305_v29 }
 0x24d   :  { %v454_v29 = vmul.f32 %v4095_v34, %v4106_v39 }
 0x24e   :  { %v408_v56 = vmax.f32 %v400_v60, 0.0  ;;  %v4280_v58 = vadd.f32 %v839_v54, %v4131_v50  ;;  %v561_v0 = vpop.permute.xlu1 %560  ;;  %v788_v54 = vmax.f32 %v4121_v45, 0.0 }
 0x24f   :  { %v4282_v62 = vpop.permute.xlu0 %828 }
 0x250   :  { %v480_v30 = vadd.f32 %v472_v5, %v408_v56  ;;  %3126 = vset.pattern.permute.xlu1 %v5134_v14 }
 0x251   :  { %760 = vperm.xlu1 %3126, %v3995_v9  }
 0x252   :  { %v4287_v38 = vadd.f32 %v536_v21, %v480_v30  ;;  %v4306_v30 = vadd.f32 %v4088_v32, %v320_v53 }
 0x253   :  { %v681_v26 = vpop.permute.xlu1 %680 }
 0x254   :  { %v708_v19 = vmul.f32 %v4095_v34, %v681_v26  ;;  %v873_v41 = vpop.permute.xlu0 %872  ;;  %v518_v26 = vmul.f32 %v4095_v34, %v4234_v7  ;;  %v398_v45 = vadd.f32 %v390_v52, %v4306_v30 }
 0x255   :  { %v900_v49 = vmul.f32 %v4095_v34, %v873_v41  ;;  %3127 = vset.pattern.permute.xlu1 %v5132_v40 }
 0x256   :  { %v716_v57 = vadd.f32 %v708_v19, %v4092_v33  ;;  %1000 = vperm.xlu1 %3127, %v3989_v6   ;;  %v582_v19 = vmul.f32 %v4095_v34, %v561_v0  ;;  %v526_v39 = vadd.f32 %v518_v26, %v4306_v30  ;;  %v406_v7 = vmax.f32 %v398_v45, 0.0 }
 0x257   :  { %v4298_v60 = vadd.f32 %v900_v49, %v4092_v33  ;;  %v462_v49 = vadd.f32 %v454_v29, %v4306_v30 }
 0x258   :  { %v724_v5 = vmax.f32 %v716_v57, 0.0  ;;  %v4301_v56 = vpop.permute.xlu1 %620  ;;  %v4303_v21 = vpop.permute.xlu0 %880  ;;  %v534_v52 = vmax.f32 %v526_v39, 0.0 }
 0x259   :  { %v470_v0 = vmax.f32 %v462_v49, 0.0 }
 0x25a   :  { %v732_v43 = vadd.f32 %v724_v5, %v4231_v47  ;;  %3128 = vset.pattern.permute.xlu1 %v3602_v22  ;;  %v590_v47 = vadd.f32 %v582_v19, %v4306_v30 }
 0x25b   :  { %700 = vperm.xlu1 %3128, %v4013_v16   ;;  %v478_v29 = vadd.f32 %v470_v0, %v406_v7 }
 0x25c   :  { %v4317_v41 = vpop.permute.xlu0 %888  ;;  %v4319_v53 = vadd.f32 %v788_v54, %v732_v43  ;;  %v710_v54 = vmul.f32 %v4095_v34, %v4240_v17  ;;  %v598_v43 = vmax.f32 %v590_v47, 0.0 }
 0x25d   :  { %v4323_v57 = vpop.permute.xlu1 %740  ;;  %v542_v45 = vadd.f32 %v534_v52, %v478_v29 }
 0x25e   :  { %v718_v19 = vadd.f32 %v710_v54, %v4306_v30 }
 0x25f   :  { %3129 = vset.pattern.permute.xlu1 %v5130_v46  ;;  %v606_v49 = vadd.f32 %v598_v43, %v542_v45 }
 0x260   :  { %940 = vperm.xlu1 %3129, %v3979_v1   ;;  %v4328_v22 = vpop.permute.xlu0 %896  ;;  %v726_v17 = vmax.f32 %v718_v19, 0.0  ;;  %v394_v19 = vmul.f32 %v4095_v34, %v4170_v27 }
 0x261   :  { %5151 = vst [vmem:[#allocation39_spill] sm:$0xff] %v4328_v22 }
 0x262   :  { %v625_v5 = vpop.permute.xlu1 %624 }
 0x263   :  { %v646_v26 = vmul.f32 %v4095_v34, %v625_v5 }
 0x264   :  { %3130 = vset.pattern.permute.xlu1 %v5128_v31 }
 0x265   :  { %v654_v13 = vadd.f32 %v646_v26, %v4306_v30  ;;  %1060 = vperm.xlu1 %3130, %v3981_v2   ;;  %v4337_v55 = vpop.permute.xlu0 %1064 }
 0x267   :  { %v662_v39 = vmax.f32 %v654_v13, 0.0  ;;  %v4339_v35 = vpop.permute.xlu1 %373  ;;  %v309_v13 = vmul.f32 0.0625, %v4182_v48  ;;  %v522_v48 = vmul.f32 %v4095_v34, %v4215_v44 }
 0x269   :  { %v670_v7 = vadd.f32 %v662_v39, %v606_v49  ;;  %3132 = vset.pattern.permute.xlu1 %v5126_v23  ;;  %v4342_v47 = vpop.permute.xlu0 %1072  ;;  %v324_v43 = vmul.f32 %v4082_v28, %v309_v13 }
 0x26a   :  { %824 = vperm.xlu1 %3132, %v3995_v9  }
 0x26b   :  { %v4345_v0 = vadd.f32 %v726_v17, %v670_v7  ;;  %v4366_v49 = vadd.f32 %v4088_v32, %v324_v43  ;;  %v5135_v43 = vmov 12  }
 0x26c   :  { %v4347_v52 = vpop.permute.xlu1 %444 }
 0x26d   :  { %v4349_v54 = vpop.permute.xlu0 %1080  ;;  %v402_v13 = vadd.f32 %v394_v19, %v4366_v49 }
 0x26e   :  { %5152 = vst [vmem:[#allocation40_spill] sm:$0xff] %v4349_v54  ;;  %3133 = vset.pattern.permute.xlu1 %v5130_v46 }
 0x26f   :  { %944 = vperm.xlu1 %3133, %v3983_v3  }
 0x271   :  { %v685_v5 = vpop.permute.xlu1 %684 }
 0x272   :  { %v4354_v29 = vpop.permute.xlu0 %996 }
 0x273   :  { %3134 = vset.pattern.permute.xlu1 %v5134_v14 }
 0x274   :  { %764 = vperm.xlu1 %3134, %v4013_v16  }
 0x276   :  { %v4359_v26 = vpop.permute.xlu1 %804  ;;  %v4361_v45 = vpop.permute.xlu0 %1004 }
 0x277   :  { %5153 = vst [vmem:[#allocation41_spill] sm:$0xff] %v4361_v45 }
 0x278   :  { %3135 = vset.pattern.permute.xlu1 %v5127_v24  ;;  %v530_v24 = vadd.f32 %v522_v48, %v4366_v49 }
 0x279   :  { %884 = vperm.xlu1 %3135, %v3997_v10  }
 0x27a   :  { %v1013_v39 = vpop.permute.xlu0 %1012  ;;  %v538_v19 = vmax.f32 %v530_v24, 0.0  ;;  %v709_v24 = vmul.f32 %v4095_v34, %v685_v5  ;;  %v837_v5 = vmul.f32 %v4095_v34, %v4264_v11 }
 0x27b   :  { %v1031_v17 = vmul.f32 %v4095_v34, %v1013_v39  ;;  %v449_v7 = vpop.permute.xlu1 %448  ;;  %v410_v39 = vmax.f32 %v402_v13, 0.0  ;;  %v916_v13 = vmax.f32 %v4298_v60, 0.0 }
 0x27c   :  { %v458_v23 = vmul.f32 %v4095_v34, %v449_v7  ;;  %v5156_v7 = vmov 6  }
 0x27d   :  { %v4376_v27 = vadd.f32 %v1031_v17, %v4131_v50  ;;  %3136 = vset.pattern.permute.xlu1 %v5135_v43 }
 0x27e   :  { %v466_v31 = vadd.f32 %v458_v23, %v4366_v49  ;;  %1124 = vperm.xlu1 %3136, %v3981_v2   ;;  %v4382_v44 = vpop.permute.xlu0 %1020  ;;  %v645_v23 = vmul.f32 %v4095_v34, %v4301_v56 }
 0x27f   :  { %5154 = vst [vmem:[#allocation42_spill] sm:$0xff] %v4376_v27  ;;  %5155 = vst [vmem:[#allocation43_spill] sm:$0xff] %v4382_v44  ;;  %v5158_v44 = vmov 10   ;;  %v5163_v27 = vmov 11  }
 0x280   :  { %v474_v46 = vmax.f32 %v466_v31, 0.0  ;;  %v569_v40 = vpop.permute.xlu1 %568 }
 0x281   :  { %v584_v11 = vmul.f32 %v4095_v34, %v569_v40  ;;  %v712_v40 = vmul.f32 %v4095_v34, %v4245_v15 }
 0x282   :  { %v482_v14 = vadd.f32 %v474_v46, %v410_v39  ;;  %3137 = vset.pattern.permute.xlu1 %v5156_v7  ;;  %v4385_v17 = vpop.permute.xlu0 %1024  ;;  %v717_v7 = vadd.f32 %v709_v24, %v4154_v63  ;;  %v845_v24 = vadd.f32 %v837_v5, %v4154_v63 }
 0x283   :  { %5157 = vst [vmem:[#allocation44_spill] sm:$0xff] %v4385_v17  ;;  %768 = vperm.xlu1 %3137, %v4018_v18   ;;  %v5161_v17 = vmov 12   ;;  %v592_v5 = vadd.f32 %v584_v11, %v4267_v20 }
 0x284   :  { %v4388_v43 = vadd.f32 %v538_v19, %v482_v14  ;;  %v653_v14 = vadd.f32 %v645_v23, %v4154_v63  ;;  %v725_v54 = vmax.f32 %v717_v7, 0.0 }
 0x285   :  { %v809_v48 = vpop.permute.xlu1 %808 }
 0x286   :  { %v836_v45 = vmul.f32 %v4095_v34, %v809_v48 }
 0x287   :  { %3138 = vset.pattern.permute.xlu1 %v5158_v44  ;;  %v4394_v31 = vpop.permute.xlu0 %1256 }
 0x288   :  { %5159 = vst [vmem:[#allocation45_spill] sm:$0xff] %v4394_v31  ;;  %v844_v46 = vadd.f32 %v836_v45, %v4092_v33  ;;  %1008 = vperm.xlu1 %3138, %v3983_v3   ;;  %v661_v45 = vmax.f32 %v653_v14, 0.0 }
 0x28a   :  { %v852_v39 = vmax.f32 %v844_v46, 0.0  ;;  %v4401_v19 = vpop.permute.xlu1 %508 }
 0x28b   :  { %v4403_v56 = vpop.permute.xlu0 %1264 }
 0x28c   :  { %5160 = vst [vmem:[#allocation46_spill] sm:$0xff] %v4403_v56  ;;  %v860_v48 = vadd.f32 %v852_v39, %v4319_v53  ;;  %3139 = vset.pattern.permute.xlu1 %v5161_v17  ;;  %v5162_v53 = vmov 9   ;;  %v669_v39 = vadd.f32 %v661_v45, %v4209_v42  ;;  %v720_v45 = vadd.f32 %v712_v40, %v4267_v20 }
 0x28d   :  { %1128 = vperm.xlu1 %3139, %v3989_v6  }
 0x28e   :  { %v4411_v60 = vadd.f32 %v916_v13, %v860_v48  ;;  %v733_v14 = vadd.f32 %v725_v54, %v669_v39 }
 0x28f   :  { %v749_v23 = vpop.permute.xlu1 %748  ;;  %v1269_v46 = vpop.permute.xlu0 %1268 }
 0x290   :  { %v773_v31 = vmul.f32 %v4095_v34, %v749_v23  ;;  %v1287_v56 = vmul.f32 %v4095_v34, %v1269_v46  ;;  %v853_v23 = vmax.f32 %v845_v24, 0.0 }
 0x291   :  { %3141 = vset.pattern.permute.xlu1 %v5162_v53 }
 0x292   :  { %v781_v22 = vadd.f32 %v773_v31, %v4154_v63  ;;  %v4421_v13 = vadd.f32 %v1287_v56, %v4131_v50  ;;  %948 = vperm.xlu1 %3141, %v3997_v10   ;;  %v600_v56 = vmax.f32 %v592_v5, 0.0 }
 0x294   :  { %v789_v7 = vmax.f32 %v781_v22, 0.0  ;;  %v4424_v48 = vpop.permute.xlu1 %868  ;;  %v5164_v22 = vmov 7   ;;  %v608_v39 = vadd.f32 %v600_v56, %v4287_v38  ;;  %v5166_v38 = vmov 8  }
 0x296   :  { %v797_v46 = vadd.f32 %v789_v7, %v733_v14  ;;  %3142 = vset.pattern.permute.xlu1 %v5163_v27  ;;  %v728_v7 = vmax.f32 %v720_v45, 0.0 }
 0x297   :  { %1068 = vperm.xlu1 %3142, %v3979_v1  }
 0x298   :  { %v4431_v42 = vadd.f32 %v853_v23, %v797_v46  ;;  %v5165_v46 = vmov 13  }
 0x299   :  { %v633_v31 = vpop.permute.xlu1 %632 }
 0x29a   :  { %v648_v54 = vmul.f32 %v4095_v34, %v633_v31 }
 0x29b   :  { %3143 = vset.pattern.permute.xlu1 %v5164_v22 }
 0x29c   :  { %v656_v24 = vadd.f32 %v648_v54, %v4267_v20  ;;  %832 = vperm.xlu1 %3143, %v4018_v18  }
 0x29e   :  { %v664_v11 = vmax.f32 %v656_v24, 0.0  ;;  %v753_v14 = vpop.permute.xlu1 %752 }
 0x29f   :  { %v774_v45 = vmul.f32 %v4095_v34, %v753_v14 }
 0x2a0   :  { %v672_v15 = vadd.f32 %v664_v11, %v608_v39  ;;  %3144 = vset.pattern.permute.xlu1 %v5162_v53  ;;  %v5167_v39 = vmov 14   ;;  %v902_v11 = vmul.f32 %v4095_v34, %v4303_v21 }
 0x2a1   :  { %952 = vperm.xlu1 %3144, %v3995_v9   ;;  %v782_v24 = vadd.f32 %v774_v45, %v4306_v30 }
 0x2a2   :  { %v4441_v23 = vadd.f32 %v728_v7, %v672_v15  ;;  %v910_v14 = vadd.f32 %v902_v11, %v4306_v30  ;;  %v308_v11 = vmul.f32 0.0625, %v4176_v37 }
 0x2a3   :  { %v4443_v5 = vpop.permute.xlu1 %572  ;;  %v790_v15 = vmax.f32 %v782_v24, 0.0 }
 0x2a5   :  { %3145 = vset.pattern.permute.xlu1 %v5165_v46 }
 0x2a6   :  { %1192 = vperm.xlu1 %3145, %v3989_v6  }
 0x2a8   :  { %v693_v40 = vpop.permute.xlu1 %692 }
 0x2a9   :  { %v711_v18 = vmul.f32 %v4095_v34, %v693_v40  ;;  %v798_v40 = vadd.f32 %v790_v15, %v4345_v0 }
 0x2aa   :  { %3146 = vset.pattern.permute.xlu1 %v5166_v38 }
 0x2ab   :  { %v719_v31 = vadd.f32 %v711_v18, %v4131_v50  ;;  %892 = vperm.xlu1 %3146, %v4013_v16  }
 0x2ad   :  { %v727_v56 = vmax.f32 %v719_v31, 0.0  ;;  %v4451_v54 = vpop.permute.xlu1 %932  ;;  %v918_v31 = vmax.f32 %v910_v14, 0.0 }
 0x2af   :  { %v735_v22 = vadd.f32 %v727_v56, %v4277_v36  ;;  %3147 = vset.pattern.permute.xlu1 %v5161_v17 }
 0x2b0   :  { %1132 = vperm.xlu1 %3147, %v3979_v1  }
 0x2b2   :  { %v577_v6 = vpop.permute.xlu1 %576 }
 0x2b4   :  { %3148 = vset.pattern.permute.xlu1 %v5167_v39 }
 0x2b5   :  { %1252 = vperm.xlu1 %3148, %v3981_v2  }
 0x2b7   :  { %v817_v7 = vpop.permute.xlu1 %816 }
 0x2b8   :  { %v838_v36 = vmul.f32 %v4095_v34, %v817_v7  ;;  %v586_v7 = vmul.f32 %v4095_v34, %v577_v6 }
 0x2b9   :  { %3150 = vset.pattern.permute.xlu1 %v5158_v44 }
 0x2ba   :  { %v846_v1 = vadd.f32 %v838_v36, %v4306_v30  ;;  %1016 = vperm.xlu1 %3150, %v3995_v9  }
 0x2bc   :  { %v854_v18 = vmax.f32 %v846_v1, 0.0  ;;  %v937_v38 = vpop.permute.xlu1 %936 }
 0x2bd   :  { %v964_v2 = vmul.f32 %v4095_v34, %v937_v38 }
 0x2be   :  { %v862_v21 = vadd.f32 %v854_v18, %v798_v40  ;;  %3151 = vset.pattern.permute.xlu1 %v5161_v17  ;;  %v323_v40 = vmul.f32 %v4082_v28, %v308_v11 }
 0x2bf   :  { %v972_v56 = vadd.f32 %v964_v2, %v4092_v33  ;;  %1136 = vperm.xlu1 %3151, %v3983_v3   ;;  %v855_v3 = vmax.f32 %v4280_v58, 0.0  ;;  %v457_v58 = vmul.f32 %v4095_v34, %v4347_v52  ;;  %v521_v52 = vmul.f32 %v4095_v34, %v4401_v19 }
 0x2c0   :  { %v4472_v44 = vadd.f32 %v918_v31, %v862_v21  ;;  %v4497_v28 = vadd.f32 %v4088_v32, %v323_v40  ;;  %v5168_v32 = vmov 15   ;;  %v707_v19 = vmul.f32 %v4095_v34, %v4257_v61 }
 0x2c1   :  { %v980_v45 = vmax.f32 %v972_v56, 0.0  ;;  %v757_v24 = vpop.permute.xlu1 %756  ;;  %v1092_v40 = vmul.f32 %v4095_v34, %v4337_v55 }
 0x2c2   :  { %v775_v9 = vmul.f32 %v4095_v34, %v757_v24  ;;  %v3175_v24 = vld [vmem:[#allocation2] sm:$0xff] }
 0x2c3   :  { %v4476_v0 = vadd.f32 %v980_v45, %v4411_v60  ;;  %3152 = vset.pattern.permute.xlu1 %v5162_v53  ;;  %v594_v60 = vadd.f32 %v586_v7, %v4366_v49 }
 0x2c4   :  { %v783_v15 = vadd.f32 %v775_v9, %v4131_v50  ;;  %956 = vperm.xlu1 %3152, %v4013_v16   ;;  %v714_v16 = vmul.f32 %v4095_v34, %v4253_v51  ;;  %v393_v51 = vmul.f32 %v4095_v34, %v4339_v35  ;;  %v465_v9 = vadd.f32 %v457_v58, %v4497_v28 }
 0x2c5   :  { %v602_v31 = vmax.f32 %v594_v60, 0.0  ;;  %v649_v58 = vmul.f32 %v4095_v34, %v4236_v8  ;;  %v899_v8 = vmul.f32 %v4095_v34, %v4424_v48  ;;  %v963_v48 = vmul.f32 %v4095_v34, %v4451_v54  ;;  %v1387_v54 = vld [vmem:[#allocation11] sm:$0xff] }
 0x2c6   :  { %v791_v36 = vmax.f32 %v783_v15, 0.0  ;;  %v877_v14 = vpop.permute.xlu1 %876  ;;  %v722_v45 = vadd.f32 %v714_v16, %v4366_v49 }
 0x2c7   :  { %v901_v1 = vmul.f32 %v4095_v34, %v877_v14 }
 0x2c8   :  { %v799_v18 = vadd.f32 %v791_v36, %v735_v22  ;;  %3153 = vset.pattern.permute.xlu1 %v5163_v27  ;;  %v579_v22 = vmul.f32 %v4095_v34, %v4200_v12  ;;  %v529_v36 = vadd.f32 %v521_v52, %v4497_v28 }
 0x2c9   :  { %v909_v37 = vadd.f32 %v901_v1, %v4154_v63  ;;  %1076 = vperm.xlu1 %3153, %v3997_v10   ;;  %v643_v10 = vmul.f32 %v4095_v34, %v4226_v59  ;;  %v585_v59 = vmul.f32 %v4095_v34, %v4443_v5  ;;  %v730_v1 = vmax.f32 %v722_v45, 0.0 }
 0x2ca   :  { %v4492_v6 = vadd.f32 %v855_v3, %v799_v18  ;;  %v587_v35 = vadd.f32 %v579_v22, %v4167_v25  ;;  %v401_v3 = vadd.f32 %v393_v51, %v4497_v28  ;;  %v771_v5 = vmul.f32 %v4095_v34, %v4323_v57 }
 0x2cb   :  { %v917_v38 = vmax.f32 %v909_v37, 0.0  ;;  %v641_v2 = vpop.permute.xlu1 %640  ;;  %v651_v15 = vadd.f32 %v643_v10, %v4167_v25  ;;  %v593_v60 = vadd.f32 %v585_v59, %v4497_v28  ;;  %v4532_v37 = vld [vmem:[#allocation5 + $0x18] sm:$0xff]  ;;  %v715_v57 = vadd.f32 %v707_v19, %v4167_v25 }
 0x2cc   :  { %v650_v21 = vmul.f32 %v4095_v34, %v641_v2  ;;  %v595_v16 = vmax.f32 %v587_v35, 0.0  ;;  %v409_v55 = vmax.f32 %v401_v3, 0.0  ;;  %v537_v2 = vmax.f32 %v529_v36, 0.0  ;;  %v3177_v19 = vld [vmem:[#allocation2 + $0x18] sm:$0xff] }
 0x2cd   :  { %v4509_v56 = vadd.f32 %v917_v38, %v4431_v42  ;;  %3154 = vset.pattern.permute.xlu1 %v5168_v32  ;;  %v610_v42 = vadd.f32 %v602_v31, %v4388_v43  ;;  %v473_v43 = vmax.f32 %v465_v9, 0.0  ;;  %v779_v10 = vadd.f32 %v771_v5, %v4167_v25 }
 0x2ce   :  { %v658_v12 = vadd.f32 %v650_v21, %v4366_v49  ;;  %1316 = vperm.xlu1 %3154, %v3175_v24   ;;  %v659_v21 = vmax.f32 %v651_v15, 0.0  ;;  %v1100_v51 = vadd.f32 %v1092_v40, %v4092_v33  ;;  %v657_v9 = vadd.f32 %v649_v58, %v4497_v28 }
 0x2cf   :  { %v481_v45 = vadd.f32 %v473_v43, %v409_v55  ;;  %v723_v59 = vmax.f32 %v715_v57, 0.0  ;;  %v787_v36 = vmax.f32 %v779_v10, 0.0  ;;  %v3178_v57 = vld [vmem:[#allocation2 + $0x8] sm:$0xff] }
 0x2d0   :  { %v666_v11 = vmax.f32 %v658_v12, 0.0  ;;  %v761_v7 = vpop.permute.xlu1 %760  ;;  %v601_v12 = vmax.f32 %v593_v60, 0.0  ;;  %v665_v5 = vmax.f32 %v657_v9, 0.0  ;;  %v1388_v60 = vld [vmem:[#allocation11 + $0x8] sm:$0xff] }
 0x2d1   :  { %v776_v14 = vmul.f32 %v4095_v34, %v761_v7  ;;  %v2917_v55 = vpack.c.bf16 %v1388_v60, %v1387_v54 }
 0x2d2   :  { %v674_v61 = vadd.f32 %v666_v11, %v610_v42  ;;  %3155 = vset.pattern.permute.xlu1 %v5162_v53  ;;  %v835_v53 = vmul.f32 %v4095_v34, %v4359_v26  ;;  %v603_v26 = vadd.f32 %v595_v16, %v4194_v4  ;;  %v545_v11 = vadd.f32 %v537_v2, %v481_v45 }
 0x2d3   :  { %v784_v18 = vadd.f32 %v776_v14, %v4267_v20  ;;  %960 = vperm.xlu1 %3155, %v4532_v37   ;;  %v907_v4 = vadd.f32 %v899_v8, %v4167_v25  ;;  %v971_v16 = vadd.f32 %v963_v48, %v4167_v25  ;;  %2918 = vmatprep.subr.bf16.mxu0 %v2917_v55  ;;  %v4574_v48 = vld [vmem:[#allocation8] ss:$0 sm:$0xff] }
 0x2d4   :  { %v4538_v38 = vadd.f32 %v730_v1, %v674_v61  ;;  %v843_v42 = vadd.f32 %v835_v53, %v4167_v25  ;;  %v667_v7 = vadd.f32 %v659_v21, %v603_v26  ;;  %v609_v14 = vadd.f32 %v601_v12, %v545_v11  ;;  %2920 = vmatpush3.bf16.msra.mxu0 %v2917_v55 }
 0x2d5   :  { %v792_v22 = vmax.f32 %v784_v18, 0.0  ;;  %v1001_v31 = vpop.permute.xlu1 %1000  ;;  %v1027_v61 = vmul.f32 %v4095_v34, %v4354_v29  ;;  %v979_v8 = vmax.f32 %v971_v16, 0.0  ;;  %v841_v55 = vmul.f32 %v4574_v48, %v4282_v62 }
 0x2d6   :  { %v1028_v52 = vmul.f32 %v4095_v34, %v1001_v31  ;;  %v731_v40 = vadd.f32 %v723_v59, %v667_v7  ;;  %v851_v18 = vmax.f32 %v843_v42, 0.0  ;;  %v673_v31 = vadd.f32 %v665_v5, %v609_v14  ;;  %v4571_v59 = vld [vmem:[#allocation5] sm:$0xff] }
 0x2d7   :  { %v4548_v24 = vadd.f32 %v792_v22, %v4441_v23  ;;  %3157 = vset.pattern.permute.xlu1 %v5165_v46  ;;  %v1108_v23 = vmax.f32 %v1100_v51, 0.0  ;;  %v915_v22 = vmax.f32 %v907_v4, 0.0  ;;  %v1389_v51 = vld [vmem:[#allocation11 + $0x10] sm:$0xff] }
 0x2d8   :  { %v1036_v35 = vadd.f32 %v1028_v52, %v4092_v33  ;;  %1200 = vperm.xlu1 %3157, %v3177_v19   ;;  %v795_v2 = vadd.f32 %v787_v36, %v731_v40  ;;  %v1390_v52 = vld [vmem:[#allocation11 + $0x18] sm:$0xff]  ;;  %v904_v36 = vmul.f32 %v4574_v48, %v4317_v41 }
 0x2d9   :  { %v2921_v26 = vpack.c.bf16 %v1390_v52, %v1389_v51 }
 0x2da   :  { %v1044_v15 = vmax.f32 %v1036_v35, 0.0  ;;  %v701_v3 = vpop.permute.xlu1 %700  ;;  %v859_v45 = vadd.f32 %v851_v18, %v795_v2 }
 0x2db   :  { %v713_v1 = vmul.f32 %v4095_v34, %v701_v3  ;;  %2922 = vmatprep.subr.bf16.mxu0 %v2921_v26  ;;  %v3181_v3 = vld [vmem:[#allocation2 + $0x10] sm:$0xff] }
 0x2dc   :  { %v1052_v43 = vadd.f32 %v1044_v15, %v4476_v0  ;;  %3158 = vset.pattern.permute.xlu1 %v5168_v32  ;;  %v1035_v0 = vadd.f32 %v1027_v61, %v4167_v25  ;;  %v923_v35 = vadd.f32 %v915_v22, %v859_v45  ;;  %2924 = vmatpush3.bf16.msra.mxu0 %v2921_v26 }
 0x2dd   :  { %v721_v58 = vadd.f32 %v713_v1, %v4497_v28  ;;  %1320 = vperm.xlu1 %3158, %v3178_v57   ;;  %v4594_v57 = vld [vmem:[#allocation5 + $0x10] sm:$0xff] }
 0x2de   :  { %v4565_v53 = vadd.f32 %v1108_v23, %v1052_v43  ;;  %v987_v11 = vadd.f32 %v979_v8, %v923_v35  ;;  %v3182_v43 = vld [vmem:[#allocation5 + $0x8] sm:$0xff] }
 0x2df   :  { %v729_v29 = vmax.f32 %v721_v58, 0.0  ;;  %v941_v21 = vpop.permute.xlu1 %940 }
 0x2e0   :  { %v965_v10 = vmul.f32 %v4095_v34, %v941_v21  ;;  %v1043_v34 = vmax.f32 %v1035_v0, 0.0 }
 0x2e1   :  { %v737_v12 = vadd.f32 %v729_v29, %v673_v31  ;;  %3159 = vset.pattern.permute.xlu1 %v5161_v17 }
 0x2e2   :  { %v973_v9 = vadd.f32 %v965_v10, %v4154_v63  ;;  %1140 = vperm.xlu1 %3159, %v4571_v59   ;;  %v1051_v4 = vadd.f32 %v1043_v34, %v987_v11 }
 0x2e4   :  { %v981_v19 = vmax.f32 %v973_v9, 0.0  ;;  %v1061_v42 = vpop.permute.xlu1 %1060 }
 0x2e5   :  { %v1091_v7 = vmul.f32 %v4574_v48, %v1061_v42 }
 0x2e6   :  { %v4578_v23 = vadd.f32 %v981_v19, %v4509_v56  ;;  %3160 = vset.pattern.permute.xlu1 %v5167_v39  ;;  %v912_v56 = vadd.f32 %v904_v36, %v4267_v20 }
 0x2e7   :  { %v1099_v15 = vadd.f32 %v1091_v7, %v4167_v25  ;;  %1260 = vperm.xlu1 %3160, %v3181_v3  }
 0x2e8   :  { %v920_v41 = vmax.f32 %v912_v56, 0.0 }
 0x2e9   :  { %v1107_v14 = vmax.f32 %v1099_v15, 0.0  ;;  %v825_v1 = vpop.permute.xlu1 %824 }
 0x2ea   :  { %v840_v5 = vmul.f32 %v4574_v48, %v825_v1 }
 0x2eb   :  { %v4585_v40 = vadd.f32 %v1107_v14, %v1051_v4  ;;  %3162 = vset.pattern.permute.xlu1 %v5161_v17 }
 0x2ec   :  { %v848_v61 = vadd.f32 %v840_v5, %v4267_v20  ;;  %1144 = vperm.xlu1 %3162, %v3182_v43  }
 0x2ee   :  { %v856_v54 = vmax.f32 %v848_v61, 0.0  ;;  %v945_v60 = vpop.permute.xlu1 %944 }
 0x2ef   :  { %v966_v18 = vmul.f32 %v4574_v48, %v945_v60 }
 0x2f0   :  { %v864_v16 = vadd.f32 %v856_v54, %v4548_v24  ;;  %3163 = vset.pattern.permute.xlu1 %v5163_v27  ;;  %v849_v24 = vadd.f32 %v841_v55, %v4497_v28  ;;  %v5170_v55 = vld [vmem:[#allocation39_spill] sm:$0xff] }
 0x2f1   :  { %v974_v58 = vadd.f32 %v966_v18, %v4306_v30  ;;  %1084 = vperm.xlu1 %3163, %v4594_v57  }
 0x2f2   :  { %v4599_v2 = vadd.f32 %v920_v41, %v864_v16  ;;  %v857_v52 = vmax.f32 %v849_v24, 0.0 }
 0x2f3   :  { %v982_v22 = vmax.f32 %v974_v58, 0.0  ;;  %v765_v31 = vpop.permute.xlu1 %764 }
 0x2f4   :  { %v777_v29 = vmul.f32 %v4574_v48, %v765_v31 }
 0x2f5   :  { %v990_v21 = vadd.f32 %v982_v22, %v4472_v44  ;;  %3164 = vset.pattern.permute.xlu1 %v5165_v46  ;;  %v906_v22 = vmul.f32 %v4574_v48, %v5170_v55 }
 0x2f6   :  { %v785_v0 = vadd.f32 %v777_v29, %v4497_v28  ;;  %1204 = vperm.xlu1 %3164, %v4571_v59  }
 0x2f7   :  { %v914_v29 = vadd.f32 %v906_v22, %v4366_v49  ;;  %v1189_v22 = vpop.permute.xlu0 %1188 }
 0x2f8   :  { %v793_v10 = vmax.f32 %v785_v0, 0.0  ;;  %v885_v51 = vpop.permute.xlu1 %884 }
 0x2f9   :  { %v903_v62 = vmul.f32 %v4574_v48, %v885_v51 }
 0x2fa   :  { %v801_v45 = vadd.f32 %v793_v10, %v737_v12  ;;  %3165 = vset.pattern.permute.xlu1 %v5163_v27  ;;  %v1094_v12 = vmul.f32 %v4574_v48, %v4342_v47  ;;  %v922_v10 = vmax.f32 %v914_v29, 0.0 }
 0x2fb   :  { %v911_v8 = vadd.f32 %v903_v62, %v4131_v50  ;;  %1088 = vperm.xlu1 %3165, %v4532_v37  }
 0x2fc   :  { %v4611_v44 = vadd.f32 %v857_v52, %v801_v45  ;;  %v1102_v15 = vadd.f32 %v1094_v12, %v4306_v30  ;;  %v5171_v52 = vld [vmem:[#allocation45_spill] sm:$0xff] }
 0x2fd   :  { %v919_v26 = vmax.f32 %v911_v8, 0.0  ;;  %v4613_v9 = vpop.permute.xlu1 %1124  ;;  %v1284_v45 = vmul.f32 %v4574_v48, %v5171_v52 }
 0x2fe   :  { %v1110_v14 = vmax.f32 %v1102_v15, 0.0 }
 0x2ff   :  { %v927_v35 = vadd.f32 %v919_v26, %v4492_v6  ;;  %3166 = vset.pattern.permute.xlu1 %v5165_v46 }
 0x300   :  { %1208 = vperm.xlu1 %3166, %v3182_v43  }
 0x302   :  { %v769_v19 = vpop.permute.xlu1 %768 }
 0x303   :  { %v778_v42 = vmul.f32 %v4574_v48, %v769_v19  ;;  %v1292_v19 = vadd.f32 %v1284_v45, %v4092_v33 }
 0x304   :  { %3167 = vset.pattern.permute.xlu1 %v5161_v17 }
 0x305   :  { %v786_v27 = vadd.f32 %v778_v42, %v4366_v49  ;;  %1148 = vperm.xlu1 %3167, %v4594_v57  }
 0x307   :  { %v794_v34 = vmax.f32 %v786_v27, 0.0  ;;  %v1009_v11 = vpop.permute.xlu1 %1008 }
 0x308   :  { %v1030_v7 = vmul.f32 %v4574_v48, %v1009_v11  ;;  %v1300_v11 = vmax.f32 %v1292_v19, 0.0 }
 0x309   :  { %v802_v6 = vadd.f32 %v794_v34, %v4538_v38  ;;  %1152 = vperm.xlu1 %3167, %v4532_v37  }
 0x30a   :  { %v1038_v3 = vadd.f32 %v1030_v7, %v4306_v30 }
 0x30c   :  { %v1046_v17 = vmax.f32 %v1038_v3, 0.0  ;;  %v1129_v36 = vpop.permute.xlu1 %1128 }
 0x30d   :  { %v1156_v4 = vmul.f32 %v4574_v48, %v1129_v36  ;;  %3169 = vset.pattern.permute.xlu1 %v5167_v39 }
 0x30e   :  { %v1054_v47 = vadd.f32 %v1046_v17, %v990_v21  ;;  %1272 = vperm.xlu1 %3169, %v3182_v43   ;;  %v5169_v43 = vld [vmem:[#allocation42_spill] sm:$0xff]  ;;  %v5172_v17 = vld [vmem:[#allocation40_spill] sm:$0xff] }
 0x30f   :  { %v1164_v1 = vadd.f32 %v1156_v4, %v4092_v33  ;;  %v1047_v16 = vmax.f32 %v5169_v43, 0.0  ;;  %v1096_v36 = vmul.f32 %v4574_v48, %v5172_v17 }
 0x310   :  { %v4631_v5 = vadd.f32 %v1110_v14, %v1054_v47 }
 0x311   :  { %v1172_v38 = vmax.f32 %v1164_v1, 0.0  ;;  %v949_v56 = vpop.permute.xlu1 %948  ;;  %v1104_v47 = vadd.f32 %v1096_v36, %v4267_v20 }
 0x312   :  { %v967_v61 = vmul.f32 %v4574_v48, %v949_v56  ;;  %3171 = vset.pattern.permute.xlu1 %v5168_v32 }
 0x313   :  { %v1180_v54 = vadd.f32 %v1172_v38, %v4565_v53  ;;  %1332 = vperm.xlu1 %3171, %v4571_v59  }
 0x314   :  { %v975_v60 = vadd.f32 %v967_v61, %v4131_v50  ;;  %v1112_v61 = vmax.f32 %v1104_v47, 0.0 }
 0x316   :  { %v983_v18 = vmax.f32 %v975_v60, 0.0  ;;  %v4638_v41 = vpop.permute.xlu1 %1068 }
 0x317   :  { %3172 = vset.pattern.permute.xlu1 %v5165_v46 }
 0x318   :  { %v991_v58 = vadd.f32 %v983_v18, %v927_v35  ;;  %1216 = vperm.xlu1 %3172, %v4532_v37   ;;  %v5173_v18 = vld [vmem:[#allocation43_spill] sm:$0xff] }
 0x31a   :  { %v4645_v31 = vadd.f32 %v1047_v16, %v991_v58 }
 0x31b   :  { %v833_v53 = vpop.permute.xlu1 %832 }
 0x31c   :  { %v842_v59 = vmul.f32 %v4574_v48, %v833_v53  ;;  %3173 = vset.pattern.permute.xlu1 %v5167_v39 }
 0x31d   :  { %1276 = vperm.xlu1 %3173, %v4594_v57  }
 0x31e   :  { %v850_v46 = vadd.f32 %v842_v59, %v4366_v49  ;;  %v1219_v59 = vmul.f32 %v4574_v48, %v1189_v22 }
 0x320   :  { %v858_v21 = vmax.f32 %v850_v46, 0.0  ;;  %v953_v24 = vpop.permute.xlu1 %952 }
 0x321   :  { %v968_v0 = vmul.f32 %v4574_v48, %v953_v24  ;;  %1280 = vperm.xlu1 %3173, %v4532_v37  }
 0x322   :  { %v866_v51 = vadd.f32 %v858_v21, %v802_v6 }
 0x323   :  { %v976_v62 = vadd.f32 %v968_v0, %v4267_v20 }
 0x324   :  { %v4657_v39 = vadd.f32 %v922_v10, %v866_v51  ;;  %v1227_v51 = vadd.f32 %v1219_v59, %v4167_v25 }
 0x325   :  { %v984_v57 = vmax.f32 %v976_v62, 0.0  ;;  %3174 = vset.pattern.permute.xlu1 %v5168_v32  ;;  %v1193_v8 = vpop.permute.xlu1 %1192 }
 0x326   :  { %v1220_v26 = vmul.f32 %v4574_v48, %v1193_v8  ;;  %1344 = vperm.xlu1 %3174, %v4532_v37   ;;  %v1235_v19 = vmax.f32 %v1227_v51, 0.0 }
 0x327   :  { %v992_v35 = vadd.f32 %v984_v57, %v4599_v2 }
 0x328   :  { %v1228_v42 = vadd.f32 %v1220_v26, %v4092_v33 }
 0x32a   :  { %v1236_v27 = vmax.f32 %v1228_v42, 0.0  ;;  %v893_v12 = vpop.permute.xlu1 %892 }
 0x32b   :  { %v905_v34 = vmul.f32 %v4574_v48, %v893_v12  ;;  %v1197_v12 = vpop.permute.xlu0 %1196 }
 0x32c   :  { %v1244_v7 = vadd.f32 %v1236_v27, %v1180_v54  ;;  %v1155_v54 = vmul.f32 %v4574_v48, %v4613_v9 }
 0x32d   :  { %v913_v6 = vadd.f32 %v905_v34, %v4497_v28 }
 0x32e   :  { %v4667_v32 = vadd.f32 %v1300_v11, %v1244_v7  ;;  %v1163_v58 = vadd.f32 %v1155_v54, %v4167_v25 }
 0x32f   :  { %v921_v15 = vmax.f32 %v913_v6, 0.0  ;;  %v4669_v3 = vpop.permute.xlu1 %1132  ;;  %v5174_v6 = vld [vmem:[#allocation44_spill] sm:$0xff] }
 0x330   :  { %v1171_v46 = vmax.f32 %v1163_v58, 0.0 }
 0x331   :  { %v929_v37 = vadd.f32 %v921_v15, %v4611_v44  ;;  %v1033_v44 = vmul.f32 %v4574_v48, %v5173_v18  ;;  %v1034_v15 = vmul.f32 %v4574_v48, %v5174_v6  ;;  %v1093_v18 = vmul.f32 %v4574_v48, %v4638_v41 }
 0x332   :  { %v1179_v57 = vadd.f32 %v1171_v46, %v4585_v40 }
 0x333   :  { %v1041_v53 = vadd.f32 %v1033_v44, %v4497_v28 }
 0x334   :  { %v1253_v2 = vpop.permute.xlu1 %1252  ;;  %v1243_v7 = vadd.f32 %v1235_v19, %v1179_v57 }
 0x335   :  { %v1283_v29 = vmul.f32 %v4574_v48, %v1253_v2  ;;  %v1049_v10 = vmax.f32 %v1041_v53, 0.0 }
 0x337   :  { %v1291_v62 = vadd.f32 %v1283_v29, %v4167_v25  ;;  %v1101_v29 = vadd.f32 %v1093_v18, %v4154_v63 }
 0x339   :  { %v1017_v4 = vpop.permute.xlu1 %1016  ;;  %v1299_v42 = vmax.f32 %v1291_v62, 0.0  ;;  %v1109_v62 = vmax.f32 %v1101_v29, 0.0 }
 0x33a   :  { %v1032_v14 = vmul.f32 %v4574_v48, %v1017_v4  ;;  %v1042_v4 = vadd.f32 %v1034_v15, %v4366_v49 }
 0x33b   :  { %v1307_v2 = vadd.f32 %v1299_v42, %v1243_v7 }
 0x33c   :  { %v1040_v1 = vadd.f32 %v1032_v14, %v4267_v20  ;;  %v4705_v14 = vpop.permute.xlu0 %1212 }
 0x33e   :  { %v1048_v38 = vmax.f32 %v1040_v1, 0.0  ;;  %v1137_v56 = vpop.permute.xlu1 %1136 }
 0x340   :  { %v1056_v60 = vadd.f32 %v1048_v38, %v992_v35  ;;  %v1158_v38 = vmul.f32 %v4574_v48, %v1137_v56  ;;  %v1325_v58 = vpop.permute.xlu0 %1324 }
 0x341   :  { %v1349_v6 = vmul.f32 %v4574_v48, %v1325_v58 }
 0x342   :  { %v4681_v43 = vadd.f32 %v1112_v61, %v1056_v60  ;;  %v5175_v61 = vld [vmem:[#allocation41_spill] sm:$0xff]  ;;  %v1050_v60 = vmax.f32 %v1042_v4, 0.0  ;;  %v1166_v56 = vadd.f32 %v1158_v38, %v4306_v30 }
 0x343   :  { %v957_v16 = vpop.permute.xlu1 %956  ;;  %v1029_v54 = vmul.f32 %v4574_v48, %v5175_v61 }
 0x344   :  { %v969_v55 = vmul.f32 %v4574_v48, %v957_v16  ;;  %v1329_v51 = vpop.permute.xlu0 %1328 }
 0x345   :  { %v1037_v59 = vadd.f32 %v1029_v54, %v4154_v63 }
 0x346   :  { %v977_v9 = vadd.f32 %v969_v55, %v4497_v28  ;;  %v1157_v55 = vmul.f32 %v4574_v48, %v4669_v3 }
 0x348   :  { %v985_v21 = vmax.f32 %v977_v9, 0.0  ;;  %v1077_v24 = vpop.permute.xlu1 %1076 }
 0x349   :  { %v1095_v0 = vmul.f32 %v4574_v48, %v1077_v24  ;;  %v1174_v24 = vmax.f32 %v1166_v56, 0.0 }
 0x34a   :  { %v993_v52 = vadd.f32 %v985_v21, %v929_v37  ;;  %v5176_v21 = vld [vmem:[#allocation46_spill] sm:$0xff] }
 0x34b   :  { %v1103_v45 = vadd.f32 %v1095_v0, %v4131_v50  ;;  %v1286_v3 = vmul.f32 %v4574_v48, %v5176_v21  ;;  %v1045_v0 = vmax.f32 %v1037_v59, 0.0 }
 0x34c   :  { %v4694_v8 = vadd.f32 %v1049_v10, %v993_v52  ;;  %v1221_v10 = vmul.f32 %v4574_v48, %v1197_v12 }
 0x34d   :  { %v1111_v26 = vmax.f32 %v1103_v45, 0.0  ;;  %v1317_v35 = vpop.permute.xlu1 %1316 }
 0x34e   :  { %v1347_v27 = vmul.f32 %v4574_v48, %v1317_v35  ;;  %v1053_v35 = vadd.f32 %v1045_v0, %v4578_v23  ;;  %v1229_v7 = vadd.f32 %v1221_v10, %v4154_v63 }
 0x34f   :  { %v4698_v34 = vadd.f32 %v1111_v26, %v4645_v31 }
 0x350   :  { %v1355_v11 = vadd.f32 %v1347_v27, %v4167_v25  ;;  %v1350_v27 = vmul.f32 %v4574_v48, %v1329_v51  ;;  %v1117_v15 = vadd.f32 %v1109_v62, %v1053_v35  ;;  %v1337_v62 = vpop.permute.xlu0 %1336 }
 0x352   :  { %v1363_v37 = vmax.f32 %v1355_v11, 0.0  ;;  %v961_v40 = vpop.permute.xlu1 %960  ;;  %v1182_v11 = vadd.f32 %v1174_v24, %v4631_v5  ;;  %v1358_v4 = vadd.f32 %v1350_v27, %v4306_v30 }
 0x353   :  { %v970_v17 = vmul.f32 %v4574_v48, %v961_v40 }
 0x354   :  { %v1371_v36 = vadd.f32 %v1363_v37, %v1307_v2 }
 0x355   :  { %v978_v47 = vadd.f32 %v970_v17, %v4366_v49 }
 0x356   :  { %v1379_v31 = vmul.f32 0.0625, %v1371_v36 }
 0x357   :  { %v986_v1 = vmax.f32 %v978_v47, 0.0  ;;  %v1201_v25 = vpop.permute.xlu1 %1200  ;;  %v1237_v47 = vmax.f32 %v1229_v7, 0.0 }
 0x358   :  { %2720 = vmatprep.mubr.msk.f32.mxu0 %vm1398_vm1, %v1379_v31  ;;  %v1222_v16 = vmul.f32 %v4574_v48, %v1201_v25  ;;  %v1357_v31 = vadd.f32 %v1349_v6, %v4154_v63 }
 0x359   :  { %v994_v44 = vadd.f32 %v986_v1, %v4657_v39  ;;  %v1165_v39 = vadd.f32 %v1157_v55, %v4154_v63 }
 0x35a   :  { %v1230_v41 = vadd.f32 %v1222_v16, %v4306_v30  ;;  %v1365_v18 = vmax.f32 %v1357_v31, 0.0 }
 0x35b   :  { %v4718_v22 = vadd.f32 %v1050_v60, %v994_v44  ;;  %v1173_v19 = vmax.f32 %v1165_v39, 0.0  ;;  %v1366_v60 = vmax.f32 %v1358_v4, 0.0 }
 0x35c   :  { %v1321_v53 = vpop.permute.xlu1 %1320  ;;  %v1238_v57 = vmax.f32 %v1230_v41, 0.0 }
 0x35d   :  { %v1348_v9 = vmul.f32 %v4574_v48, %v1321_v53  ;;  %v1181_v17 = vadd.f32 %v1173_v19, %v1117_v15 }
 0x35e   :  { %v1246_v40 = vadd.f32 %v1238_v57, %v1182_v11  ;;  %v1352_v57 = vmul.f32 %v4574_v48, %v1337_v62 }
 0x35f   :  { %v1356_v46 = vadd.f32 %v1348_v9, %v4092_v33  ;;  %v1294_v33 = vadd.f32 %v1286_v3, %v4306_v30  ;;  %v1245_v38 = vadd.f32 %v1237_v47, %v1181_v17  ;;  %v1303_v9 = vmax.f32 %v4421_v13, 0.0 }
 0x360   :  { %v1360_v27 = vadd.f32 %v1352_v57, %v4267_v20 }
 0x361   :  { %v1364_v52 = vmax.f32 %v1356_v46, 0.0  ;;  %v1141_v45 = vpop.permute.xlu1 %1140  ;;  %v1302_v36 = vmax.f32 %v1294_v33, 0.0 }
 0x362   :  { %v1159_v26 = vmul.f32 %v4574_v48, %v1141_v45 }
 0x363   :  { %v1372_v42 = vadd.f32 %v1364_v52, %v4667_v32  ;;  %v1310_v25 = vadd.f32 %v1302_v36, %v1246_v40 }
 0x364   :  { %v1167_v12 = vadd.f32 %v1159_v26, %v4131_v50 }
 0x365   :  { %v1380_v37 = vmul.f32 0.0625, %v1372_v42  ;;  %v1374_v16 = vadd.f32 %v1366_v60, %v1310_v25 }
 0x366   :  { %v1175_v2 = vmax.f32 %v1167_v12, 0.0  ;;  %v1261_v23 = vpop.permute.xlu1 %1260 }
 0x367   :  { %v1285_v32 = vmul.f32 %v4574_v48, %v1261_v23  ;;  %2721 = vmatmul.mubr.msk.f32.vlgmr.msra.gmra.mrb[0].mxu0 %vm1398_vm1, %v1380_v37  ;;  %v1382_v53 = vmul.f32 0.0625, %v1374_v16  ;;  %v1368_v23 = vmax.f32 %v1360_v27, 0.0 }
 0x368   :  { %v1183_v5 = vadd.f32 %v1175_v2, %v4698_v34 }
 0x369   :  { %v1293_v1 = vadd.f32 %v1285_v32, %v4154_v63 }
 0x36b   :  { %v1301_v61 = vmax.f32 %v1293_v1, 0.0  ;;  %v1145_v54 = vpop.permute.xlu1 %1144 }
 0x36c   :  { %v1160_v21 = vmul.f32 %v4574_v48, %v1145_v54 }
 0x36d   :  { %v1309_v44 = vadd.f32 %v1301_v61, %v1245_v38 }
 0x36e   :  { %v1168_v0 = vadd.f32 %v1160_v21, %v4267_v20 }
 0x36f   :  { %v1373_v58 = vadd.f32 %v1365_v18, %v1309_v44 }
 0x370   :  { %v1085_v55 = vpop.permute.xlu1 %1084  ;;  %v1176_v52 = vmax.f32 %v1168_v0, 0.0 }
 0x371   :  { %v1381_v56 = vmul.f32 0.0625, %v1373_v58  ;;  %v1097_v35 = vmul.f32 %v4574_v48, %v1085_v55 }
 0x372   :  { %v1184_v19 = vadd.f32 %v1176_v52, %v4681_v43  ;;  %v1225_v43 = vmul.f32 %v4574_v48, %v4705_v14 }
 0x373   :  { %2723 = vmatprep.mubr.msk.f32.mxu0 %vm1398_vm1, %v1381_v56  ;;  %v1105_v6 = vadd.f32 %v1097_v35, %v4497_v28 }
 0x374   :  { %2724 = vmatmul.mubr.msk.f32.gmra.mrb[2].mxu0 %vm1398_vm1, %v1382_v53  ;;  %v1233_v25 = vadd.f32 %v1225_v43, %v4497_v28 }
 0x375   :  { %v1205_v30 = vpop.permute.xlu1 %1204  ;;  %v1113_v17 = vmax.f32 %v1105_v6, 0.0 }
 0x376   :  { %v1223_v34 = vmul.f32 %v4574_v48, %v1205_v30  ;;  %v1241_v55 = vmax.f32 %v1233_v25, 0.0 }
 0x378   :  { %v1231_v63 = vadd.f32 %v1223_v34, %v4131_v50 }
 0x37a   :  { %v1239_v59 = vmax.f32 %v1231_v63, 0.0  ;;  %v1089_v29 = vpop.permute.xlu1 %1088 }
 0x37b   :  { %v1098_v4 = vmul.f32 %v4574_v48, %v1089_v29 }
 0x37c   :  { %v1247_v41 = vadd.f32 %v1239_v59, %v1183_v5 }
 0x37d   :  { %v1106_v14 = vadd.f32 %v1098_v4, %v4366_v49 }
 0x37e   :  { %v1311_v39 = vadd.f32 %v1303_v9, %v1247_v41 }
 0x37f   :  { %v1209_v46 = vpop.permute.xlu1 %1208  ;;  %v1114_v53 = vmax.f32 %v1106_v14, 0.0 }
 0x380   :  { %v1224_v24 = vmul.f32 %v4574_v48, %v1209_v46 }
 0x381   :  { %v1122_v21 = vadd.f32 %v1114_v53, %v4718_v22  ;;  %v1593_v22 = vld [vmem:[#allocation16] sm:$0xff] }
 0x382   :  { %v1232_v51 = vadd.f32 %v1224_v24, %v4267_v20 }
 0x384   :  { %v1149_v3 = vpop.permute.xlu1 %1148  ;;  %v1240_v26 = vmax.f32 %v1232_v51, 0.0 }
 0x385   :  { %v1161_v33 = vmul.f32 %v4574_v48, %v1149_v3 }
 0x386   :  { %v1248_v11 = vadd.f32 %v1240_v26, %v1184_v19  ;;  %v1594_v19 = vld [vmem:[#allocation16 + $0x8] sm:$0xff] }
 0x387   :  { %v1169_v40 = vadd.f32 %v1161_v33, %v4497_v28  ;;  %v3612_v33 = vmov 0.0|0.0  }
 0x388   :  { %v1153_v10 = vpop.permute.xlu1 %1152  ;;  %2925 = vmatprep.subr.bf16.mxu1 %v3612_v33  ;;  %2939 = vmatprep.subr.bf16.mxu0 %v3612_v33 }
 0x389   :  { %v1177_v47 = vmax.f32 %v1169_v40, 0.0  ;;  %v1162_v1 = vmul.f32 %v4574_v48, %v1153_v10 }
 0x38b   :  { %v1170_v58 = vadd.f32 %v1162_v1, %v4366_v49 }
 0x38d   :  { %v1273_v45 = vpop.permute.xlu1 %1272  ;;  %v1178_v9 = vmax.f32 %v1170_v58, 0.0 }
 0x38e   :  { %v1288_v13 = vmul.f32 %v4574_v48, %v1273_v45 }
 0x38f   :  { %v1186_v10 = vadd.f32 %v1178_v9, %v1122_v21 }
 0x390   :  { %v1296_v42 = vadd.f32 %v1288_v13, %v4267_v20  ;;  %v1341_v20 = vpop.permute.xlu0 %1340 }
 0x391   :  { %v1353_v38 = vmul.f32 %v4574_v48, %v1341_v20 }
 0x392   :  { %v1304_v12 = vmax.f32 %v1296_v42, 0.0  ;;  %v1333_v7 = vpop.permute.xlu1 %1332  ;;  %v2926_v42 = vpack.c.bf16 %v1594_v19, %v1593_v22 }
 0x393   :  { %v1351_v15 = vmul.f32 %v4574_v48, %v1333_v7  ;;  %v1361_v56 = vadd.f32 %v1353_v38, %v4497_v28  ;;  %v3614_v7 = vmov 0.0  }
 0x394   :  { %v1312_v37 = vadd.f32 %v1304_v12, %v1248_v11  ;;  %2927 = vmatpush3.bf16.msra.mxu1 %v2926_v42  ;;  %v1698_v11 = vld [vmem:[#allocation14] sm:$0xff]  ;;  %v1699_v12 = vld [vmem:[#allocation14 + $0x8] sm:$0xff]  ;;  %2740 = vmatprep.mubr.msk.f32.mxu1 %vm3613_vm2, %v3614_v7 }
 0x395   :  { %v1359_v2 = vadd.f32 %v1351_v15, %v4131_v50  ;;  %v1121_v50 = vadd.f32 %v1113_v17, %v4694_v8  ;;  %v1369_v41 = vmax.f32 %v1361_v56, 0.0  ;;  %2928 = vmatprep.subr.bf16.mxu1 %v3612_v33  ;;  %v4793_v6 = vpack.c.bf16 %v1699_v12, %v1698_v11  ;;  %v4798_v15 = vld [vmem:[#allocation13] ss:$0 sm:$0xff] }
 0x396   :  { %v1376_v5 = vadd.f32 %v1368_v23, %v1312_v37 }
 0x397   :  { %v1367_v32 = vmax.f32 %v1359_v2, 0.0  ;;  %v1217_v36 = vpop.permute.xlu1 %1216  ;;  %v1185_v44 = vadd.f32 %v1177_v47, %v1121_v50 }
 0x398   :  { %v1226_v54 = vmul.f32 %v4574_v48, %v1217_v36  ;;  %v1384_v18 = vmul.f32 0.0625, %v1376_v5 }
 0x399   :  { %v1375_v31 = vadd.f32 %v1367_v32, %v1311_v39  ;;  %v1249_v63 = vadd.f32 %v1241_v55, %v1185_v44 }
 0x39a   :  { %v1234_v30 = vadd.f32 %v1226_v54, %v4366_v49 }
 0x39b   :  { %v1383_v61 = vmul.f32 0.0625, %v1375_v31 }
 0x39c   :  { %v1277_v60 = vpop.permute.xlu1 %1276  ;;  %v1242_v3 = vmax.f32 %v1234_v30, 0.0 }
 0x39d   :  { %v1289_v16 = vmul.f32 %v4574_v48, %v1277_v60  ;;  %2726 = vmatprep.mubr.msk.f32.mxu0 %vm1398_vm1, %v1383_v61 }
 0x39e   :  { %2727 = vmatmul.mubr.msk.f32.gmra.mrb[4].mxu0 %vm1398_vm1, %v1384_v18  ;;  %v1250_v52 = vadd.f32 %v1242_v3, %v1186_v10 }
 0x39f   :  { %v1297_v8 = vadd.f32 %v1289_v16, %v4497_v28 }
 0x3a0   :  { %v1281_v34 = vpop.permute.xlu1 %1280 }
 0x3a1   :  { %v1305_v59 = vmax.f32 %v1297_v8, 0.0  ;;  %v1290_v29 = vmul.f32 %v4574_v48, %v1281_v34 }
 0x3a3   :  { %v1313_v39 = vadd.f32 %v1305_v59, %v1249_v63  ;;  %v1298_v46 = vadd.f32 %v1290_v29, %v4366_v49 }
 0x3a5   :  { %v1377_v24 = vadd.f32 %v1369_v41, %v1313_v39  ;;  %v1345_v0 = vpop.permute.xlu1 %1344  ;;  %v1306_v28 = vmax.f32 %v1298_v46, 0.0 }
 0x3a6   :  { %v1354_v51 = vmul.f32 %v4574_v48, %v1345_v0  ;;  %v1596_v48 = vld [vmem:[#allocation16 + $0x18] sm:$0xff] }
 0x3a7   :  { %v1385_v62 = vmul.f32 0.0625, %v1377_v24  ;;  %v1314_v57 = vadd.f32 %v1306_v28, %v1250_v52 }
 0x3a8   :  { %v1362_v45 = vadd.f32 %v1354_v51, %v4366_v49  ;;  %v1595_v49 = vld [vmem:[#allocation16 + $0x10] sm:$0xff] }
 0x3a9   :  { %2729 = vmatprep.mubr.msk.f32.mxu0 %vm1398_vm1, %v1385_v62  ;;  %v2929_v27 = vpack.c.bf16 %v1596_v48, %v1595_v49 }
 0x3aa   :  { %v1370_v26 = vmax.f32 %v1362_v45, 0.0 }
 0x3ab   :  { %2930 = vmatpush3.bf16.msra.mxu1 %v2929_v27 }
 0x3ac   :  { %v1378_v13 = vadd.f32 %v1370_v26, %v1314_v57  ;;  %2932 = vmatprep.subr.bf16.mxu1 %v4793_v6 }
 0x3ae   :  { %v1386_v35 = vmul.f32 0.0625, %v1378_v13 }
 0x3b0   :  { %2730 = vmatmul.mubr.msk.f32.gmra.mrb[6].mxu0 %vm1398_vm1, %v1386_v35 }
 0x3b1   :  { %2779 = vmatprep.mubr.msk.f32.mxu0 %vm3613_vm2, %v3614_v7 }
 0x43a   :  { %v2722_v37 = vpop.f32.mrb[0].mxu0 }
 0x43b   :  { %v4801_v40 = vadd.f32 %v2722_v37, %v4798_v15  ;;  %v1489_v2 = vpop.f32.mrb[1].mxu0 }
 0x43c   :  { %v4804_v23 = vadd.f32 %v4798_v15, %v1489_v2 }
 0x43d   :  { %v1535_v43 = vsel %vm1398_vm1, %v4801_v40, 0.0 }
 0x43e   :  { %v1536_v17 = vrot.slane %v1535_v43, 4  ;;  %v1528_v32 = vsel %vm1398_vm1, %v4804_v23, 0.0 }
 0x43f   :  { %v1529_v36 = vrot.slane %v1528_v32, 4 }
 0x440   :  { %v1537_v20 = vadd.f32 %v1536_v17, %v1535_v43 }
 0x441   :  { %v1530_v4 = vadd.f32 %v1529_v36, %v1528_v32 }
 0x442   :  { %v1538_v5 = vrot.slane %v1537_v20, 2 }
 0x443   :  { %v1531_v47 = vrot.slane %v1530_v4, 2 }
 0x444   :  { %v1539_v31 = vadd.f32 %v1538_v5, %v1537_v20 }
 0x445   :  { %v1532_v1 = vadd.f32 %v1531_v47, %v1530_v4 }
 0x446   :  { %v1540_v25 = vrot.slane %v1539_v31, 1 }
 0x447   :  { %v1533_v38 = vrot.slane %v1532_v1, 1  ;;  %v2725_v50 = vpop.f32.mrb[2].mxu0 }
 0x448   :  { %v1541_v61 = vadd.f32 %v1540_v25, %v1539_v31  ;;  %v4811_v14 = vadd.f32 %v2725_v50, %v4798_v15  ;;  %v1499_v54 = vpop.f32.mrb[3].mxu0 }
 0x449   :  { %v1534_v60 = vadd.f32 %v1533_v38, %v1532_v1  ;;  %v4814_v18 = vadd.f32 %v4798_v15, %v1499_v54 }
 0x44a   :  { %v1586_v44 = vmul.f32 0.125, %v1541_v61  ;;  %v1549_v16 = vsel %vm1398_vm1, %v4811_v14, 0.0 }
 0x44b   :  { %v1585_v58 = vmul.f32 0.125, %v1534_v60  ;;  %v1550_v55 = vrot.slane %v1549_v16, 4  ;;  %v1542_v56 = vsel %vm1398_vm1, %v4814_v18, 0.0 }
 0x44c   :  { %v1543_v8 = vrot.slane %v1542_v56, 4 }
 0x44d   :  { %v1613_v53 = vsel %vm1612_vm3, %v1586_v44, %v1585_v58  ;;  %v1551_v30 = vadd.f32 %v1550_v55, %v1549_v16 }
 0x44e   :  { %v1544_v34 = vadd.f32 %v1543_v8, %v1542_v56  ;;  %v1701_v8 = vld [vmem:[#allocation14 + $0x18] sm:$0xff] }
 0x44f   :  { %v1552_v63 = vrot.slane %v1551_v30, 2 }
 0x450   :  { %v1545_v59 = vrot.slane %v1544_v34, 2 }
 0x451   :  { %v1553_v29 = vadd.f32 %v1552_v63, %v1551_v30 }
 0x452   :  { %v1546_v9 = vadd.f32 %v1545_v59, %v1544_v34 }
 0x453   :  { %v1554_v41 = vrot.slane %v1553_v29, 1 }
 0x454   :  { %v1547_v39 = vrot.slane %v1546_v9, 1 }
 0x455   :  { %v1555_v46 = vadd.f32 %v1554_v41, %v1553_v29  ;;  %v2005_v29 = vld [vmem:[#allocation19 + $0x18] sm:$0xff]  ;;  %v2007_v41 = vld [vmem:[#allocation19 + $0x28] sm:$0xff] }
 0x456   :  { %v1548_v21 = vadd.f32 %v1547_v39, %v1546_v9  ;;  %v2006_v9 = vld [vmem:[#allocation19 + $0x20] sm:$0xff] }
 0x457   :  { %v1588_v24 = vmul.f32 0.125, %v1555_v46  ;;  %v2946_v39 = vpack.c.bf16 %v2007_v41, %v2006_v9  ;;  %v2008_v46 = vld [vmem:[#allocation19 + $0x30] sm:$0xff] }
 0x458   :  { %v1587_v3 = vmul.f32 0.125, %v1548_v21  ;;  %v2009_v21 = vld [vmem:[#allocation19 + $0x38] sm:$0xff] }
 0x45a   :  { %v1615_v0 = vsel %vm1614_vm4, %v1587_v3, %v1613_v53  ;;  %v2949_v3 = vpack.c.bf16 %v2009_v21, %v2008_v46 }
 0x45b   :  { %v1617_v10 = vsel %vm1616_vm5, %v1588_v24, %v1615_v0  ;;  %v2120_v24 = vld [vmem:[%s5103_s14] sm:$0xff]  ;;  %v2121_v0 = vld [vmem:[%s5103_s14 + $0x8] sm:$0xff] }
 0x471   :  { %v2728_v28 = vpop.f32.mrb[4].mxu0 }
 0x472   :  { %v1515_v51 = vadd.f32 %v2728_v28, %v4798_v15  ;;  %v1509_v62 = vpop.f32.mrb[5].mxu0  ;;  %v2122_v28 = vld [vmem:[%s5103_s14 + $0x10] sm:$0xff] }
 0x473   :  { %v1510_v52 = vadd.f32 %v4798_v15, %v1509_v62 }
 0x474   :  { %v1563_v45 = vsel %vm1398_vm1, %v1515_v51, 0.0 }
 0x475   :  { %v1564_v57 = vrot.slane %v1563_v45, 4  ;;  %v1556_v26 = vsel %vm1398_vm1, %v1510_v52, 0.0 }
 0x476   :  { %v1557_v13 = vrot.slane %v1556_v26, 4 }
 0x477   :  { %v1565_v35 = vadd.f32 %v1564_v57, %v1563_v45  ;;  %v2125_v45 = vld [vmem:[%s5103_s14 + $0x28] sm:$0xff] }
 0x478   :  { %v1558_v22 = vadd.f32 %v1557_v13, %v1556_v26  ;;  %v2126_v26 = vld [vmem:[%s5103_s14 + $0x30] sm:$0xff]  ;;  %v2127_v13 = vld [vmem:[%s5103_s14 + $0x38] sm:$0xff] }
 0x479   :  { %v1566_v19 = vrot.slane %v1565_v35, 2 }
 0x47a   :  { %v1559_v42 = vrot.slane %v1558_v22, 2 }
 0x47b   :  { %v1567_v49 = vadd.f32 %v1566_v19, %v1565_v35  ;;  %v2961_v35 = vpack.c.bf16 %v2127_v13, %v2126_v26  ;;  %v2129_v19 = vld [vmem:[%s5103_s14 + $0x48] sm:$0xff] }
 0x47c   :  { %v1560_v48 = vadd.f32 %v1559_v42, %v1558_v22  ;;  %v2128_v22 = vld [vmem:[%s5103_s14 + $0x40] sm:$0xff] }
 0x47d   :  { %v1568_v27 = vrot.slane %v1567_v49, 1  ;;  %v2964_v42 = vpack.c.bf16 %v2129_v19, %v2128_v22 }
 0x47e   :  { %v1561_v11 = vrot.slane %v1560_v48, 1 }
 0x47f   :  { %v1569_v12 = vadd.f32 %v1568_v27, %v1567_v49  ;;  %v2130_v49 = vld [vmem:[%s5103_s14 + $0x50] sm:$0xff] }
 0x480   :  { %v1562_v37 = vadd.f32 %v1561_v11, %v1560_v48  ;;  %v2131_v48 = vld [vmem:[%s5103_s14 + $0x58] sm:$0xff]  ;;  %v2132_v11 = vld [vmem:[%s5103_s14 + $0x60] sm:$0xff] }
 0x481   :  { %v1590_v43 = vmul.f32 0.125, %v1569_v12  ;;  %v2967_v27 = vpack.c.bf16 %v2131_v48, %v2130_v49  ;;  %v2133_v12 = vld [vmem:[%s5103_s14 + $0x68] sm:$0xff] }
 0x482   :  { %v1589_v2 = vmul.f32 0.125, %v1562_v37  ;;  %v2970_v37 = vpack.c.bf16 %v2133_v12, %v2132_v11 }
 0x483   :  { %v2731_v17 = vpop.f32.mrb[6].mxu0 }
 0x484   :  { %v1525_v32 = vadd.f32 %v2731_v17, %v4798_v15  ;;  %v1519_v36 = vpop.f32.mrb[7].mxu0  ;;  %v1619_v20 = vsel %vm1618_vm6, %v1589_v2, %v1617_v10  ;;  %v2952_v10 = vpack.c.bf16 %v2121_v0, %v2120_v24  ;;  %v3615_v2 = vmov 1966171168  }
 0x485   :  { %v1520_v4 = vadd.f32 %v4798_v15, %v1519_v36  ;;  %v1621_v5 = vsel %vm1620_vm7, %v1590_v43, %v1619_v20  ;;  %v1700_v15 = vld [vmem:[#allocation14 + $0x10] sm:$0xff]  ;;  %v1834_v43 = vunpack.c.l.s4 %v3615_v2  ;;  %v1836_v17 = vlaneseq  ;;  %v2591_v20 = vld [vmem:[#allocation17] ss:$0 sm:$0xff] }
 0x486   :  { %v1577_v47 = vsel %vm1398_vm1, %v1525_v32, 0.0  ;;  %v2935_v63 = vpack.c.bf16 %v1701_v8, %v1700_v15 }
 0x487   :  { %v1578_v31 = vrot.slane %v1577_v47, 4  ;;  %v1570_v1 = vsel %vm1398_vm1, %v1520_v4, 0.0  ;;  %v1837_v36 = vshrl.u32 %v1836_v17, 7 }
 0x488   :  { %v1571_v25 = vrot.slane %v1570_v1, 4 }
 0x489   :  { %v1579_v38 = vadd.f32 %v1578_v31, %v1577_v47 }
 0x48a   :  { %v1572_v50 = vadd.f32 %v1571_v25, %v1570_v1 }
 0x48b   :  { %v1580_v61 = vrot.slane %v1579_v38, 2 }
 0x48c   :  { %v1573_v54 = vrot.slane %v1572_v50, 2 }
 0x48d   :  { %v1581_v60 = vadd.f32 %v1580_v61, %v1579_v38  ;;  %v1883_v38 = vsub.s32 0, %v1837_v36 }
 0x48e   :  { %v1574_v44 = vadd.f32 %v1573_v54, %v1572_v50 }
 0x48f   :  { %v1582_v16 = vrot.slane %v1581_v60, 1 }
 0x490   :  { %v1575_v58 = vrot.slane %v1574_v44, 1 }
 0x491   :  { %v1583_v55 = vadd.f32 %v1582_v16, %v1581_v60 }
 0x492   :  { %v1576_v56 = vadd.f32 %v1575_v58, %v1574_v44 }
 0x493   :  { %v1592_v30 = vmul.f32 0.125, %v1583_v55 }
 0x494   :  { %v1591_v53 = vmul.f32 0.125, %v1576_v56 }
 0x496   :  { %v1623_v34 = vsel %vm1622_vm8, %v1591_v53, %v1621_v5 }
 0x497   :  { %v1625_v59 = vsel %vm1624_vm9, %v1592_v30, %v1623_v34 }
 0x498   :  { %2741 = vmatmul.mubr.msk.f32.vlgmr.msra.gmra.mrb[0].mxu1 %vm1398_vm1, %v1625_v59 }
 0x499   :  { %2934 = vmatpush3.bf16.msra.mxu1 %v4793_v6  ;;  %2751 = vmatprep.mubr.msk.f32.mxu1 %vm1398_vm1, %v4804_v23  ;;  %v2002_v6 = vld [vmem:[#allocation19] sm:$0xff]  ;;  %v2003_v23 = vld [vmem:[#allocation19 + $0x8] sm:$0xff] }
 0x49a   :  { %2936 = vmatprep.subr.bf16.mxu1 %v2935_v63 }
 0x49d   :  { %2938 = vmatpush3.bf16.msra.mxu1 %v2935_v63 }
 0x49e   :  { %2951 = vmatprep.subr.bf16.mxu1 %v3612_v33 }
 0x4a0   :  { %2752 = vmatmul.mubr.msk.f32.vlgmr.msra.gmra.mrb[2].mxu1 %vm1398_vm1, %v4801_v40  ;;  %v2940_v40 = vpack.c.bf16 %v2003_v23, %v2002_v6 }
 0x4a1   :  { %2754 = vmatprep.mubr.msk.f32.mxu1 %vm1398_vm1, %v4814_v18  ;;  %v2004_v18 = vld [vmem:[#allocation19 + $0x10] sm:$0xff]  ;;  %2953 = vmatpush3.bf16.msra.mxu1 %v2952_v10 }
 0x4a2   :  { %2941 = vmatpush3.bf16.msra.mxu0 %v2940_v40  ;;  %2954 = vmatprep.subr.bf16.mxu1 %v3612_v33 }
 0x4a3   :  { %2942 = vmatprep.subr.bf16.mxu0 %v3612_v33 }
 0x4a4   :  { %2755 = vmatmul.mubr.msk.f32.gmra.mrb[4].mxu1 %vm1398_vm1, %v4811_v14  ;;  %v2943_v14 = vpack.c.bf16 %v2005_v29, %v2004_v18 }
 0x4a5   :  { %2757 = vmatprep.mubr.msk.f32.mxu1 %vm1398_vm1, %v1510_v52  ;;  %v2124_v52 = vld [vmem:[%s5103_s14 + $0x20] sm:$0xff] }
 0x4a6   :  { %2944 = vmatpush3.bf16.msra.mxu0 %v2943_v14  ;;  %v2958_v57 = vpack.c.bf16 %v2125_v45, %v2124_v52 }
 0x4a7   :  { %2945 = vmatprep.subr.bf16.mxu0 %v3612_v33 }
 0x4a8   :  { %2758 = vmatmul.mubr.msk.f32.gmra.mrb[6].mxu1 %vm1398_vm1, %v1515_v51  ;;  %v2123_v51 = vld [vmem:[%s5103_s14 + $0x18] sm:$0xff] }
 0x4a9   :  { %2760 = vmatprep.mubr.msk.f32.mxu1 %vm1398_vm1, %v1520_v4  ;;  %v2955_v62 = vpack.c.bf16 %v2123_v51, %v2122_v28 }
 0x4aa   :  { %2947 = vmatpush3.bf16.msra.mxu0 %v2946_v39 }
 0x4ab   :  { %2948 = vmatprep.subr.bf16.mxu0 %v3612_v33  ;;  %2956 = vmatpush3.bf16.msra.mxu1 %v2955_v62 }
 0x4ac   :  { %2761 = vmatmul.mubr.msk.f32.gmra.mrb[8].mxu1 %vm1398_vm1, %v1525_v32  ;;  %2957 = vmatprep.subr.bf16.mxu1 %v3612_v33  ;;  %v1835_v32 = vunpack.c.0.s8 %v1834_v43 }
 0x4ad   :  { %2814 = vmatprep.mubr.msk.f32.mxu1 %vm3613_vm2, %v3614_v7 }
 0x4ae   :  { %2950 = vmatpush3.bf16.msra.mxu0 %v2949_v3  ;;  %v1838_v4 = vsub.s32 %v1835_v32, %v1837_v36 }
 0x4af   :  { %2975 = vmatprep.subr.bf16.mxu0 %v3612_v33  ;;  %2959 = vmatpush3.bf16.msra.mxu1 %v2958_v57 }
 0x4b0   :  { %2960 = vmatprep.subr.bf16.mxu1 %v3612_v33 }
 0x4b3   :  { %2962 = vmatpush3.bf16.msra.mxu1 %v2961_v35 }
 0x4b4   :  { %2963 = vmatprep.subr.bf16.mxu1 %v3612_v33 }
 0x4b7   :  { %2965 = vmatpush3.bf16.msra.mxu1 %v2964_v42 }
 0x4b8   :  { %2966 = vmatprep.subr.bf16.mxu1 %v3612_v33 }
 0x4bb   :  { %2968 = vmatpush3.bf16.msra.mxu1 %v2967_v27 }
 0x4bc   :  { %2969 = vmatprep.subr.bf16.mxu1 %v3612_v33 }
 0x4bf   :  { %2971 = vmatpush3.bf16.msra.mxu1 %v2970_v37 }
 0x4c0   :  { %2972 = vmatprep.subr.bf16.mxu1 %v3612_v33 }
 0x56b   :  { %v1694_v5 = vpop.f32.mrb[0].mxu1 }
 0x56c   :  { %v1695_v47 = vadd.f32 %v2591_v20, %v1694_v5  ;;  %v2742_v31 = vpop.f32.mrb[1].mxu1 }
 0x56e   :  { %v1832_v1 = vcombine.high %v1695_v47, %v1695_v47  ;;  %v1839_v25 = vrot.slane %v1695_v47, %v1838_v4 }
 0x570   :  { %v1846_v50 = vrot.slane %v1832_v1, %v1838_v4  ;;  %v1847_v61 = vcombine.high %v1839_v25, %v1839_v25  ;;  %v1855_v54 = vrot.slane %v1839_v25, %v1838_v4 }
 0x572   :  { %v1869_v60 = vrot.slane %v1847_v61, %v1838_v4  ;;  %v1884_v44 = vrot.slane %v1855_v54, %v1883_v38  ;;  %v1848_v16 = vcombine.high %v1846_v50, %v1846_v50  ;;  %v1877_v55 = vcombine.high %v1855_v54, %v1855_v54 }
 0x573   :  { %v2753_v58 = vpop.f32.mrb[2].mxu1  ;;  %v1862_v40 = vrot.slane %v1846_v50, %v1838_v4 }
 0x574   :  { %v1888_v56 = vrot.slane %v1869_v60, %v1883_v38  ;;  %v1792_v15 = vpop.f32.mrb[3].mxu1  ;;  %v1879_v8 = vcombine.high %v1869_v60, %v1869_v60  ;;  %v1876_v30 = vrot.slane %v1848_v16, %v1838_v4  ;;  %v1892_v23 = vrot.slane %v1877_v55, %v1883_v38 }
 0x575   :  { %v1921_v53 = vadd.f32 %v1884_v44, %v1792_v15  ;;  %v1900_v51 = vrot.slane %v1862_v40, %v1883_v38  ;;  %v1878_v62 = vcombine.high %v1862_v40, %v1862_v40 }
 0x576   :  { %v1922_v34 = vadd.f32 %v2753_v58, %v1888_v56  ;;  %v1896_v63 = vrot.slane %v1879_v8, %v1883_v38  ;;  %v1904_v39 = vrot.slane %v1876_v30, %v1883_v38  ;;  %v1880_v24 = vcombine.high %v1876_v30, %v1876_v30 }
 0x577   :  { %v1929_v59 = vmax.f32 %v1921_v53, 0.0  ;;  %v2756_v6 = vpop.f32.mrb[4].mxu1  ;;  %v1908_v43 = vrot.slane %v1878_v62, %v1883_v38 }
 0x578   :  { %v1930_v18 = vmax.f32 %v1922_v34, 0.0  ;;  %v1924_v29 = vadd.f32 %v2756_v6, %v1896_v63  ;;  %v1802_v14 = vpop.f32.mrb[5].mxu1  ;;  %v1912_v27 = vrot.slane %v1880_v24, %v1883_v38 }
 0x579   :  { %v1938_v9 = vsel %vm1937_vm10, %v1929_v59, 0.0  ;;  %v1923_v41 = vadd.f32 %v1892_v23, %v1802_v14 }
 0x57a   :  { %v1945_v46 = vsel %vm1937_vm10, %v1930_v18, 0.0  ;;  %v1939_v21 = vrot.slane %v1938_v9, 4  ;;  %v1932_v3 = vmax.f32 %v1924_v29, 0.0 }
 0x57b   :  { %v1946_v0 = vrot.slane %v1945_v46, 4  ;;  %v1931_v10 = vmax.f32 %v1923_v41, 0.0  ;;  %v2759_v28 = vpop.f32.mrb[6].mxu1 }
 0x57c   :  { %v1940_v52 = vadd.f32 %v1939_v21, %v1938_v9  ;;  %v1959_v45 = vsel %vm1937_vm10, %v1932_v3, 0.0  ;;  %v1926_v57 = vadd.f32 %v2759_v28, %v1904_v39  ;;  %v1812_v26 = vpop.f32.mrb[7].mxu1 }
 0x57d   :  { %v1947_v13 = vadd.f32 %v1946_v0, %v1945_v46  ;;  %v1960_v35 = vrot.slane %v1959_v45, 4  ;;  %v1952_v22 = vsel %vm1937_vm10, %v1931_v10, 0.0  ;;  %v1925_v19 = vadd.f32 %v1900_v51, %v1812_v26 }
 0x57e   :  { %v1941_v42 = vrot.slane %v1940_v52, 2  ;;  %v1953_v49 = vrot.slane %v1952_v22, 4  ;;  %v1934_v48 = vmax.f32 %v1926_v57, 0.0 }
 0x57f   :  { %v1948_v11 = vrot.slane %v1947_v13, 2  ;;  %v1961_v12 = vadd.f32 %v1960_v35, %v1959_v45  ;;  %v1933_v37 = vmax.f32 %v1925_v19, 0.0  ;;  %v2762_v2 = vpop.f32.mrb[8].mxu1 }
 0x580   :  { %v1942_v17 = vadd.f32 %v1941_v42, %v1940_v52  ;;  %v1954_v32 = vadd.f32 %v1953_v49, %v1952_v22  ;;  %v1973_v36 = vsel %vm1937_vm10, %v1934_v48, 0.0  ;;  %v1928_v20 = vadd.f32 %v2762_v2, %v1912_v27  ;;  %v1822_v4 = vpop.f32.mrb[9].mxu1  ;;  %v2105_v2 = vld [vmem:[%s5102_s13 + $0x8] sm:$0xff] }
 0x581   :  { %v1949_v5 = vadd.f32 %v1948_v11, %v1947_v13  ;;  %v1962_v47 = vrot.slane %v1961_v12, 2  ;;  %v1974_v31 = vrot.slane %v1973_v36, 4  ;;  %v1966_v1 = vsel %vm1937_vm10, %v1933_v37, 0.0  ;;  %v2104_v37 = vld [vmem:[%s5102_s13] sm:$0xff] }
 0x582   :  { %v1943_v25 = vrot.slane %v1942_v17, 1  ;;  %v1955_v50 = vrot.slane %v1954_v32, 2  ;;  %v1967_v61 = vrot.slane %v1966_v1, 4  ;;  %v1936_v54 = vmax.f32 %v1928_v20, 0.0  ;;  %v2106_v20 = vld [vmem:[%s5102_s13 + $0x10] sm:$0xff] }
 0x583   :  { %v1950_v60 = vrot.slane %v1949_v5, 1  ;;  %v1963_v44 = vadd.f32 %v1962_v47, %v1961_v12  ;;  %v1975_v16 = vadd.f32 %v1974_v31, %v1973_v36  ;;  %v1927_v58 = vadd.f32 %v1908_v43, %v1822_v4  ;;  %v2107_v4 = vld [vmem:[%s5102_s13 + $0x18] sm:$0xff]  ;;  %v2108_v31 = vld [vmem:[%s5102_s13 + $0x20] sm:$0xff] }
 0x584   :  { %v1944_v38 = vadd.f32 %v1943_v25, %v1942_v17  ;;  %v1956_v55 = vadd.f32 %v1955_v50, %v1954_v32  ;;  %v1968_v56 = vadd.f32 %v1967_v61, %v1966_v1  ;;  %v1987_v15 = vsel %vm1937_vm10, %v1936_v54, 0.0  ;;  %v2109_v1 = vld [vmem:[%s5102_s13 + $0x28] sm:$0xff]  ;;  %v2110_v50 = vld [vmem:[%s5102_s13 + $0x30] sm:$0xff]  ;;  %v2111_v61 = vld [vmem:[%s5102_s13 + $0x38] sm:$0xff] }
 0x585   :  { %v1951_v8 = vadd.f32 %v1950_v60, %v1949_v5  ;;  %v1964_v53 = vrot.slane %v1963_v44, 1  ;;  %v1976_v30 = vrot.slane %v1975_v16, 2  ;;  %v1988_v34 = vrot.slane %v1987_v15, 4  ;;  %v2112_v60 = vld [vmem:[%s5102_s13 + $0x40] sm:$0xff] }
 0x586   :  { %v1994_v63 = vmul.f32 0.125, %v1944_v38  ;;  %v1957_v59 = vrot.slane %v1956_v55, 1  ;;  %v1969_v6 = vrot.slane %v1968_v56, 2  ;;  %v1935_v23 = vmax.f32 %v1927_v58, 0.0  ;;  %v2114_v58 = vld [vmem:[%s5102_s13 + $0x50] sm:$0xff]  ;;  %v2115_v38 = vld [vmem:[%s5102_s13 + $0x58] sm:$0xff] }
 0x587   :  { %v1995_v40 = vmul.f32 0.125, %v1951_v8  ;;  %v1965_v18 = vadd.f32 %v1964_v53, %v1963_v44  ;;  %v1977_v29 = vadd.f32 %v1976_v30, %v1975_v16  ;;  %v1989_v14 = vadd.f32 %v1988_v34, %v1987_v15  ;;  %v2113_v44 = vld [vmem:[%s5102_s13 + $0x48] sm:$0xff]  ;;  %v2118_v53 = vld [vmem:[%s5102_s13 + $0x70] sm:$0xff]  ;;  %v2119_v30 = vld [vmem:[%s5102_s13 + $0x78] sm:$0xff] }
 0x588   :  { %v1958_v9 = vadd.f32 %v1957_v59, %v1956_v55  ;;  %v1970_v41 = vadd.f32 %v1969_v6, %v1968_v56  ;;  %v1980_v39 = vsel %vm1937_vm10, %v1935_v23, 0.0  ;;  %v2976_v32 = vpack.c.bf16 %v2105_v2, %v2104_v37  ;;  %v2116_v56 = vld [vmem:[%s5102_s13 + $0x60] sm:$0xff]  ;;  %v2117_v15 = vld [vmem:[%s5102_s13 + $0x68] sm:$0xff]  ;;  %v2135_v59 = vld [vmem:[%s5103_s14 + $0x78] sm:$0xff] }
 0x589   :  { %v2025_v46 = vsel %vm1612_vm3, %v1995_v40, %v1994_v63  ;;  %v1997_v21 = vmul.f32 0.125, %v1965_v18  ;;  %v1978_v3 = vrot.slane %v1977_v29, 1  ;;  %v1990_v24 = vrot.slane %v1989_v14, 2  ;;  %v2134_v63 = vld [vmem:[%s5103_s14 + $0x70] sm:$0xff]  ;;  %v2372_v23 = vld [vmem:[%s5106_s17] sm:$0xff]  ;;  %v2373_v40 = vld [vmem:[%s5106_s17 + $0x8] sm:$0xff] }
 0x58a   :  { %v1996_v0 = vmul.f32 0.125, %v1958_v9  ;;  %v1971_v10 = vrot.slane %v1970_v41, 1  ;;  %v1981_v28 = vrot.slane %v1980_v39, 4  ;;  %v2979_v47 = vpack.c.bf16 %v2107_v4, %v2106_v20  ;;  %v2601_v18 = vld [vmem:[#allocation20] ss:$0 sm:$0xff]  ;;  %v2386_v2 = vld [vmem:[%s5106_s17 + $0x70] sm:$0xff] }
 0x58b   :  { %v1979_v51 = vadd.f32 %v1978_v3, %v1977_v29  ;;  %v1991_v62 = vadd.f32 %v1990_v24, %v1989_v14  ;;  %v2982_v25 = vpack.c.bf16 %v2109_v1, %v2108_v31  ;;  %v2985_v54 = vpack.c.bf16 %v2111_v61, %v2110_v50  ;;  %v2280_v29 = vld [vmem:[#allocation22] sm:$0xff]  ;;  %v2281_v14 = vld [vmem:[#allocation22 + $0x8] sm:$0xff]  ;;  %v2470_v31 = vld [vmem:[%s5108_s19 + $0x20] sm:$0xff] }
 0x58c   :  { %v2026_v52 = vsel %vm1614_vm4, %v1996_v0, %v2025_v46  ;;  %v1972_v45 = vadd.f32 %v1971_v10, %v1970_v41  ;;  %v1982_v57 = vadd.f32 %v1981_v28, %v1980_v39  ;;  %v2988_v16 = vpack.c.bf16 %v2113_v44, %v2112_v60  ;;  %v2375_v3 = vld [vmem:[%s5106_s17 + $0x18] sm:$0xff]  ;;  %v2283_v28 = vld [vmem:[#allocation22 + $0x18] sm:$0x7]  ;;  %v2468_v20 = vld [vmem:[%s5108_s19 + $0x10] sm:$0xff] }
 0x58d   :  { %v2027_v26 = vsel %vm1616_vm5, %v1997_v21, %v2026_v52  ;;  %v1999_v22 = vmul.f32 0.125, %v1979_v51  ;;  %v1992_v19 = vrot.slane %v1991_v62, 1  ;;  %v2991_v55 = vpack.c.bf16 %v2115_v38, %v2114_v58  ;;  %v2374_v21 = vld [vmem:[%s5106_s17 + $0x10] sm:$0xff]  ;;  %v2282_v10 = vld [vmem:[#allocation22 + $0x10] sm:$0xff]  ;;  %v2377_v52 = vld [vmem:[%s5106_s17 + $0x28] sm:$0xff] }
 0x58e   :  { %v1998_v13 = vmul.f32 0.125, %v1972_v45  ;;  %v1983_v35 = vrot.slane %v1982_v57, 2  ;;  %v2994_v8 = vpack.c.bf16 %v2117_v15, %v2116_v56  ;;  %v2997_v34 = vpack.c.bf16 %v2119_v30, %v2118_v53  ;;  %v2471_v1 = vld [vmem:[%s5108_s19 + $0x28] sm:$0xff]  ;;  %v2606_v30 = vld [vmem:[#allocation25] ss:$0 sm:$0xff] }
 0x58f   :  { %v1993_v11 = vadd.f32 %v1992_v19, %v1991_v62  ;;  %v2973_v6 = vpack.c.bf16 %v2135_v59, %v2134_v63  ;;  %v3007_v41 = vpack.c.bf16 %v2373_v40, %v2372_v23  ;;  %v3000_v24 = vpack.c.bf16 %v2281_v14, %v2280_v29  ;;  %v2376_v62 = vld [vmem:[%s5106_s17 + $0x20] sm:$0xff]  ;;  %v2605_v58 = vld [vmem:[#allocation23] ss:$0 sm:$0xff]  ;;  %v2607_v23 = vld [vmem:[#allocation26] ss:$0 sm:$0xff] }
 0x590   :  { %v2028_v42 = vsel %vm1618_vm6, %v1998_v13, %v2027_v26  ;;  %v1984_v49 = vadd.f32 %v1983_v35, %v1982_v57  ;;  %v3010_v51 = vpack.c.bf16 %v2375_v3, %v2374_v21  ;;  %v3003_v45 = vpack.c.bf16 %v2283_v28, %v2282_v10  ;;  %v2378_v26 = vld [vmem:[%s5106_s17 + $0x30] sm:$0xff]  ;;  %v2379_v13 = vld [vmem:[%s5106_s17 + $0x38] sm:$0xff]  ;;  %v2279_v35 = vld [vmem:[#allocation7] sm:$0xf] }
 0x591   :  { %v2029_v48 = vsel %vm1620_vm7, %v1999_v22, %v2028_v42  ;;  %v2001_v17 = vmul.f32 0.125, %v1993_v11  ;;  %2974 = vmatpush3.bf16.msra.mxu1 %v2973_v6  ;;  %v3013_v57 = vpack.c.bf16 %v2377_v52, %v2376_v62  ;;  %v3016_v22 = vpack.c.bf16 %v2379_v13, %v2378_v26  ;;  %v2380_v19 = vld [vmem:[%s5106_s17 + $0x40] sm:$0xff]  ;;  %v2381_v42 = vld [vmem:[%s5106_s17 + $0x48] sm:$0xff] }
 0x592   :  { %v1985_v27 = vrot.slane %v1984_v49, 1  ;;  %2999 = vmatprep.subr.bf16.mxu1 %v3612_v33  ;;  %v2384_v11 = vld [vmem:[%s5106_s17 + $0x60] sm:$0xff] }
 0x594   :  { %v1986_v12 = vadd.f32 %v1985_v27, %v1984_v49  ;;  %v3019_v49 = vpack.c.bf16 %v2381_v42, %v2380_v19 }
 0x596   :  { %v2000_v43 = vmul.f32 0.125, %v1986_v12  ;;  %v2385_v12 = vld [vmem:[%s5106_s17 + $0x68] sm:$0xff] }
 0x597   :  { %v3025_v37 = vpack.c.bf16 %v2385_v12, %v2384_v11 }
 0x598   :  { %v2030_v36 = vsel %vm1622_vm8, %v2000_v43, %v2029_v48  ;;  %v2382_v48 = vld [vmem:[%s5106_s17 + $0x50] sm:$0xff]  ;;  %v2387_v43 = vld [vmem:[%s5106_s17 + $0x78] sm:$0xff] }
 0x599   :  { %v2031_v5 = vsel %vm1624_vm9, %v2001_v17, %v2030_v36  ;;  %v3028_v17 = vpack.c.bf16 %v2387_v43, %v2386_v2  ;;  %v2467_v36 = vld [vmem:[%s5108_s19 + $0x8] sm:$0xff] }
 0x59a   :  { %2780 = vmatmul.mubr.msk.f32.vlgmr.msra.gmra.mrb[8].mxu0 %vm1937_vm10, %v2031_v5  ;;  %v2469_v5 = vld [vmem:[%s5108_s19 + $0x18] sm:$0xff] }
 0x59b   :  { %2977 = vmatpush3.bf16.msra.mxu0 %v2976_v32  ;;  %2849 = vmatprep.mubr.msk.f32.mxu0 %vm3613_vm2, %v3614_v7  ;;  %v2466_v32 = vld [vmem:[%s5108_s19] sm:$0xff] }
 0x59c   :  { %2978 = vmatprep.subr.bf16.mxu0 %v3612_v33  ;;  %v3031_v4 = vpack.c.bf16 %v2467_v36, %v2466_v32 }
 0x59f   :  { %2980 = vmatpush3.bf16.msra.mxu0 %v2979_v47  ;;  %v3034_v47 = vpack.c.bf16 %v2469_v5, %v2468_v20 }
 0x5a0   :  { %2981 = vmatprep.subr.bf16.mxu0 %v3612_v33 }
 0x5a3   :  { %2983 = vmatpush3.bf16.msra.mxu0 %v2982_v25  ;;  %v3037_v25 = vpack.c.bf16 %v2471_v1, %v2470_v31 }
 0x5a4   :  { %2984 = vmatprep.subr.bf16.mxu0 %v3612_v33 }
 0x5a7   :  { %2986 = vmatpush3.bf16.msra.mxu0 %v2985_v54 }
 0x5a8   :  { %2987 = vmatprep.subr.bf16.mxu0 %v3612_v33 }
 0x5ab   :  { %2989 = vmatpush3.bf16.msra.mxu0 %v2988_v16 }
 0x5ac   :  { %2990 = vmatprep.subr.bf16.mxu0 %v3612_v33 }
 0x5af   :  { %2992 = vmatpush3.bf16.msra.mxu0 %v2991_v55 }
 0x5b0   :  { %2993 = vmatprep.subr.bf16.mxu0 %v3612_v33 }
 0x5b3   :  { %2995 = vmatpush3.bf16.msra.mxu0 %v2994_v8  ;;  %v2472_v8 = vld [vmem:[%s5108_s19 + $0x30] sm:$0xff] }
 0x5b4   :  { %2996 = vmatprep.subr.bf16.mxu0 %v3612_v33 }
 0x5b7   :  { %2998 = vmatpush3.bf16.msra.mxu0 %v2997_v34 }
 0x5b8   :  { %3006 = vmatprep.subr.bf16.mxu0 %v3612_v33 }
 0x66d   :  { %v2100_v9 = vpop.f32.mrb[8].mxu0 }
 0x66e   :  { %v2101_v39 = vadd.f32 %v2601_v18, %v2100_v9  ;;  %v2781_v46 = vpop.f32.mrb[9].mxu0 }
 0x670   :  { %v2137_v0 = vrot.slane %v2101_v39, 4  ;;  %2850 = vmatmul.mubr.f32.vlgmr.msra.gmra.mrb[10].mxu0 %v2101_v39 }
 0x671   :  { %3008 = vmatpush3.bf16.msra.mxu0 %v3007_v41  ;;  %2895 = vmatprep.mubr.msk.f32.mxu0 %vm3613_vm2, %v3614_v7 }
 0x672   :  { %2815 = vmatmul.mubr.f32.vlgmr.msra.gmra.mrb[10].mxu1 %v2137_v0  ;;  %3009 = vmatprep.subr.bf16.mxu0 %v3612_v33 }
 0x673   :  { %3001 = vmatpush3.bf16.msra.mxu1 %v3000_v24  ;;  %2860 = vmatprep.mubr.msk.f32.mxu1 %vm3613_vm2, %v3614_v7 }
 0x674   :  { %3002 = vmatprep.subr.bf16.mxu1 %v3612_v33 }
 0x675   :  { %3011 = vmatpush3.bf16.msra.mxu0 %v3010_v51 }
 0x676   :  { %3012 = vmatprep.subr.bf16.mxu0 %v3612_v33 }
 0x677   :  { %3005 = vmatpush3.bf16.msk.msra.mxu1 %vm3004_vm13, %v3003_v45 }
 0x678   :  { %3030 = vmatprep.subr.bf16.mxu1 %v3612_v33 }
 0x679   :  { %3014 = vmatpush3.bf16.msra.mxu0 %v3013_v57 }
 0x67a   :  { %2861 = vmatmul.mubr.msk.f32.vlgmr.msra.gmra.mrb[12].mxu1 %vm2284_vm14, %v2279_v35  ;;  %3015 = vmatprep.subr.bf16.mxu0 %v3612_v33 }
 0x67b   :  { %2914 = vmatprep.mubr.msk.f32.mxu1 %vm3613_vm2, %v3614_v7  ;;  %v2383_v7 = vld [vmem:[%s5106_s17 + $0x58] sm:$0xff]  ;;  %3032 = vmatpush3.bf16.msra.mxu1 %v3031_v4 }
 0x67c   :  { %v3022_v27 = vpack.c.bf16 %v2383_v7, %v2382_v48  ;;  %3033 = vmatprep.subr.bf16.mxu1 %v3612_v33 }
 0x67d   :  { %3017 = vmatpush3.bf16.msra.mxu0 %v3016_v22 }
 0x67e   :  { %3018 = vmatprep.subr.bf16.mxu0 %v3612_v33 }
 0x67f   :  { %3035 = vmatpush3.bf16.msra.mxu1 %v3034_v47 }
 0x680   :  { %3036 = vmatprep.subr.bf16.mxu1 %v3612_v33 }
 0x681   :  { %3020 = vmatpush3.bf16.msra.mxu0 %v3019_v49 }
 0x682   :  { %3021 = vmatprep.subr.bf16.mxu0 %v3612_v33 }
 0x683   :  { %3038 = vmatpush3.bf16.msra.mxu1 %v3037_v25 }
 0x684   :  { %3039 = vmatprep.subr.bf16.mxu1 %v3612_v33 }
 0x685   :  { %3023 = vmatpush3.bf16.msra.mxu0 %v3022_v27 }
 0x686   :  { %3024 = vmatprep.subr.bf16.mxu0 %v3612_v33 }
 0x689   :  { %3026 = vmatpush3.bf16.msra.mxu0 %v3025_v37 }
 0x68a   :  { %3027 = vmatprep.subr.bf16.mxu0 %v3612_v33  ;;  %v2473_v33 = vld [vmem:[%s5108_s19 + $0x38] sm:$0xff] }
 0x68b   :  { %v3040_v53 = vpack.c.bf16 %v2473_v33, %v2472_v8 }
 0x68d   :  { %3029 = vmatpush3.bf16.msra.mxu0 %v3028_v17  ;;  %3041 = vmatpush3.bf16.msra.mxu1 %v3040_v53 }
 0x743   :  { %v2275_v50 = vpop.f32.mrb[10].mxu0 }
 0x744   :  { %v2851_v61 = vpop.f32.mrb[11].mxu0 }
 0x745   :  { %v2205_v54 = vpop.f32.mrb[10].mxu1 }
 0x746   :  { %v2276_v60 = vadd.f32 %v2275_v50, %v2205_v54  ;;  %v2816_v44 = vpop.f32.mrb[11].mxu1 }
 0x74d   :  { %v2358_v16 = vpop.f32.mrb[12].mxu1 }
 0x74e   :  { %v2362_v38 = vadd.f32 %v2358_v16, %v2276_v60  ;;  %v2862_v55 = vpop.f32.mrb[13].mxu1 }
 0x750   :  { %v2370_v56 = vadd.f32 %v2605_v58, %v2362_v38 }
 0x752   :  { %v2371_v15 = vmax.f32 %v2370_v56, 0.0 }
 0x754   :  { %2896 = vmatmul.mubr.f32.vlgmr.msra.gmra.mrb[12].mxu0 %v2371_v15 }
 0x827   :  { %v2461_v34 = vpop.f32.mrb[12].mxu0 }
 0x828   :  { %v2462_v63 = vadd.f32 %v2606_v30, %v2461_v34  ;;  %v2897_v59 = vpop.f32.mrb[13].mxu0 }
 0x82a   :  { %v2465_v6 = vmax.f32 %v2462_v63, 0.0 }
 0x82c   :  { %2915 = vmatmul.mubr.msk.f32.vlgmr.msra.gmra.mrb[14].mxu1 %vm1937_vm10, %v2465_v6 }
 0x8ff   :  { %v2550_v40 = vpop.f32.mrb[14].mxu1 }
 0x900   :  { %v2551_v18 = vadd.f32 %v2607_v23, %v2550_v40  ;;  %v2916_v29 = vpop.f32.mrb[15].mxu1 }
 0x902   :  { %2555 = vst.msk [vmem:[#allocation28] sm:$0xf] %vm2554_vm15, %v2551_v18 }
 0x903   :  { %3547 = shalt.err (!%p3544_p6)
}
 0x904   :  { %s3548_s28 = scalar_lea.hbm %s5110_s21, 64 }
 0x905   :  { %p3549_p7 = scmp.ne.s32.totalorder %s5110_s21, %s3548_s28  ;;  %p3552_p8 = scmp.lt.u32.totalorder %s3548_s28, %s5110_s21 }
 0x907   :  { %p3554_p9 = pnand %p3552_p8, %p3549_p7 }
 0x909   :  { %3557 = shalt.err (!%p3554_p9)
}
 0x90a   :  { %2565 = dma.vmem_to_hbm [thread:$0]  %s2563_s9, 64, %s5110_s21, [#allocation4]  }
 0x90b   :  { %3576 = dma.done.wait [#allocation4], 64  }
 0x90c   :  { %3577 = vsyncadd [#allocation4], 4294967232 }
 0x90d   :  { %2569 = vsyncpa [#allocation3], 1 }
 0x90e   :  { %2570 = vsyncpa [#allocation6], 1 }
 0x90f   :  { %2571 = vsyncpa [#allocation9], 1 }
 0x910   :  { %2572 = vsyncpa [#allocation12], 1 }
 0x911   :  { %2573 = vsyncpa [#allocation15], 1 }
 0x912   :  { %2574 = vsyncpa [#allocation18], 1 }
 0x913   :  { %2575 = vsyncpa [#allocation21], 1 }
 0x914   :  { %2576 = vsyncpa [#allocation24], 1 }
 0x915   :  { %2577 = vsyncpa [#allocation27], 1 }
 0x916   :  { %2578 = vsyncpa [#allocation4], 1 }

</bundles_post_ra>
